<compile_context>
chip_gen: v7x
topology: tpu7x:2x2x1
jax: 0.10.0
libtpu: 0.0.40
codegen_flags: <defaults>
</compile_context>

<pallas_src>
import functools

import jax
import jax.numpy as jnp
import numpy as np
from jax.experimental import pallas as pl
from jax.experimental.pallas import tpu as pltpu

# Native MXU input dtype on v5e/v6e/v7x; accumulation stays f32 via
# preferred_element_type, elementwise math and skip paths stay f32.
MXU_DTYPE = jnp.bfloat16


# --------------------------------------------------------------------------
# Fused Pallas kernel: whole BodyModel forward for all images at once.
# Activations are (B*H, W*C); one bf16 matmul per conv.
# --------------------------------------------------------------------------
def _make_body_kernel(B, H, WC, depth):
    M = B * H

    def kernel(x_ref, w_ref, s_ref, o_ref):
        x0 = x_ref[...]                                           # (M, WC) f32

        # Per-image vertical boundary masks (batch is folded into the rows).
        row = jax.lax.broadcasted_iota(jnp.int32, (M, WC), 0)
        has_up = (row % H) != 0            # row h-1 exists inside the image
        has_dn = (row % H) != (H - 1)      # row h+1 exists inside the image

        def conv_bn(v, li):
            # 3x3 SAME conv + folded BN for conv index `li`, as ONE matmul.
            up = jnp.where(has_up, pltpu.roll(v, shift=1, axis=0), 0.0)
            dn = jnp.where(has_dn, pltpu.roll(v, shift=M - 1, axis=0), 0.0)
            operand = jnp.concatenate([up, v, dn], axis=-1).astype(MXU_DTYPE)
            acc = jnp.dot(operand, w_ref[li],                     # (M, WC) f32
                          preferred_element_type=jnp.float32)
            return acc + s_ref[pl.ds(li, 1), :]                   # + (1, WC)

        def mini(v, li):                                          # ResidualMiniBlock
            z = conv_bn(v, li)
            z = jnp.maximum(z, 0.0)
            z = conv_bn(z, li + 1)
            return v + z

        cur = x0
        li = 0
        for _ in range(depth):                                    # ResidualMaxiBlocks
            blk_in = cur
            for _ in range(3):
                cur = mini(cur, li)
                li += 2
            cur = blk_in + cur
        cur = mini(cur, li)                                       # trailing mini block
        o_ref[...] = (x0 + cur).astype(o_ref.dtype)               # body skip

    return kernel


# --------------------------------------------------------------------------
# Weight folding (numpy, done once outside jit):
# conv(3,3,C,C) + BN scale -> ONE (3*W*C, W*C) block-Toeplitz matrix whose
# row blocks are ordered [up | same | down], plus a per-channel shift tiled
# to width W*C.
# --------------------------------------------------------------------------
def _fold_conv_np(w_hwio, scale, shift, W):
    C = w_hwio.shape[-1]
    ws = np.asarray(w_hwio, np.float32) * np.asarray(scale, np.float32)[None, None, None, :]
    blocks = []
    for ky in range(3):                                           # dy = ky - 1
        m = np.zeros((W * C, W * C), np.float32)
        for kx in range(3):                                       # dx = kx - 1
            # M[w_in*C+ci, w_out*C+co] = K[ky,kx,ci,co]*scale[co] iff w_in-w_out == dx
            m += np.kron(np.eye(W, k=-(kx - 1), dtype=np.float32), ws[ky, kx])
        blocks.append(m)
    wmat = np.concatenate(blocks, axis=0)                         # (3*WC, WC)
    wshift = np.tile(np.asarray(shift, np.float32), W)            # (WC,)
    return wmat, wshift


def fold_params(params, W):
    convs = []
    for maxi in params["maxi"]:
        for mp in maxi:
            convs.append((mp["w1"], mp["s1"], mp["b1"]))
            convs.append((mp["w2"], mp["s2"], mp["b2"]))
    mp = params["final"]
    convs.append((mp["w1"], mp["s1"], mp["b1"]))
    convs.append((mp["w2"], mp["s2"], mp["b2"]))
    folded = [_fold_conv_np(w, s, b, W) for (w, s, b) in convs]
    wmat = jnp.asarray(np.stack([f[0] for f in folded]), dtype=MXU_DTYPE)   # (n_conv, 3*WC, WC)
    wshift = jnp.asarray(np.stack([f[1] for f in folded]), dtype=jnp.float32)  # (n_conv, WC)
    return wmat, wshift


# --------------------------------------------------------------------------
# BodyModel forward (Pallas): one pallas_call, single grid step.
# --------------------------------------------------------------------------
def body_forward_pallas(x_nchw, wmat, wshift, depth):
    B, C, H, W = x_nchw.shape
    WC = W * C
    M = B * H
    n_conv = wmat.shape[0]

    # Lane-dense layout, batch folded into the row (M) dimension.
    x2 = jnp.transpose(x_nchw, (0, 2, 3, 1)).reshape(M, WC)

    kernel = _make_body_kernel(B, H, WC, depth)
    grid_spec = pltpu.PrefetchScalarGridSpec(
        num_scalar_prefetch=0,
        grid=(1,),
        in_specs=[
            pl.BlockSpec((M, WC), lambda i: (0, 0)),                  # activations
            pl.BlockSpec((n_conv, 3 * WC, WC), lambda i: (0, 0, 0)),  # folded weights
            pl.BlockSpec((n_conv, WC), lambda i: (0, 0)),             # per-conv shifts
        ],
        out_specs=pl.BlockSpec((M, WC), lambda i: (0, 0)),
    )
    y2 = pl.pallas_call(
        kernel,
        out_shape=jax.ShapeDtypeStruct((M, WC), jnp.float32),
        grid_spec=grid_spec,
        compiler_params=pltpu.CompilerParams(
            dimension_semantics=("arbitrary",)),
    )(x2, wmat, wshift)
    return jnp.transpose(y2.reshape(B, H, W, C), (0, 3, 1, 2))


# --------------------------------------------------------------------------
# Pure-JAX reference (same math, lax.conv) for the self-check.
# --------------------------------------------------------------------------
def body_forward_ref(x_nchw, params):
    x = jnp.transpose(x_nchw, (0, 2, 3, 1))                       # NHWC

    def conv(z, w):
        return jax.lax.conv_general_dilated(
            z, w, (1, 1), "SAME",
            dimension_numbers=("NHWC", "HWIO", "NHWC"))

    def mini(z, p):
        t = conv(z, p["w1"]) * p["s1"] + p["b1"]
        t = jnp.maximum(t, 0.0)
        t = conv(t, p["w2"]) * p["s2"] + p["b2"]
        return z + t

    tmp = x
    for maxi in params["maxi"]:
        blk_in = tmp
        z = blk_in
        for mp in maxi:
            z = mini(z, mp)
        tmp = blk_in + z
    tmp = mini(tmp, params["final"])
    y = x + tmp
    return jnp.transpose(y, (0, 3, 1, 2))


# --------------------------------------------------------------------------
# Deterministic parameter init (conv bias + BN folded into scale/shift).
# --------------------------------------------------------------------------
def init_mini_params(key, C, eps=1e-5):
    ks = jax.random.split(key, 12)

    def make(kw, kb, kg, kbe, km, kv):
        w = 0.05 * jax.random.normal(kw, (3, 3, C, C), jnp.float32)   # HWIO
        cbias = 0.05 * jax.random.normal(kb, (C,), jnp.float32)
        gamma = 1.0 + 0.1 * jax.random.normal(kg, (C,), jnp.float32)
        beta = 0.1 * jax.random.normal(kbe, (C,), jnp.float32)
        rmean = 0.1 * jax.random.normal(km, (C,), jnp.float32)
        rvar = 1.0 + 0.2 * jax.random.uniform(kv, (C,), jnp.float32)
        scale = gamma / jnp.sqrt(rvar + eps)
        shift = beta + scale * (cbias - rmean)
        return w, scale, shift

    w1, s1, b1 = make(*ks[0:6])
    w2, s2, b2 = make(*ks[6:12])
    return dict(w1=w1, s1=s1, b1=b1, w2=w2, s2=s2, b2=b2)


def init_params(key, C, depth):
    maxi = []
    for _ in range(depth):
        sub = []
        for _ in range(3):
            key, k = jax.random.split(key)
            sub.append(init_mini_params(k, C))
        maxi.append(sub)
    key, k = jax.random.split(key)
    return dict(maxi=maxi, final=init_mini_params(k, C))


# --------------------------------------------------------------------------
if __name__ == "__main__":
    B, C, H, W = 2, 8, 16, 16          # W*C = 128 -> lane-dense activations
    depth = 2

    key = jax.random.PRNGKey(0)
    key, kx, kp = jax.random.split(key, 3)
    x = jax.random.normal(kx, (B, C, H, W), jnp.float32)   # NCHW like PyTorch
    params = init_params(kp, C, depth)

    # Fold conv + BN into the block-Toeplitz matmul weights ONCE, outside jit.
    wmat, wshift = fold_params(params, W)

    fwd = jax.jit(functools.partial(body_forward_pallas, depth=depth))
    y = jax.block_until_ready(fwd(x, wmat, wshift))

    y_ref = np.asarray(body_forward_ref(x, params))
    y_np = np.asarray(y)
    max_diff = float(np.max(np.abs(y_np - y_ref)))
    scale = float(np.max(np.abs(y_ref))) + 1.0
    assert y_np.shape == (B, C, H, W)
    # bf16 MXU operands through a 14-conv dependent chain -> loosened tolerance.
    assert max_diff <= 2e-2 * scale, f"mismatch: max_diff={max_diff}"

    print("KERNEL_OK")
</pallas_src>

<mosaic_0001>
module attributes {stable_mosaic.version = 11 : i64} {
  func.func @kernel(%arg0: i32, %arg1: memref<32x128xf32, #tpu.memory_space<vmem>>, %arg2: memref<14x384x128xbf16, #tpu.memory_space<vmem>>, %arg3: memref<14x128xf32, #tpu.memory_space<vmem>>, %arg4: memref<32x128xf32, #tpu.memory_space<vmem>>) attributes {dimension_semantics = [#tpu.dimension_semantics<arbitrary>], iteration_bounds = array<i64: 1>, scalar_prefetch = 0 : i64, scratch_operands = 0 : i64, tpu.core_type = #tpu.core_type<tc>, window_params = [{pipeline_mode = #tpu.pipeline_mode<synchronous>, transform_indices = @transform_0, window_bounds = array<i64: 32, 128>}, {pipeline_mode = #tpu.pipeline_mode<synchronous>, transform_indices = @transform_1, window_bounds = array<i64: 14, 384, 128>}, {pipeline_mode = #tpu.pipeline_mode<synchronous>, transform_indices = @transform_2, window_bounds = array<i64: 14, 128>}, {pipeline_mode = #tpu.pipeline_mode<synchronous>, transform_indices = @transform_3, window_bounds = array<i64: 32, 128>}]} {
    %c0 = arith.constant 0 : index
    %c0_0 = arith.constant 0 : index
    %0 = vector.load %arg1[%c0, %c0_0] : memref<32x128xf32, #tpu.memory_space<vmem>>, vector<32x128xf32>
    %1 = tpu.iota {dimensions = array<i32: 0>} : vector<32x128xi32>
    %c16_i32 = arith.constant 16 : i32
    %c0_i32 = arith.constant 0 : i32
    %2 = arith.cmpi eq, %c16_i32, %c0_i32 : i32
    %c1_i32 = arith.constant 1 : i32
    %3 = arith.select %2, %c1_i32, %c16_i32 : i32
    %4 = vector.broadcast %3 : i32 to vector<32x128xi32>
    %5 = arith.remsi %1, %4 : vector<32x128xi32>
    %c0_i32_1 = arith.constant 0 : i32
    %6 = vector.broadcast %c0_i32_1 : i32 to vector<32x128xi32>
    %7 = arith.cmpi ne, %5, %6 : vector<32x128xi32>
    %c0_i32_2 = arith.constant 0 : i32
    %8 = vector.broadcast %c0_i32_2 : i32 to vector<32x128xi32>
    %9 = arith.cmpi slt, %5, %8 : vector<32x128xi32>
    %c0_i32_3 = arith.constant 0 : i32
    %10 = arith.cmpi slt, %3, %c0_i32_3 : i32
    %11 = vector.broadcast %10 : i1 to vector<32x128xi1>
    %12 = vector.broadcast %11 : vector<32x128xi1> to vector<32x128xi1>
    %13 = arith.xori %9, %12 : vector<32x128xi1>
    %14 = arith.andi %13, %7 : vector<32x128xi1>
    %15 = vector.broadcast %3 : i32 to vector<32x128xi32>
    %16 = arith.addi %5, %15 : vector<32x128xi32>
    %17 = arith.select %14, %16, %5 : vector<32x128xi1>, vector<32x128xi32>
    %c0_i32_4 = arith.constant 0 : i32
    %18 = vector.broadcast %c0_i32_4 : i32 to vector<32x128xi32>
    %19 = arith.cmpi ne, %17, %18 : vector<32x128xi32>
    %c16_i32_5 = arith.constant 16 : i32
    %c0_i32_6 = arith.constant 0 : i32
    %20 = arith.cmpi eq, %c16_i32_5, %c0_i32_6 : i32
    %c1_i32_7 = arith.constant 1 : i32
    %21 = arith.select %20, %c1_i32_7, %c16_i32_5 : i32
    %22 = vector.broadcast %21 : i32 to vector<32x128xi32>
    %23 = arith.remsi %1, %22 : vector<32x128xi32>
    %c0_i32_8 = arith.constant 0 : i32
    %24 = vector.broadcast %c0_i32_8 : i32 to vector<32x128xi32>
    %25 = arith.cmpi ne, %23, %24 : vector<32x128xi32>
    %c0_i32_9 = arith.constant 0 : i32
    %26 = vector.broadcast %c0_i32_9 : i32 to vector<32x128xi32>
    %27 = arith.cmpi slt, %23, %26 : vector<32x128xi32>
    %c0_i32_10 = arith.constant 0 : i32
    %28 = arith.cmpi slt, %21, %c0_i32_10 : i32
    %29 = vector.broadcast %28 : i1 to vector<32x128xi1>
    %30 = vector.broadcast %29 : vector<32x128xi1> to vector<32x128xi1>
    %31 = arith.xori %27, %30 : vector<32x128xi1>
    %32 = arith.andi %31, %25 : vector<32x128xi1>
    %33 = vector.broadcast %21 : i32 to vector<32x128xi32>
    %34 = arith.addi %23, %33 : vector<32x128xi32>
    %35 = arith.select %32, %34, %23 : vector<32x128xi1>, vector<32x128xi32>
    %c15_i32 = arith.constant 15 : i32
    %36 = vector.broadcast %c15_i32 : i32 to vector<32x128xi32>
    %37 = arith.cmpi ne, %35, %36 : vector<32x128xi32>
    %c1_i32_11 = arith.constant 1 : i32
    %38 = tpu.dynamic_rotate %0 by %c1_i32_11 dim 0 : vector<32x128xf32>, i32 -> vector<32x128xf32>
    %cst = arith.constant 0.000000e+00 : f32
    %39 = vector.broadcast %cst : f32 to vector<32x128xf32>
    %40 = arith.select %19, %38, %39 : vector<32x128xi1>, vector<32x128xf32>
    %c31_i32 = arith.constant 31 : i32
    %41 = tpu.dynamic_rotate %0 by %c31_i32 dim 0 : vector<32x128xf32>, i32 -> vector<32x128xf32>
    %cst_12 = arith.constant 0.000000e+00 : f32
    %42 = vector.broadcast %cst_12 : f32 to vector<32x128xf32>
    %43 = arith.select %37, %41, %42 : vector<32x128xi1>, vector<32x128xf32>
    %44 = tpu.concatenate %40, %0, %43 in 1 : vector<32x128xf32>, vector<32x128xf32>, vector<32x128xf32> -> vector<32x384xf32>
    %45 = arith.truncf %44 : vector<32x384xf32> to vector<32x384xbf16>
    %c0_13 = arith.constant 0 : index
    %c0_14 = arith.constant 0 : index
    %c0_15 = arith.constant 0 : index
    %46 = vector.load %arg2[%c0_13, %c0_14, %c0_15] : memref<14x384x128xbf16, #tpu.memory_space<vmem>>, vector<1x384x128xbf16>
    %47 = vector.shape_cast %46 : vector<1x384x128xbf16> to vector<384x128xbf16>
    %cst_16 = arith.constant dense<0.000000e+00> : vector<32x128xf32>
    %48 = tpu.matmul %45, %47, %cst_16 {dimension_numbers = #tpu.dot_dimension_numbers<[1], [0], [0], [1], [0, 0, 1, 1], [], []>} : vector<32x384xbf16>, vector<384x128xbf16>, vector<32x128xf32> -> vector<32x128xf32>
    %c0_17 = arith.constant 0 : index
    %c0_18 = arith.constant 0 : index
    %49 = vector.load %arg3[%c0_17, %c0_18] : memref<14x128xf32, #tpu.memory_space<vmem>>, vector<1x128xf32>
    %50 = vector.broadcast %49 : vector<1x128xf32> to vector<32x128xf32>
    %51 = arith.addf %48, %50 : vector<32x128xf32>
    %cst_19 = arith.constant 0.000000e+00 : f32
    %52 = vector.broadcast %cst_19 : f32 to vector<32x128xf32>
    %53 = arith.maximumf %51, %52 : vector<32x128xf32>
    %c1_i32_20 = arith.constant 1 : i32
    %54 = tpu.dynamic_rotate %53 by %c1_i32_20 dim 0 : vector<32x128xf32>, i32 -> vector<32x128xf32>
    %cst_21 = arith.constant 0.000000e+00 : f32
    %55 = vector.broadcast %cst_21 : f32 to vector<32x128xf32>
    %56 = arith.select %19, %54, %55 : vector<32x128xi1>, vector<32x128xf32>
    %c31_i32_22 = arith.constant 31 : i32
    %57 = tpu.dynamic_rotate %53 by %c31_i32_22 dim 0 : vector<32x128xf32>, i32 -> vector<32x128xf32>
    %cst_23 = arith.constant 0.000000e+00 : f32
    %58 = vector.broadcast %cst_23 : f32 to vector<32x128xf32>
    %59 = arith.select %37, %57, %58 : vector<32x128xi1>, vector<32x128xf32>
    %60 = tpu.concatenate %56, %53, %59 in 1 : vector<32x128xf32>, vector<32x128xf32>, vector<32x128xf32> -> vector<32x384xf32>
    %61 = arith.truncf %60 : vector<32x384xf32> to vector<32x384xbf16>
    %c1 = arith.constant 1 : index
    %c0_24 = arith.constant 0 : index
    %c0_25 = arith.constant 0 : index
    %62 = vector.load %arg2[%c1, %c0_24, %c0_25] : memref<14x384x128xbf16, #tpu.memory_space<vmem>>, vector<1x384x128xbf16>
    %63 = vector.shape_cast %62 : vector<1x384x128xbf16> to vector<384x128xbf16>
    %cst_26 = arith.constant dense<0.000000e+00> : vector<32x128xf32>
    %64 = tpu.matmul %61, %63, %cst_26 {dimension_numbers = #tpu.dot_dimension_numbers<[1], [0], [0], [1], [0, 0, 1, 1], [], []>} : vector<32x384xbf16>, vector<384x128xbf16>, vector<32x128xf32> -> vector<32x128xf32>
    %c1_27 = arith.constant 1 : index
    %c0_28 = arith.constant 0 : index
    %65 = vector.load %arg3[%c1_27, %c0_28] : memref<14x128xf32, #tpu.memory_space<vmem>>, vector<1x128xf32>
    %66 = vector.broadcast %65 : vector<1x128xf32> to vector<32x128xf32>
    %67 = arith.addf %64, %66 : vector<32x128xf32>
    %68 = arith.addf %0, %67 : vector<32x128xf32>
    %c1_i32_29 = arith.constant 1 : i32
    %69 = tpu.dynamic_rotate %68 by %c1_i32_29 dim 0 : vector<32x128xf32>, i32 -> vector<32x128xf32>
    %cst_30 = arith.constant 0.000000e+00 : f32
    %70 = vector.broadcast %cst_30 : f32 to vector<32x128xf32>
    %71 = arith.select %19, %69, %70 : vector<32x128xi1>, vector<32x128xf32>
    %c31_i32_31 = arith.constant 31 : i32
    %72 = tpu.dynamic_rotate %68 by %c31_i32_31 dim 0 : vector<32x128xf32>, i32 -> vector<32x128xf32>
    %cst_32 = arith.constant 0.000000e+00 : f32
    %73 = vector.broadcast %cst_32 : f32 to vector<32x128xf32>
    %74 = arith.select %37, %72, %73 : vector<32x128xi1>, vector<32x128xf32>
    %75 = tpu.concatenate %71, %68, %74 in 1 : vector<32x128xf32>, vector<32x128xf32>, vector<32x128xf32> -> vector<32x384xf32>
    %76 = arith.truncf %75 : vector<32x384xf32> to vector<32x384xbf16>
    %c2 = arith.constant 2 : index
    %c0_33 = arith.constant 0 : index
    %c0_34 = arith.constant 0 : index
    %77 = vector.load %arg2[%c2, %c0_33, %c0_34] : memref<14x384x128xbf16, #tpu.memory_space<vmem>>, vector<1x384x128xbf16>
    %78 = vector.shape_cast %77 : vector<1x384x128xbf16> to vector<384x128xbf16>
    %cst_35 = arith.constant dense<0.000000e+00> : vector<32x128xf32>
    %79 = tpu.matmul %76, %78, %cst_35 {dimension_numbers = #tpu.dot_dimension_numbers<[1], [0], [0], [1], [0, 0, 1, 1], [], []>} : vector<32x384xbf16>, vector<384x128xbf16>, vector<32x128xf32> -> vector<32x128xf32>
    %c2_36 = arith.constant 2 : index
    %c0_37 = arith.constant 0 : index
    %80 = vector.load %arg3[%c2_36, %c0_37] : memref<14x128xf32, #tpu.memory_space<vmem>>, vector<1x128xf32>
    %81 = vector.broadcast %80 : vector<1x128xf32> to vector<32x128xf32>
    %82 = arith.addf %79, %81 : vector<32x128xf32>
    %cst_38 = arith.constant 0.000000e+00 : f32
    %83 = vector.broadcast %cst_38 : f32 to vector<32x128xf32>
    %84 = arith.maximumf %82, %83 : vector<32x128xf32>
    %c1_i32_39 = arith.constant 1 : i32
    %85 = tpu.dynamic_rotate %84 by %c1_i32_39 dim 0 : vector<32x128xf32>, i32 -> vector<32x128xf32>
    %cst_40 = arith.constant 0.000000e+00 : f32
    %86 = vector.broadcast %cst_40 : f32 to vector<32x128xf32>
    %87 = arith.select %19, %85, %86 : vector<32x128xi1>, vector<32x128xf32>
    %c31_i32_41 = arith.constant 31 : i32
    %88 = tpu.dynamic_rotate %84 by %c31_i32_41 dim 0 : vector<32x128xf32>, i32 -> vector<32x128xf32>
    %cst_42 = arith.constant 0.000000e+00 : f32
    %89 = vector.broadcast %cst_42 : f32 to vector<32x128xf32>
    %90 = arith.select %37, %88, %89 : vector<32x128xi1>, vector<32x128xf32>
    %91 = tpu.concatenate %87, %84, %90 in 1 : vector<32x128xf32>, vector<32x128xf32>, vector<32x128xf32> -> vector<32x384xf32>
    %92 = arith.truncf %91 : vector<32x384xf32> to vector<32x384xbf16>
    %c3 = arith.constant 3 : index
    %c0_43 = arith.constant 0 : index
    %c0_44 = arith.constant 0 : index
    %93 = vector.load %arg2[%c3, %c0_43, %c0_44] : memref<14x384x128xbf16, #tpu.memory_space<vmem>>, vector<1x384x128xbf16>
    %94 = vector.shape_cast %93 : vector<1x384x128xbf16> to vector<384x128xbf16>
    %cst_45 = arith.constant dense<0.000000e+00> : vector<32x128xf32>
    %95 = tpu.matmul %92, %94, %cst_45 {dimension_numbers = #tpu.dot_dimension_numbers<[1], [0], [0], [1], [0, 0, 1, 1], [], []>} : vector<32x384xbf16>, vector<384x128xbf16>, vector<32x128xf32> -> vector<32x128xf32>
    %c3_46 = arith.constant 3 : index
    %c0_47 = arith.constant 0 : index
    %96 = vector.load %arg3[%c3_46, %c0_47] : memref<14x128xf32, #tpu.memory_space<vmem>>, vector<1x128xf32>
    %97 = vector.broadcast %96 : vector<1x128xf32> to vector<32x128xf32>
    %98 = arith.addf %95, %97 : vector<32x128xf32>
    %99 = arith.addf %68, %98 : vector<32x128xf32>
    %c1_i32_48 = arith.constant 1 : i32
    %100 = tpu.dynamic_rotate %99 by %c1_i32_48 dim 0 : vector<32x128xf32>, i32 -> vector<32x128xf32>
    %cst_49 = arith.constant 0.000000e+00 : f32
    %101 = vector.broadcast %cst_49 : f32 to vector<32x128xf32>
    %102 = arith.select %19, %100, %101 : vector<32x128xi1>, vector<32x128xf32>
    %c31_i32_50 = arith.constant 31 : i32
    %103 = tpu.dynamic_rotate %99 by %c31_i32_50 dim 0 : vector<32x128xf32>, i32 -> vector<32x128xf32>
    %cst_51 = arith.constant 0.000000e+00 : f32
    %104 = vector.broadcast %cst_51 : f32 to vector<32x128xf32>
    %105 = arith.select %37, %103, %104 : vector<32x128xi1>, vector<32x128xf32>
    %106 = tpu.concatenate %102, %99, %105 in 1 : vector<32x128xf32>, vector<32x128xf32>, vector<32x128xf32> -> vector<32x384xf32>
    %107 = arith.truncf %106 : vector<32x384xf32> to vector<32x384xbf16>
    %c4 = arith.constant 4 : index
    %c0_52 = arith.constant 0 : index
    %c0_53 = arith.constant 0 : index
    %108 = vector.load %arg2[%c4, %c0_52, %c0_53] : memref<14x384x128xbf16, #tpu.memory_space<vmem>>, vector<1x384x128xbf16>
    %109 = vector.shape_cast %108 : vector<1x384x128xbf16> to vector<384x128xbf16>
    %cst_54 = arith.constant dense<0.000000e+00> : vector<32x128xf32>
    %110 = tpu.matmul %107, %109, %cst_54 {dimension_numbers = #tpu.dot_dimension_numbers<[1], [0], [0], [1], [0, 0, 1, 1], [], []>} : vector<32x384xbf16>, vector<384x128xbf16>, vector<32x128xf32> -> vector<32x128xf32>
    %c4_55 = arith.constant 4 : index
    %c0_56 = arith.constant 0 : index
    %111 = vector.load %arg3[%c4_55, %c0_56] : memref<14x128xf32, #tpu.memory_space<vmem>>, vector<1x128xf32>
    %112 = vector.broadcast %111 : vector<1x128xf32> to vector<32x128xf32>
    %113 = arith.addf %110, %112 : vector<32x128xf32>
    %cst_57 = arith.constant 0.000000e+00 : f32
    %114 = vector.broadcast %cst_57 : f32 to vector<32x128xf32>
    %115 = arith.maximumf %113, %114 : vector<32x128xf32>
    %c1_i32_58 = arith.constant 1 : i32
    %116 = tpu.dynamic_rotate %115 by %c1_i32_58 dim 0 : vector<32x128xf32>, i32 -> vector<32x128xf32>
    %cst_59 = arith.constant 0.000000e+00 : f32
    %117 = vector.broadcast %cst_59 : f32 to vector<32x128xf32>
    %118 = arith.select %19, %116, %117 : vector<32x128xi1>, vector<32x128xf32>
    %c31_i32_60 = arith.constant 31 : i32
    %119 = tpu.dynamic_rotate %115 by %c31_i32_60 dim 0 : vector<32x128xf32>, i32 -> vector<32x128xf32>
    %cst_61 = arith.constant 0.000000e+00 : f32
    %120 = vector.broadcast %cst_61 : f32 to vector<32x128xf32>
    %121 = arith.select %37, %119, %120 : vector<32x128xi1>, vector<32x128xf32>
    %122 = tpu.concatenate %118, %115, %121 in 1 : vector<32x128xf32>, vector<32x128xf32>, vector<32x128xf32> -> vector<32x384xf32>
    %123 = arith.truncf %122 : vector<32x384xf32> to vector<32x384xbf16>
    %c5 = arith.constant 5 : index
    %c0_62 = arith.constant 0 : index
    %c0_63 = arith.constant 0 : index
    %124 = vector.load %arg2[%c5, %c0_62, %c0_63] : memref<14x384x128xbf16, #tpu.memory_space<vmem>>, vector<1x384x128xbf16>
    %125 = vector.shape_cast %124 : vector<1x384x128xbf16> to vector<384x128xbf16>
    %cst_64 = arith.constant dense<0.000000e+00> : vector<32x128xf32>
    %126 = tpu.matmul %123, %125, %cst_64 {dimension_numbers = #tpu.dot_dimension_numbers<[1], [0], [0], [1], [0, 0, 1, 1], [], []>} : vector<32x384xbf16>, vector<384x128xbf16>, vector<32x128xf32> -> vector<32x128xf32>
    %c5_65 = arith.constant 5 : index
    %c0_66 = arith.constant 0 : index
    %127 = vector.load %arg3[%c5_65, %c0_66] : memref<14x128xf32, #tpu.memory_space<vmem>>, vector<1x128xf32>
    %128 = vector.broadcast %127 : vector<1x128xf32> to vector<32x128xf32>
    %129 = arith.addf %126, %128 : vector<32x128xf32>
    %130 = arith.addf %99, %129 : vector<32x128xf32>
    %131 = arith.addf %0, %130 : vector<32x128xf32>
    %c1_i32_67 = arith.constant 1 : i32
    %132 = tpu.dynamic_rotate %131 by %c1_i32_67 dim 0 : vector<32x128xf32>, i32 -> vector<32x128xf32>
    %cst_68 = arith.constant 0.000000e+00 : f32
    %133 = vector.broadcast %cst_68 : f32 to vector<32x128xf32>
    %134 = arith.select %19, %132, %133 : vector<32x128xi1>, vector<32x128xf32>
    %c31_i32_69 = arith.constant 31 : i32
    %135 = tpu.dynamic_rotate %131 by %c31_i32_69 dim 0 : vector<32x128xf32>, i32 -> vector<32x128xf32>
    %cst_70 = arith.constant 0.000000e+00 : f32
    %136 = vector.broadcast %cst_70 : f32 to vector<32x128xf32>
    %137 = arith.select %37, %135, %136 : vector<32x128xi1>, vector<32x128xf32>
    %138 = tpu.concatenate %134, %131, %137 in 1 : vector<32x128xf32>, vector<32x128xf32>, vector<32x128xf32> -> vector<32x384xf32>
    %139 = arith.truncf %138 : vector<32x384xf32> to vector<32x384xbf16>
    %c6 = arith.constant 6 : index
    %c0_71 = arith.constant 0 : index
    %c0_72 = arith.constant 0 : index
    %140 = vector.load %arg2[%c6, %c0_71, %c0_72] : memref<14x384x128xbf16, #tpu.memory_space<vmem>>, vector<1x384x128xbf16>
    %141 = vector.shape_cast %140 : vector<1x384x128xbf16> to vector<384x128xbf16>
    %cst_73 = arith.constant dense<0.000000e+00> : vector<32x128xf32>
    %142 = tpu.matmul %139, %141, %cst_73 {dimension_numbers = #tpu.dot_dimension_numbers<[1], [0], [0], [1], [0, 0, 1, 1], [], []>} : vector<32x384xbf16>, vector<384x128xbf16>, vector<32x128xf32> -> vector<32x128xf32>
    %c6_74 = arith.constant 6 : index
    %c0_75 = arith.constant 0 : index
    %143 = vector.load %arg3[%c6_74, %c0_75] : memref<14x128xf32, #tpu.memory_space<vmem>>, vector<1x128xf32>
    %144 = vector.broadcast %143 : vector<1x128xf32> to vector<32x128xf32>
    %145 = arith.addf %142, %144 : vector<32x128xf32>
    %cst_76 = arith.constant 0.000000e+00 : f32
    %146 = vector.broadcast %cst_76 : f32 to vector<32x128xf32>
    %147 = arith.maximumf %145, %146 : vector<32x128xf32>
    %c1_i32_77 = arith.constant 1 : i32
    %148 = tpu.dynamic_rotate %147 by %c1_i32_77 dim 0 : vector<32x128xf32>, i32 -> vector<32x128xf32>
    %cst_78 = arith.constant 0.000000e+00 : f32
    %149 = vector.broadcast %cst_78 : f32 to vector<32x128xf32>
    %150 = arith.select %19, %148, %149 : vector<32x128xi1>, vector<32x128xf32>
    %c31_i32_79 = arith.constant 31 : i32
    %151 = tpu.dynamic_rotate %147 by %c31_i32_79 dim 0 : vector<32x128xf32>, i32 -> vector<32x128xf32>
    %cst_80 = arith.constant 0.000000e+00 : f32
    %152 = vector.broadcast %cst_80 : f32 to vector<32x128xf32>
    %153 = arith.select %37, %151, %152 : vector<32x128xi1>, vector<32x128xf32>
    %154 = tpu.concatenate %150, %147, %153 in 1 : vector<32x128xf32>, vector<32x128xf32>, vector<32x128xf32> -> vector<32x384xf32>
    %155 = arith.truncf %154 : vector<32x384xf32> to vector<32x384xbf16>
    %c7 = arith.constant 7 : index
    %c0_81 = arith.constant 0 : index
    %c0_82 = arith.constant 0 : index
    %156 = vector.load %arg2[%c7, %c0_81, %c0_82] : memref<14x384x128xbf16, #tpu.memory_space<vmem>>, vector<1x384x128xbf16>
    %157 = vector.shape_cast %156 : vector<1x384x128xbf16> to vector<384x128xbf16>
    %cst_83 = arith.constant dense<0.000000e+00> : vector<32x128xf32>
    %158 = tpu.matmul %155, %157, %cst_83 {dimension_numbers = #tpu.dot_dimension_numbers<[1], [0], [0], [1], [0, 0, 1, 1], [], []>} : vector<32x384xbf16>, vector<384x128xbf16>, vector<32x128xf32> -> vector<32x128xf32>
    %c7_84 = arith.constant 7 : index
    %c0_85 = arith.constant 0 : index
    %159 = vector.load %arg3[%c7_84, %c0_85] : memref<14x128xf32, #tpu.memory_space<vmem>>, vector<1x128xf32>
    %160 = vector.broadcast %159 : vector<1x128xf32> to vector<32x128xf32>
    %161 = arith.addf %158, %160 : vector<32x128xf32>
    %162 = arith.addf %131, %161 : vector<32x128xf32>
    %c1_i32_86 = arith.constant 1 : i32
    %163 = tpu.dynamic_rotate %162 by %c1_i32_86 dim 0 : vector<32x128xf32>, i32 -> vector<32x128xf32>
    %cst_87 = arith.constant 0.000000e+00 : f32
    %164 = vector.broadcast %cst_87 : f32 to vector<32x128xf32>
    %165 = arith.select %19, %163, %164 : vector<32x128xi1>, vector<32x128xf32>
    %c31_i32_88 = arith.constant 31 : i32
    %166 = tpu.dynamic_rotate %162 by %c31_i32_88 dim 0 : vector<32x128xf32>, i32 -> vector<32x128xf32>
    %cst_89 = arith.constant 0.000000e+00 : f32
    %167 = vector.broadcast %cst_89 : f32 to vector<32x128xf32>
    %168 = arith.select %37, %166, %167 : vector<32x128xi1>, vector<32x128xf32>
    %169 = tpu.concatenate %165, %162, %168 in 1 : vector<32x128xf32>, vector<32x128xf32>, vector<32x128xf32> -> vector<32x384xf32>
    %170 = arith.truncf %169 : vector<32x384xf32> to vector<32x384xbf16>
    %c8 = arith.constant 8 : index
    %c0_90 = arith.constant 0 : index
    %c0_91 = arith.constant 0 : index
    %171 = vector.load %arg2[%c8, %c0_90, %c0_91] : memref<14x384x128xbf16, #tpu.memory_space<vmem>>, vector<1x384x128xbf16>
    %172 = vector.shape_cast %171 : vector<1x384x128xbf16> to vector<384x128xbf16>
    %cst_92 = arith.constant dense<0.000000e+00> : vector<32x128xf32>
    %173 = tpu.matmul %170, %172, %cst_92 {dimension_numbers = #tpu.dot_dimension_numbers<[1], [0], [0], [1], [0, 0, 1, 1], [], []>} : vector<32x384xbf16>, vector<384x128xbf16>, vector<32x128xf32> -> vector<32x128xf32>
    %c8_93 = arith.constant 8 : index
    %c0_94 = arith.constant 0 : index
    %174 = vector.load %arg3[%c8_93, %c0_94] : memref<14x128xf32, #tpu.memory_space<vmem>>, vector<1x128xf32>
    %175 = vector.broadcast %174 : vector<1x128xf32> to vector<32x128xf32>
    %176 = arith.addf %173, %175 : vector<32x128xf32>
    %cst_95 = arith.constant 0.000000e+00 : f32
    %177 = vector.broadcast %cst_95 : f32 to vector<32x128xf32>
    %178 = arith.maximumf %176, %177 : vector<32x128xf32>
    %c1_i32_96 = arith.constant 1 : i32
    %179 = tpu.dynamic_rotate %178 by %c1_i32_96 dim 0 : vector<32x128xf32>, i32 -> vector<32x128xf32>
    %cst_97 = arith.constant 0.000000e+00 : f32
    %180 = vector.broadcast %cst_97 : f32 to vector<32x128xf32>
    %181 = arith.select %19, %179, %180 : vector<32x128xi1>, vector<32x128xf32>
    %c31_i32_98 = arith.constant 31 : i32
    %182 = tpu.dynamic_rotate %178 by %c31_i32_98 dim 0 : vector<32x128xf32>, i32 -> vector<32x128xf32>
    %cst_99 = arith.constant 0.000000e+00 : f32
    %183 = vector.broadcast %cst_99 : f32 to vector<32x128xf32>
    %184 = arith.select %37, %182, %183 : vector<32x128xi1>, vector<32x128xf32>
    %185 = tpu.concatenate %181, %178, %184 in 1 : vector<32x128xf32>, vector<32x128xf32>, vector<32x128xf32> -> vector<32x384xf32>
    %186 = arith.truncf %185 : vector<32x384xf32> to vector<32x384xbf16>
    %c9 = arith.constant 9 : index
    %c0_100 = arith.constant 0 : index
    %c0_101 = arith.constant 0 : index
    %187 = vector.load %arg2[%c9, %c0_100, %c0_101] : memref<14x384x128xbf16, #tpu.memory_space<vmem>>, vector<1x384x128xbf16>
    %188 = vector.shape_cast %187 : vector<1x384x128xbf16> to vector<384x128xbf16>
    %cst_102 = arith.constant dense<0.000000e+00> : vector<32x128xf32>
    %189 = tpu.matmul %186, %188, %cst_102 {dimension_numbers = #tpu.dot_dimension_numbers<[1], [0], [0], [1], [0, 0, 1, 1], [], []>} : vector<32x384xbf16>, vector<384x128xbf16>, vector<32x128xf32> -> vector<32x128xf32>
    %c9_103 = arith.constant 9 : index
    %c0_104 = arith.constant 0 : index
    %190 = vector.load %arg3[%c9_103, %c0_104] : memref<14x128xf32, #tpu.memory_space<vmem>>, vector<1x128xf32>
    %191 = vector.broadcast %190 : vector<1x128xf32> to vector<32x128xf32>
    %192 = arith.addf %189, %191 : vector<32x128xf32>
    %193 = arith.addf %162, %192 : vector<32x128xf32>
    %c1_i32_105 = arith.constant 1 : i32
    %194 = tpu.dynamic_rotate %193 by %c1_i32_105 dim 0 : vector<32x128xf32>, i32 -> vector<32x128xf32>
    %cst_106 = arith.constant 0.000000e+00 : f32
    %195 = vector.broadcast %cst_106 : f32 to vector<32x128xf32>
    %196 = arith.select %19, %194, %195 : vector<32x128xi1>, vector<32x128xf32>
    %c31_i32_107 = arith.constant 31 : i32
    %197 = tpu.dynamic_rotate %193 by %c31_i32_107 dim 0 : vector<32x128xf32>, i32 -> vector<32x128xf32>
    %cst_108 = arith.constant 0.000000e+00 : f32
    %198 = vector.broadcast %cst_108 : f32 to vector<32x128xf32>
    %199 = arith.select %37, %197, %198 : vector<32x128xi1>, vector<32x128xf32>
    %200 = tpu.concatenate %196, %193, %199 in 1 : vector<32x128xf32>, vector<32x128xf32>, vector<32x128xf32> -> vector<32x384xf32>
    %201 = arith.truncf %200 : vector<32x384xf32> to vector<32x384xbf16>
    %c10 = arith.constant 10 : index
    %c0_109 = arith.constant 0 : index
    %c0_110 = arith.constant 0 : index
    %202 = vector.load %arg2[%c10, %c0_109, %c0_110] : memref<14x384x128xbf16, #tpu.memory_space<vmem>>, vector<1x384x128xbf16>
    %203 = vector.shape_cast %202 : vector<1x384x128xbf16> to vector<384x128xbf16>
    %cst_111 = arith.constant dense<0.000000e+00> : vector<32x128xf32>
    %204 = tpu.matmul %201, %203, %cst_111 {dimension_numbers = #tpu.dot_dimension_numbers<[1], [0], [0], [1], [0, 0, 1, 1], [], []>} : vector<32x384xbf16>, vector<384x128xbf16>, vector<32x128xf32> -> vector<32x128xf32>
    %c10_112 = arith.constant 10 : index
    %c0_113 = arith.constant 0 : index
    %205 = vector.load %arg3[%c10_112, %c0_113] : memref<14x128xf32, #tpu.memory_space<vmem>>, vector<1x128xf32>
    %206 = vector.broadcast %205 : vector<1x128xf32> to vector<32x128xf32>
    %207 = arith.addf %204, %206 : vector<32x128xf32>
    %cst_114 = arith.constant 0.000000e+00 : f32
    %208 = vector.broadcast %cst_114 : f32 to vector<32x128xf32>
    %209 = arith.maximumf %207, %208 : vector<32x128xf32>
    %c1_i32_115 = arith.constant 1 : i32
    %210 = tpu.dynamic_rotate %209 by %c1_i32_115 dim 0 : vector<32x128xf32>, i32 -> vector<32x128xf32>
    %cst_116 = arith.constant 0.000000e+00 : f32
    %211 = vector.broadcast %cst_116 : f32 to vector<32x128xf32>
    %212 = arith.select %19, %210, %211 : vector<32x128xi1>, vector<32x128xf32>
    %c31_i32_117 = arith.constant 31 : i32
    %213 = tpu.dynamic_rotate %209 by %c31_i32_117 dim 0 : vector<32x128xf32>, i32 -> vector<32x128xf32>
    %cst_118 = arith.constant 0.000000e+00 : f32
    %214 = vector.broadcast %cst_118 : f32 to vector<32x128xf32>
    %215 = arith.select %37, %213, %214 : vector<32x128xi1>, vector<32x128xf32>
    %216 = tpu.concatenate %212, %209, %215 in 1 : vector<32x128xf32>, vector<32x128xf32>, vector<32x128xf32> -> vector<32x384xf32>
    %217 = arith.truncf %216 : vector<32x384xf32> to vector<32x384xbf16>
    %c11 = arith.constant 11 : index
    %c0_119 = arith.constant 0 : index
    %c0_120 = arith.constant 0 : index
    %218 = vector.load %arg2[%c11, %c0_119, %c0_120] : memref<14x384x128xbf16, #tpu.memory_space<vmem>>, vector<1x384x128xbf16>
    %219 = vector.shape_cast %218 : vector<1x384x128xbf16> to vector<384x128xbf16>
    %cst_121 = arith.constant dense<0.000000e+00> : vector<32x128xf32>
    %220 = tpu.matmul %217, %219, %cst_121 {dimension_numbers = #tpu.dot_dimension_numbers<[1], [0], [0], [1], [0, 0, 1, 1], [], []>} : vector<32x384xbf16>, vector<384x128xbf16>, vector<32x128xf32> -> vector<32x128xf32>
    %c11_122 = arith.constant 11 : index
    %c0_123 = arith.constant 0 : index
    %221 = vector.load %arg3[%c11_122, %c0_123] : memref<14x128xf32, #tpu.memory_space<vmem>>, vector<1x128xf32>
    %222 = vector.broadcast %221 : vector<1x128xf32> to vector<32x128xf32>
    %223 = arith.addf %220, %222 : vector<32x128xf32>
    %224 = arith.addf %193, %223 : vector<32x128xf32>
    %225 = arith.addf %131, %224 : vector<32x128xf32>
    %c1_i32_124 = arith.constant 1 : i32
    %226 = tpu.dynamic_rotate %225 by %c1_i32_124 dim 0 : vector<32x128xf32>, i32 -> vector<32x128xf32>
    %cst_125 = arith.constant 0.000000e+00 : f32
    %227 = vector.broadcast %cst_125 : f32 to vector<32x128xf32>
    %228 = arith.select %19, %226, %227 : vector<32x128xi1>, vector<32x128xf32>
    %c31_i32_126 = arith.constant 31 : i32
    %229 = tpu.dynamic_rotate %225 by %c31_i32_126 dim 0 : vector<32x128xf32>, i32 -> vector<32x128xf32>
    %cst_127 = arith.constant 0.000000e+00 : f32
    %230 = vector.broadcast %cst_127 : f32 to vector<32x128xf32>
    %231 = arith.select %37, %229, %230 : vector<32x128xi1>, vector<32x128xf32>
    %232 = tpu.concatenate %228, %225, %231 in 1 : vector<32x128xf32>, vector<32x128xf32>, vector<32x128xf32> -> vector<32x384xf32>
    %233 = arith.truncf %232 : vector<32x384xf32> to vector<32x384xbf16>
    %c12 = arith.constant 12 : index
    %c0_128 = arith.constant 0 : index
    %c0_129 = arith.constant 0 : index
    %234 = vector.load %arg2[%c12, %c0_128, %c0_129] : memref<14x384x128xbf16, #tpu.memory_space<vmem>>, vector<1x384x128xbf16>
    %235 = vector.shape_cast %234 : vector<1x384x128xbf16> to vector<384x128xbf16>
    %cst_130 = arith.constant dense<0.000000e+00> : vector<32x128xf32>
    %236 = tpu.matmul %233, %235, %cst_130 {dimension_numbers = #tpu.dot_dimension_numbers<[1], [0], [0], [1], [0, 0, 1, 1], [], []>} : vector<32x384xbf16>, vector<384x128xbf16>, vector<32x128xf32> -> vector<32x128xf32>
    %c12_131 = arith.constant 12 : index
    %c0_132 = arith.constant 0 : index
    %237 = vector.load %arg3[%c12_131, %c0_132] : memref<14x128xf32, #tpu.memory_space<vmem>>, vector<1x128xf32>
    %238 = vector.broadcast %237 : vector<1x128xf32> to vector<32x128xf32>
    %239 = arith.addf %236, %238 : vector<32x128xf32>
    %cst_133 = arith.constant 0.000000e+00 : f32
    %240 = vector.broadcast %cst_133 : f32 to vector<32x128xf32>
    %241 = arith.maximumf %239, %240 : vector<32x128xf32>
    %c1_i32_134 = arith.constant 1 : i32
    %242 = tpu.dynamic_rotate %241 by %c1_i32_134 dim 0 : vector<32x128xf32>, i32 -> vector<32x128xf32>
    %cst_135 = arith.constant 0.000000e+00 : f32
    %243 = vector.broadcast %cst_135 : f32 to vector<32x128xf32>
    %244 = arith.select %19, %242, %243 : vector<32x128xi1>, vector<32x128xf32>
    %c31_i32_136 = arith.constant 31 : i32
    %245 = tpu.dynamic_rotate %241 by %c31_i32_136 dim 0 : vector<32x128xf32>, i32 -> vector<32x128xf32>
    %cst_137 = arith.constant 0.000000e+00 : f32
    %246 = vector.broadcast %cst_137 : f32 to vector<32x128xf32>
    %247 = arith.select %37, %245, %246 : vector<32x128xi1>, vector<32x128xf32>
    %248 = tpu.concatenate %244, %241, %247 in 1 : vector<32x128xf32>, vector<32x128xf32>, vector<32x128xf32> -> vector<32x384xf32>
    %249 = arith.truncf %248 : vector<32x384xf32> to vector<32x384xbf16>
    %c13 = arith.constant 13 : index
    %c0_138 = arith.constant 0 : index
    %c0_139 = arith.constant 0 : index
    %250 = vector.load %arg2[%c13, %c0_138, %c0_139] : memref<14x384x128xbf16, #tpu.memory_space<vmem>>, vector<1x384x128xbf16>
    %251 = vector.shape_cast %250 : vector<1x384x128xbf16> to vector<384x128xbf16>
    %cst_140 = arith.constant dense<0.000000e+00> : vector<32x128xf32>
    %252 = tpu.matmul %249, %251, %cst_140 {dimension_numbers = #tpu.dot_dimension_numbers<[1], [0], [0], [1], [0, 0, 1, 1], [], []>} : vector<32x384xbf16>, vector<384x128xbf16>, vector<32x128xf32> -> vector<32x128xf32>
    %c13_141 = arith.constant 13 : index
    %c0_142 = arith.constant 0 : index
    %253 = vector.load %arg3[%c13_141, %c0_142] : memref<14x128xf32, #tpu.memory_space<vmem>>, vector<1x128xf32>
    %254 = vector.broadcast %253 : vector<1x128xf32> to vector<32x128xf32>
    %255 = arith.addf %252, %254 : vector<32x128xf32>
    %256 = arith.addf %225, %255 : vector<32x128xf32>
    %257 = arith.addf %0, %256 : vector<32x128xf32>
    %c0_143 = arith.constant 0 : index
    %c0_144 = arith.constant 0 : index
    %258 = vector.load %arg4[%c0_143, %c0_144] : memref<32x128xf32, #tpu.memory_space<vmem>>, vector<32x128xf32>
    tpu.vector_store %arg4[%c0_143, %c0_144], %257 {strides = array<i32>} : memref<32x128xf32, #tpu.memory_space<vmem>>, vector<32x128xf32>,
    return
  }
  func.func @transform_0(%arg0: i32) -> (i32, i32) {
    %c0_i32 = arith.constant 0 : i32
    %c0_i32_0 = arith.constant 0 : i32
    %c0_i32_1 = arith.constant 0 : i32
    return %c0_i32, %c0_i32_0 : i32, i32
  }
  func.func @transform_1(%arg0: i32) -> (i32, i32, i32) {
    %c0_i32 = arith.constant 0 : i32
    %c0_i32_0 = arith.constant 0 : i32
    %c0_i32_1 = arith.constant 0 : i32
    %c0_i32_2 = arith.constant 0 : i32
    return %c0_i32, %c0_i32_0, %c0_i32_1 : i32, i32, i32
  }
  func.func @transform_2(%arg0: i32) -> (i32, i32) {
    %c0_i32 = arith.constant 0 : i32
    %c0_i32_0 = arith.constant 0 : i32
    %c0_i32_1 = arith.constant 0 : i32
    return %c0_i32, %c0_i32_0 : i32, i32
  }
  func.func @transform_3(%arg0: i32) -> (i32, i32) {
    %c0_i32 = arith.constant 0 : i32
    %c0_i32_0 = arith.constant 0 : i32
    %c0_i32_1 = arith.constant 0 : i32
    return %c0_i32, %c0_i32_0 : i32, i32
  }
}

</mosaic_0001>

<bundles_post_ra>
// kernel: body_forward_pallas.1
= control target key start
LH: loop header
LB: loop body
LE: loop exit
PB: predicated region body
PF: predicated region fallthrough
CT: control target
= control target key end

     0   :  { %8 = vsyncpa [#allocation3], 0  ;;  %s7153_s0 = inlined_call_operand.vmem [shape: f32[32,128], index: 0, kind: input, shape index: {}]   ;;  %s7154_s1 = inlined_call_operand.hbm [shape: bf16[14,384,128], index: 1, kind: input, shape index: {}]   ;;  %s7155_s2 = inlined_call_operand.hbm [shape: f32[14,128], index: 2, kind: input, shape index: {}]   ;;  %s7156_s3 = inlined_call_operand.vmem [shape: f32[32,128], index: 3, kind: output, shape index: {}]  }
   0x1   :  { %9 = vsyncpa [#allocation5], 0  ;;  %s6480_s12 = smov [#allocation2]   ;;  %s6432_s16 = scalar_lea.hbm %s7154_s1, 43008 }
   0x2   :  { %s17_s13 = sshll.u32 %s6480_s12, 4  ;;  %p6433_p0 = scmp.ne.s32.totalorder %s7154_s1, %s6432_s16  ;;  %s18_s13 = int_to_ptr.vmem [resolvable:$true] %s17_s13 }
   0x3   :  { %p6436_p1 = scmp.lt.u32.totalorder %s6432_s16, %s7154_s1 }
   0x5   :  { %p6438_p2 = pnand %p6436_p1, %p6433_p0 }
   0x7   :  { %6441 = shalt.err (!%p6438_p2)
}
   0x8   :  { %s6442_s21 = scalar_lea.vmem %s18_s13, 43008  ;;  %p6447_p4 = scmp.lt.s32.totalorder %s18_s13, %s18_s13 }
   0x9   :  { %p6443_p3 = scmp.ne.s32.totalorder %s18_s13, %s6442_s21  ;;  %p6448_p5 = scmp.lt.s32.totalorder %s6442_s21, %s6442_s21 }
   0xb   :  { %p6449_p6 = por %p6448_p5, %p6447_p4 }
   0xd   :  { %p6450_p7 = pnand %p6449_p6, %p6443_p3 }
   0xf   :  { %6453 = shalt.err (!%p6450_p7)
}
  0x10   :  { %s6481_s22 = smov 64   ;;  %s6482_s23 = smov 4  }
  0x11   :  { %23 = dma.hbm_to_vmem [thread:$0]  %s7154_s1, 43008, %s18_s13, [#allocation3], %s6481_s22, %s6481_s22, %s6482_s23  }
  0x12   :  { %s6483_s26 = smov [#allocation4]   ;;  %s6454_s30 = scalar_lea.hbm %s7155_s2, 256 }
  0x13   :  { %s29_s27 = sshll.u32 %s6483_s26, 4  ;;  %p6455_p8 = scmp.ne.s32.totalorder %s7155_s2, %s6454_s30  ;;  %s30_s27 = int_to_ptr.vmem [resolvable:$true] %s29_s27 }
  0x14   :  { %p6458_p9 = scmp.lt.u32.totalorder %s6454_s30, %s7155_s2 }
  0x16   :  { %p6460_p10 = pnand %p6458_p9, %p6455_p8 }
  0x18   :  { %6463 = shalt.err (!%p6460_p10)
}
  0x19   :  { %s6464_s8 = scalar_lea.vmem %s30_s27, 256  ;;  %p6469_p12 = scmp.lt.s32.totalorder %s30_s27, %s30_s27 }
  0x1a   :  { %p6465_p11 = scmp.ne.s32.totalorder %s30_s27, %s6464_s8  ;;  %p6470_p13 = scmp.lt.s32.totalorder %s6464_s8, %s6464_s8 }
  0x1c   :  { %p6471_p0 = por %p6470_p13, %p6469_p12 }
  0x1e   :  { %p6472_p1 = pnand %p6471_p0, %p6465_p11 }
  0x20   :  { %6475 = shalt.err (!%p6472_p1)
}
  0x21   :  { %s6484_s1 = smov 128   ;;  %s6485_s9 = smov 8  }
  0x22   :  { %35 = dma.hbm_to_vmem [thread:$0]  %s7155_s2, 256, %s30_s27, [#allocation5], %s6484_s1, %s6484_s1, %s6485_s9  }
  0x23   :  { %6476 = dma.done.wait [#allocation3], 43008  }
  0x24   :  { %6477 = vsyncadd [#allocation3], 4294924288 }
  0x25   :  { %6478 = dma.done.wait [#allocation5], 256  }
  0x26   :  { %6479 = vsyncadd [#allocation5], 4294967040  ;;  %v6088_v0 = vld [vmem:[#allocation2 + $0x40] sm:$0xff]   ;;  %v6090_v2 = vld [vmem:[#allocation2 + $0x48] sm:$0xff]   ;;  %v47_v7 = vlaneseq  ;;  %vm6486_vm5 = vmmov 1  }
  0x27   :  { %v6089_v1 = vld [vmem:[#allocation2] sm:$0xff]   ;;  %5269 = vmatprep.subr.bf16.mxu0 %v6088_v0  ;;  %v6092_v4 = vld [vmem:[#allocation2 + $0x8] sm:$0xff]   ;;  %v6093_v5 = vld [vmem:[#allocation2 + $0x50] sm:$0xff]  }
  0x28   :  { %5270 = vmatpush3.bf16.msra.mxu0 %v6089_v1  ;;  %v6091_v3 = vld [vmem:[#allocation2 + $0x80] sm:$0xff]   ;;  %v6094_v6 = vld [vmem:[#allocation2 + $0x88] sm:$0xff]   ;;  %v6095_v8 = vld [vmem:[#allocation2 + $0x10] sm:$0xff]   ;;  %v6531_v12 = vshrl.u32 %v47_v7, 7 }
  0x29   :  { %5271 = vmatprep.subr.bf16.mxu0 %v6090_v2  ;;  %5801 = vmatprep.subr.bf16.mxu1 %v6091_v3  ;;  %v6096_v9 = vld [vmem:[#allocation2 + $0x58] sm:$0xff]   ;;  %v6097_v10 = vld [vmem:[#allocation2 + $0x90] sm:$0xff]   ;;  %v6099_v13 = vld [vmem:[#allocation2 + $0x60] sm:$0xff]  }
  0x2a   :  { %5802 = vmatpush3.bf16.msra.mxu1 %v6091_v3  ;;  %v6098_v11 = vld [vmem:[#allocation2 + $0x18] sm:$0xff]   ;;  %v6101_v15 = vld [vmem:[#allocation2 + $0x20] sm:$0xff]   ;;  %v49_v16 = vadd.s32 8, %v6531_v12  ;;  %v51_v18 = vadd.s32 24, %v6531_v12  ;;  %v6102_v19 = vld [vmem:[#allocation2 + $0x68] sm:$0xff]   ;;  %v56_v20 = vand.u32 15, %v6531_v12 }
  0x2b   :  { %5803 = vmatprep.subr.bf16.mxu1 %v6094_v6  ;;  %v6100_v14 = vld [vmem:[#allocation2 + $0x98] sm:$0xff]   ;;  %v6103_v17 = vld [vmem:[#allocation2 + $0xa0] sm:$0xff]   ;;  %v50_v21 = vadd.s32 16, %v6531_v12  ;;  %v6104_v22 = vld [vmem:[#allocation2 + $0x28] sm:$0xff]   ;;  %vm112_vm0 = vcmp.lt.s32.totalorder %v6531_v12, 1  ;;  %vm125_vm1 = vcmp.lt.s32.totalorder %v6531_v12, 7 }
  0x2c   :  { %5272 = vmatpush3.bf16.msra.mxu0 %v6092_v4  ;;  %v63_v23 = vand.u32 15, %v49_v16  ;;  %v6106_v24 = vld [vmem:[#allocation2 + $0xa8] sm:$0xff]   ;;  %v77_v25 = vand.u32 15, %v51_v18  ;;  %v6105_v26 = vld [vmem:[#allocation2 + $0x70] sm:$0xff]   ;;  %vm6539_vm2 = vcmp.ne.s32.totalorder %v56_v20, 0  ;;  %v43_v30 = vld [vmem:[%s7153_s0] sm:$0xff] }
  0x2d   :  { %5273 = vmatprep.subr.bf16.mxu0 %v6093_v5  ;;  %v6107_v27 = vld [vmem:[#allocation2 + $0x30] sm:$0xff]   ;;  %v44_v31 = vld [vmem:[%s7153_s0 + $0x8] sm:$0xff]  ;;  %v46_v32 = vld [vmem:[%s7153_s0 + $0x18] sm:$0xff]  ;;  %v70_v35 = vand.u32 15, %v50_v21  ;;  %v108_v38 = vrot.slane %v43_v30, 7  ;;  %v121_v43 = vrot.slane %v43_v30, 1 }
  0x2e   :  { %5804 = vmatpush3.bf16.msra.mxu1 %v6094_v6  ;;  %v6109_v28 = vld [vmem:[#allocation2 + $0xb0] sm:$0xff]   ;;  %vm6552_vm3 = vcmp.ne.s32.totalorder %v63_v23, 15  ;;  %vm6556_vm4 = vcmp.ne.s32.totalorder %v77_v25, 15  ;;  %v6108_v36 = vld [vmem:[#allocation2 + $0x78] sm:$0xff]   ;;  %v135_v37 = vpack.c.bf16 %v44_v31, %v43_v30  ;;  %v109_v39 = vrot.slane %v44_v31, 7  ;;  %vm6566_vm6 = vmpackc.low %vm6486_vm5, %vm6539_vm2 }
  0x2f   :  { %5805 = vmatprep.subr.bf16.mxu1 %v6097_v10  ;;  %v111_v40 = vrot.slane %v46_v32, 7  ;;  %v6110_v41 = vld [vmem:[#allocation2 + $0x38] sm:$0xff]   ;;  %v45_v42 = vld [vmem:[%s7153_s0 + $0x10] sm:$0xff]  ;;  %v122_v44 = vrot.slane %v44_v31, 1  ;;  %v124_v47 = vrot.slane %v46_v32, 1  ;;  %vm6579_vm7 = vmpackc.low %vm6552_vm3, %vm6486_vm5  ;;  %vm102_vm8 = vcmp.ne.s32.totalorder %v70_v35, 0 }
  0x30   :  { %5274 = vmatpush3.bf16.msra.mxu0 %v6095_v8  ;;  %369 = vmatprep.mubr.bf16.mxu0 %v135_v37  ;;  %v123_v46 = vrot.slane %v45_v42, 1  ;;  %v115_v48 = vsel %vm112_vm0, %v108_v38, %v109_v39  ;;  %v6111_v50 = vld [vmem:[#allocation2 + $0xb8] sm:$0xff]   ;;  %v6112_v54 = vld [vmem:[#allocation2 + $0x100] sm:$0xff]   ;;  %vm6588_vm9 = vmpackc.low %vm6556_vm4, %vm6486_vm5  ;;  %v138_v61 = vpack.c.bf16 %v46_v32, %v45_v42  ;;  %v110_v62 = vrot.slane %v45_v42, 7 }
  0x31   :  { %5275 = vmatprep.subr.bf16.mxu0 %v6096_v9  ;;  %v116_v49 = vsel %vm112_vm0, %v111_v40, %v108_v38  ;;  %v128_v51 = vsel %vm125_vm1, %v121_v43, %v122_v44  ;;  %v129_v59 = vsel %vm125_vm1, %v124_v47, %v121_v43  ;;  %v6113_v60 = vld [vmem:[#allocation2 + $0x140] sm:$0xff]   ;;  %vm6597_vm10 = vmpackc.low %vm6486_vm5, %vm102_vm8  ;;  %v6115_v1 = vld [vmem:[#allocation2 + $0x108] sm:$0xff]  }
  0x32   :  { %5806 = vmatpush3.bf16.msra.mxu1 %v6097_v10  ;;  %v127_v53 = vsel %vm125_vm1, %v122_v44, %v123_v46  ;;  %v4777_v57 = vpack.c.bf16 %v115_v48, %v116_v49  ;;  %v126_v58 = vsel %vm125_vm1, %v123_v46, %v124_v47  ;;  %v6114_v0 = vld [vmem:[#allocation2 + $0xc0] sm:$0xff]   ;;  %v6116_v3 = vld [vmem:[#allocation2 + $0x148] sm:$0xff]   ;;  %v113_v5 = vsel %vm112_vm0, %v110_v62, %v111_v40  ;;  %v6118_v8 = vld [vmem:[#allocation2 + $0x110] sm:$0xff]  }
  0x33   :  { %5807 = vmatprep.subr.bf16.mxu1 %v6100_v14  ;;  %v4783_v55 = vpack.c.bf16 %v127_v53, %v128_v51  ;;  %v4786_v2 = vpack.c.bf16 %v129_v59, %v126_v58  ;;  %v6117_v4 = vld [vmem:[#allocation2 + $0xc8] sm:$0xff]   ;;  %v114_v6 = vsel %vm112_vm0, %v109_v39, %v110_v62  ;;  %v6119_v9 = vld [vmem:[#allocation2 + $0x150] sm:$0xff]   ;;  %v6125_v16 = vld [vmem:[#allocation2 + $0x160] sm:$0xff]  }
  0x34   :  { %5276 = vmatpush3.bf16.msra.mxu0 %v6098_v11  ;;  %v4780_v7 = vpack.c.bf16 %v113_v5, %v114_v6  ;;  %v6120_v10 = vld [vmem:[#allocation2 + $0xd0] sm:$0xff]   ;;  %v6121_v11 = vld [vmem:[#allocation2 + $0x118] sm:$0xff]   ;;  %v6127_v18 = vld [vmem:[#allocation2 + $0x128] sm:$0xff]  }
  0x35   :  { %5277 = vmatprep.subr.bf16.mxu0 %v6099_v13  ;;  %5817 = vmatprep.mubr.msk.bf16.mxu1 %vm6579_vm7, %v4783_v55  ;;  %v6122_v13 = vld [vmem:[#allocation2 + $0x158] sm:$0xff]   ;;  %v6129_v20 = vld [vmem:[#allocation2 + $0xe8] sm:$0xff]   ;;  %v6130_v21 = vld [vmem:[#allocation2 + $0x130] sm:$0xff]  }
  0x36   :  { %5808 = vmatpush3.bf16.msra.mxu1 %v6100_v14  ;;  %v6123_v14 = vld [vmem:[#allocation2 + $0xd8] sm:$0xff]   ;;  %v6132_v23 = vld [vmem:[#allocation2 + $0xf0] sm:$0xff]   ;;  %v4751_v31 = vld [vmem:[#allocation4] ss:$0 sm:$0xff] }
  0x37   :  { %5809 = vmatprep.subr.bf16.mxu1 %v6103_v17  ;;  %v6134_v25 = vld [vmem:[#allocation2 + $0x178] sm:$0xff]  }
  0x38   :  { %5278 = vmatpush3.bf16.msra.mxu0 %v6101_v15  ;;  %v6124_v15 = vld [vmem:[#allocation2 + $0x120] sm:$0xff]  }
  0x39   :  { %5279 = vmatprep.subr.bf16.mxu0 %v6102_v19  ;;  %v6128_v19 = vld [vmem:[#allocation2 + $0x168] sm:$0xff]  }
  0x3a   :  { %5810 = vmatpush3.bf16.msra.mxu1 %v6103_v17  ;;  %v6126_v17 = vld [vmem:[#allocation2 + $0xe0] sm:$0xff]  }
  0x3b   :  { %5811 = vmatprep.subr.bf16.mxu1 %v6106_v24 }
  0x3c   :  { %5280 = vmatpush3.bf16.msra.mxu0 %v6104_v22  ;;  %v6131_v22 = vld [vmem:[#allocation2 + $0x170] sm:$0xff]  }
  0x3d   :  { %5281 = vmatprep.subr.bf16.mxu0 %v6105_v26  ;;  %v6135_v26 = vld [vmem:[#allocation2 + $0xf8] sm:$0xff]  }
  0x3e   :  { %5812 = vmatpush3.bf16.msra.mxu1 %v6106_v24  ;;  %v6133_v24 = vld [vmem:[#allocation2 + $0x138] sm:$0xff]  }
  0x3f   :  { %5813 = vmatprep.subr.bf16.mxu1 %v6109_v28 }
  0x40   :  { %5282 = vmatpush3.bf16.msra.mxu0 %v6107_v27  ;;  %v6136_v27 = vld [vmem:[#allocation2 + $0x1c0] sm:$0xff]  }
  0x41   :  { %5283 = vmatprep.subr.bf16.mxu0 %v6108_v36 }
  0x42   :  { %5814 = vmatpush3.bf16.msra.mxu1 %v6109_v28  ;;  %v6613_v28 = vld [vmem:[#allocation2 + $0x200] sm:$0xff]  }
  0x43   :  { %5815 = vmatprep.subr.bf16.mxu1 %v6111_v50 }
  0x44   :  { %5284 = vmatpush3.bf16.msra.mxu0 %v6110_v41 }
  0x45   :  { %5307 = vmatprep.subr.bf16.mxu0 %v6112_v54 }
  0x46   :  { %5816 = vmatpush3.bf16.msra.mxu1 %v6111_v50 }
  0x47   :  { %4778 = vmatmul.mubr.msk.bf16.vlgmr.msra.gmra.mrb[0].mxu0 %vm6566_vm6, %v4777_v57  ;;  %5821 = vmatprep.subr.bf16.mxu1 %v6113_v60 }
  0x48   :  { %377 = vmatprep.mubr.bf16.mxu0 %v138_v61  ;;  %5308 = vmatpush3.bf16.msra.mxu0 %v6114_v0 }
  0x49   :  { %5818 = vmatmul.mubr.msk.bf16.vlgmr.msra.gmra.mrb[0].mxu1 %vm6588_vm9, %v4786_v2  ;;  %5309 = vmatprep.subr.bf16.mxu0 %v6115_v1 }
  0x4a   :  { %5822 = vmatpush3.bf16.msra.mxu1 %v6113_v60 }
  0x4b   :  { %5823 = vmatprep.subr.bf16.mxu1 %v6116_v3 }
  0x4c   :  { %5310 = vmatpush3.bf16.msra.mxu0 %v6117_v4 }
  0x4d   :  { %5311 = vmatprep.subr.bf16.mxu0 %v6118_v8 }
  0x4e   :  { %5824 = vmatpush3.bf16.msra.mxu1 %v6116_v3 }
  0x4f   :  { %4781 = vmatmul.mubr.msk.bf16.gmra.mrb[4].mxu0 %vm6597_vm10, %v4780_v7  ;;  %5825 = vmatprep.subr.bf16.mxu1 %v6119_v9 }
  0x50   :  { %5312 = vmatpush3.bf16.msra.mxu0 %v6120_v10 }
  0x51   :  { %5313 = vmatprep.subr.bf16.mxu0 %v6121_v11 }
  0x52   :  { %5826 = vmatpush3.bf16.msra.mxu1 %v6119_v9 }
  0x53   :  { %5827 = vmatprep.subr.bf16.mxu1 %v6122_v13 }
  0x54   :  { %5314 = vmatpush3.bf16.msra.mxu0 %v6123_v14 }
  0x55   :  { %5315 = vmatprep.subr.bf16.mxu0 %v6124_v15 }
  0x56   :  { %5828 = vmatpush3.bf16.msra.mxu1 %v6122_v13 }
  0x57   :  { %5829 = vmatprep.subr.bf16.mxu1 %v6125_v16 }
  0x58   :  { %5316 = vmatpush3.bf16.msra.mxu0 %v6126_v17 }
  0x59   :  { %5317 = vmatprep.subr.bf16.mxu0 %v6127_v18  ;;  %v6138_v18 = vld [vmem:[#allocation2 + $0x180] sm:$0xff]  }
  0x5a   :  { %5830 = vmatpush3.bf16.msra.mxu1 %v6125_v16 }
  0x5b   :  { %5831 = vmatprep.subr.bf16.mxu1 %v6128_v19 }
  0x5c   :  { %5318 = vmatpush3.bf16.msra.mxu0 %v6129_v20 }
  0x5d   :  { %5319 = vmatprep.subr.bf16.mxu0 %v6130_v21 }
  0x5e   :  { %5832 = vmatpush3.bf16.msra.mxu1 %v6128_v19 }
  0x5f   :  { %5833 = vmatprep.subr.bf16.mxu1 %v6131_v22 }
  0x60   :  { %5320 = vmatpush3.bf16.msra.mxu0 %v6132_v23  ;;  %v6140_v23 = vld [vmem:[#allocation2 + $0x208] sm:$0xff]  }
  0x61   :  { %5321 = vmatprep.subr.bf16.mxu0 %v6133_v24  ;;  %v6141_v24 = vld [vmem:[#allocation2 + $0x188] sm:$0xff]  }
  0x62   :  { %5834 = vmatpush3.bf16.msra.mxu1 %v6131_v22  ;;  %v6139_v22 = vld [vmem:[#allocation2 + $0x1c8] sm:$0xff]  }
  0x63   :  { %5835 = vmatprep.subr.bf16.mxu1 %v6134_v25 }
  0x64   :  { %5322 = vmatpush3.bf16.msra.mxu0 %v6135_v26  ;;  %v6143_v26 = vld [vmem:[#allocation2 + $0x210] sm:$0xff]  }
  0x65   :  { %5345 = vmatprep.subr.bf16.mxu0 %v6136_v27  ;;  %v6144_v27 = vld [vmem:[#allocation2 + $0x190] sm:$0xff]  }
  0x66   :  { %5836 = vmatpush3.bf16.msra.mxu1 %v6134_v25  ;;  %v6142_v25 = vld [vmem:[#allocation2 + $0x1d0] sm:$0xff]  }
  0x67   :  { %5841 = vmatprep.subr.bf16.mxu1 %v6613_v28 }
 0x11a   :  { %v5285_v29 = vpop.f32.mrb[0].mxu0 }
 0x11b   :  { %v5286_v30 = vpop.f32.mrb[1].mxu0 }
 0x11c   :  { %v5287_v32 = vadd.f32 %v5286_v30, %v5285_v29  ;;  %v5288_v33 = vpop.f32.mrb[2].mxu0  ;;  %v5819_v35 = vpop.f32.mrb[0].mxu1  ;;  %v6145_v29 = vld [vmem:[#allocation2 + $0x1d8] sm:$0xff]  }
 0x11d   :  { %v5289_v34 = vpop.f32.mrb[3].mxu0  ;;  %v420_v38 = vpop.f32.mrb[1].mxu1  ;;  %v6146_v30 = vld [vmem:[#allocation2 + $0x218] sm:$0xff]  }
 0x11e   :  { %v5290_v36 = vadd.f32 %v5289_v34, %v5288_v33  ;;  %v372_v37 = vadd.f32 %v5287_v32, %v4751_v31  ;;  %v5820_v39 = vpop.f32.mrb[2].mxu1  ;;  %v6149_v32 = vld [vmem:[#allocation2 + $0x220] sm:$0xff]   ;;  %v6151_v34 = vld [vmem:[#allocation2 + $0x1e8] sm:$0xff]  }
 0x11f   :  { %v423_v42 = vpop.f32.mrb[3].mxu1  ;;  %v6150_v33 = vld [vmem:[#allocation2 + $0x1a0] sm:$0xff]  }
 0x120   :  { %v421_v40 = vadd.f32 %v420_v38, %v372_v37  ;;  %v375_v41 = vadd.f32 %v5290_v36, %v4751_v31  ;;  %v6153_v36 = vld [vmem:[#allocation2 + $0x1a8] sm:$0xff]   ;;  %v6154_v37 = vld [vmem:[#allocation2 + $0x1f0] sm:$0xff]  }
 0x121   :  { %v6155_v38 = vld [vmem:[#allocation2 + $0x230] sm:$0xff]  }
 0x122   :  { %v435_v43 = vmax.f32 %v421_v40, 0.0  ;;  %v424_v44 = vadd.f32 %v423_v42, %v375_v41  ;;  %v5291_v46 = vpop.f32.mrb[4].mxu0  ;;  %v6157_v40 = vld [vmem:[#allocation2 + $0x1f8] sm:$0xff]  }
 0x123   :  { %v5292_v47 = vpop.f32.mrb[5].mxu0  ;;  %v6158_v41 = vld [vmem:[#allocation2 + $0x238] sm:$0xff]  }
 0x124   :  { %v436_v48 = vmax.f32 %v424_v44, 0.0  ;;  %v5293_v49 = vadd.f32 %v5292_v47, %v5291_v46  ;;  %v5294_v50 = vpop.f32.mrb[6].mxu0  ;;  %v439_v51 = vrot.slane %v435_v43, 7  ;;  %v451_v53 = vrot.slane %v435_v43, 1  ;;  %v6159_v42 = vld [vmem:[#allocation2 + $0x1b8] sm:$0xff]   ;;  %v6641_v44 = vld [vmem:[#allocation2 + $0x2c0] sm:$0xff]  }
 0x125   :  { %v5295_v54 = vpop.f32.mrb[7].mxu0 }
 0x126   :  { %v440_v55 = vrot.slane %v436_v48, 7  ;;  %v452_v57 = vrot.slane %v436_v48, 1  ;;  %v380_v58 = vadd.f32 %v5293_v49, %v4751_v31  ;;  %v5296_v59 = vadd.f32 %v5295_v54, %v5294_v50  ;;  %v4788_v49 = vld [vmem:[#allocation4 + $0x1] ss:$0 sm:$0xff] }
 0x127   :  { %v464_v60 = vpack.c.bf16 %v436_v48, %v435_v43  ;;  %v6160_v43 = vld [vmem:[#allocation2 + $0x280] sm:$0xff]  }
 0x128   :  { %v445_v61 = vsel %vm112_vm0, %v439_v51, %v440_v55  ;;  %v429_v62 = vadd.f32 %v5819_v35, %v380_v58  ;;  %v383_v0 = vadd.f32 %v5296_v59, %v4751_v31  ;;  %v457_v1 = vsel %vm125_vm1, %v451_v53, %v452_v57  ;;  %v6147_v31 = vld [vmem:[#allocation2 + $0x198] sm:$0xff]   ;;  %v6152_v35 = vld [vmem:[#allocation2 + $0x228] sm:$0xff]  }
 0x129   :  { %699 = vmatprep.mubr.bf16.mxu0 %v464_v60 }
 0x12a   :  { %v437_v2 = vmax.f32 %v429_v62, 0.0  ;;  %v432_v3 = vadd.f32 %v5820_v39, %v383_v0  ;;  %v6156_v39 = vld [vmem:[#allocation2 + $0x1b0] sm:$0xff]  }
 0x12c   :  { %v441_v4 = vrot.slane %v437_v2, 7  ;;  %v453_v5 = vrot.slane %v437_v2, 1  ;;  %v438_v6 = vmax.f32 %v432_v3, 0.0 }
 0x12e   :  { %v442_v7 = vrot.slane %v438_v6, 7  ;;  %v454_v8 = vrot.slane %v438_v6, 1  ;;  %v456_v9 = vsel %vm125_vm1, %v452_v57, %v453_v5  ;;  %v467_v10 = vpack.c.bf16 %v438_v6, %v437_v2  ;;  %v6647_v2 = vld [vmem:[%s7153_s0 + $0x8] sm:$0xff]  ;;  %v6655_v6 = vld [vmem:[%s7153_s0] sm:$0xff] }
 0x12f   :  { %v4820_v11 = vpack.c.bf16 %v456_v9, %v457_v1  ;;  %v444_v13 = vsel %vm112_vm0, %v440_v55, %v441_v4 }
 0x130   :  { %v446_v14 = vsel %vm112_vm0, %v442_v7, %v439_v51  ;;  %v455_v15 = vsel %vm125_vm1, %v453_v5, %v454_v8  ;;  %v458_v16 = vsel %vm125_vm1, %v454_v8, %v451_v53  ;;  %v443_v17 = vsel %vm112_vm0, %v441_v4, %v442_v7 }
 0x131   :  { %v4814_v19 = vpack.c.bf16 %v445_v61, %v446_v14  ;;  %5837 = vmatprep.mubr.msk.bf16.mxu1 %vm6579_vm7, %v4820_v11  ;;  %v4823_v20 = vpack.c.bf16 %v458_v16, %v455_v15  ;;  %v4817_v21 = vpack.c.bf16 %v443_v17, %v444_v13  ;;  %v6666_v16 = vld [vmem:[%s7153_s0 + $0x10] sm:$0xff] }
 0x133   :  { %4815 = vmatmul.mubr.msk.bf16.vlgmr.msra.gmra.mrb[8].mxu0 %vm6566_vm6, %v4814_v19  ;;  %5838 = vmatmul.mubr.msk.bf16.vlgmr.msra.gmra.mrb[4].mxu1 %vm6588_vm9, %v4823_v20 }
 0x134   :  { %707 = vmatprep.mubr.bf16.mxu0 %v467_v10  ;;  %5346 = vmatpush3.bf16.msra.mxu0 %v6138_v18 }
 0x135   :  { %5842 = vmatpush3.bf16.msra.mxu1 %v6613_v28  ;;  %5347 = vmatprep.subr.bf16.mxu0 %v6139_v22  ;;  %v6148_v28 = vld [vmem:[#allocation2 + $0x1e0] sm:$0xff]  }
 0x136   :  { %5843 = vmatprep.subr.bf16.mxu1 %v6140_v23 }
 0x138   :  { %5348 = vmatpush3.bf16.msra.mxu0 %v6141_v24 }
 0x139   :  { %5844 = vmatpush3.bf16.msra.mxu1 %v6140_v23  ;;  %5349 = vmatprep.subr.bf16.mxu0 %v6142_v25 }
 0x13a   :  { %5845 = vmatprep.subr.bf16.mxu1 %v6143_v26 }
 0x13b   :  { %4818 = vmatmul.mubr.msk.bf16.gmra.mrb[12].mxu0 %vm6597_vm10, %v4817_v21  ;;  %v6676_v21 = vld [vmem:[%s7153_s0 + $0x18] sm:$0xff] }
 0x13c   :  { %5350 = vmatpush3.bf16.msra.mxu0 %v6144_v27 }
 0x13d   :  { %5846 = vmatpush3.bf16.msra.mxu1 %v6143_v26  ;;  %5351 = vmatprep.subr.bf16.mxu0 %v6145_v29 }
 0x13e   :  { %5847 = vmatprep.subr.bf16.mxu1 %v6146_v30 }
 0x140   :  { %5352 = vmatpush3.bf16.msra.mxu0 %v6147_v31 }
 0x141   :  { %5848 = vmatpush3.bf16.msra.mxu1 %v6146_v30  ;;  %5353 = vmatprep.subr.bf16.mxu0 %v6148_v28 }
 0x142   :  { %5849 = vmatprep.subr.bf16.mxu1 %v6149_v32 }
 0x144   :  { %5354 = vmatpush3.bf16.msra.mxu0 %v6150_v33 }
 0x145   :  { %5850 = vmatpush3.bf16.msra.mxu1 %v6149_v32  ;;  %5355 = vmatprep.subr.bf16.mxu0 %v6151_v34  ;;  %v6162_v34 = vld [vmem:[#allocation2 + $0x240] sm:$0xff]  }
 0x146   :  { %5851 = vmatprep.subr.bf16.mxu1 %v6152_v35 }
 0x148   :  { %5356 = vmatpush3.bf16.msra.mxu0 %v6153_v36 }
 0x149   :  { %5852 = vmatpush3.bf16.msra.mxu1 %v6152_v35  ;;  %5357 = vmatprep.subr.bf16.mxu0 %v6154_v37  ;;  %v6163_v37 = vld [vmem:[#allocation2 + $0x288] sm:$0xff]  }
 0x14a   :  { %5853 = vmatprep.subr.bf16.mxu1 %v6155_v38 }
 0x14c   :  { %5358 = vmatpush3.bf16.msra.mxu0 %v6156_v39  ;;  %v6164_v39 = vld [vmem:[#allocation2 + $0x2c8] sm:$0xff]  }
 0x14d   :  { %5854 = vmatpush3.bf16.msra.mxu1 %v6155_v38  ;;  %5359 = vmatprep.subr.bf16.mxu0 %v6157_v40 }
 0x14e   :  { %5855 = vmatprep.subr.bf16.mxu1 %v6158_v41 }
 0x150   :  { %5360 = vmatpush3.bf16.msra.mxu0 %v6159_v42 }
 0x151   :  { %5856 = vmatpush3.bf16.msra.mxu1 %v6158_v41  ;;  %5383 = vmatprep.subr.bf16.mxu0 %v6160_v43  ;;  %v6165_v41 = vld [vmem:[#allocation2 + $0x248] sm:$0xff]  }
 0x152   :  { %5861 = vmatprep.subr.bf16.mxu1 %v6641_v44 }
 0x206   :  { %v5323_v46 = vpop.f32.mrb[8].mxu0  ;;  %v5839_v47 = vpop.f32.mrb[4].mxu1 }
 0x207   :  { %v5324_v48 = vpop.f32.mrb[9].mxu0  ;;  %v750_v50 = vpop.f32.mrb[5].mxu1 }
 0x208   :  { %v5325_v51 = vadd.f32 %v5324_v48, %v5323_v46  ;;  %v5326_v53 = vpop.f32.mrb[10].mxu0  ;;  %v5840_v54 = vpop.f32.mrb[6].mxu1  ;;  %v6167_v48 = vld [vmem:[#allocation2 + $0x2d0] sm:$0xff]  }
 0x209   :  { %v5327_v55 = vpop.f32.mrb[11].mxu0  ;;  %v753_v57 = vpop.f32.mrb[7].mxu1 }
 0x20a   :  { %v702_v58 = vadd.f32 %v5325_v51, %v4788_v49  ;;  %v5328_v59 = vadd.f32 %v5327_v55, %v5326_v53  ;;  %v6171_v51 = vld [vmem:[#allocation2 + $0x258] sm:$0xff]   ;;  %v6172_v53 = vld [vmem:[#allocation2 + $0x2a0] sm:$0xff]  }
 0x20b   :  { %v6174_v55 = vld [vmem:[#allocation2 + $0x260] sm:$0xff]  }
 0x20c   :  { %v751_v60 = vadd.f32 %v750_v50, %v702_v58  ;;  %v705_v61 = vadd.f32 %v5328_v59, %v4788_v49  ;;  %v6170_v50 = vld [vmem:[#allocation2 + $0x2d8] sm:$0xff]   ;;  %v6176_v58 = vld [vmem:[#allocation2 + $0x2e8] sm:$0xff]  }
 0x20d   :  { %v6177_v59 = vld [vmem:[#allocation2 + $0x268] sm:$0xff]  }
 0x20e   :  { %v754_v62 = vadd.f32 %v753_v57, %v705_v61  ;;  %v5329_v0 = vpop.f32.mrb[12].mxu0  ;;  %v6658_v7 = vadd.f32 %v6655_v6, %v751_v60  ;;  %v6175_v57 = vld [vmem:[#allocation2 + $0x2a8] sm:$0xff]   ;;  %v6178_v60 = vld [vmem:[#allocation2 + $0x2b0] sm:$0xff]  }
 0x20f   :  { %v5330_v1 = vpop.f32.mrb[13].mxu0  ;;  %v6179_v61 = vld [vmem:[#allocation2 + $0x2f0] sm:$0xff]  }
 0x210   :  { %v6650_v3 = vadd.f32 %v6647_v2, %v754_v62  ;;  %v5331_v4 = vadd.f32 %v5330_v1, %v5329_v0  ;;  %v5332_v5 = vpop.f32.mrb[14].mxu0  ;;  %v781_v19 = vrot.slane %v6658_v7, 1  ;;  %v769_v24 = vrot.slane %v6658_v7, 7  ;;  %v6180_v62 = vld [vmem:[#allocation2 + $0x270] sm:$0xff]   ;;  %v6181_v0 = vld [vmem:[#allocation2 + $0x2b8] sm:$0xff]  }
 0x211   :  { %v5333_v8 = vpop.f32.mrb[15].mxu0  ;;  %v6182_v1 = vld [vmem:[#allocation2 + $0x2f8] sm:$0xff]  }
 0x212   :  { %v710_v9 = vadd.f32 %v5331_v4, %v4788_v49  ;;  %v5334_v10 = vadd.f32 %v5333_v8, %v5332_v5  ;;  %v794_v11 = vpack.c.bf16 %v6650_v3, %v6658_v7  ;;  %v782_v15 = vrot.slane %v6650_v3, 1  ;;  %v6183_v4 = vld [vmem:[#allocation2 + $0x278] sm:$0xff]   ;;  %v6184_v5 = vld [vmem:[#allocation2 + $0x340] sm:$0xff]  }
 0x213   :  { %v770_v20 = vrot.slane %v6650_v3, 7  ;;  %v6713_v8 = vld [vmem:[#allocation2 + $0x380] sm:$0xff]  }
 0x214   :  { %v759_v13 = vadd.f32 %v5839_v47, %v710_v9  ;;  %v713_v14 = vadd.f32 %v5334_v10, %v4788_v49  ;;  %1029 = vmatprep.mubr.bf16.mxu0 %v794_v11  ;;  %v787_v29 = vsel %vm125_vm1, %v781_v19, %v782_v15  ;;  %v6166_v47 = vld [vmem:[#allocation2 + $0x290] sm:$0xff]  }
 0x215   :  { %v775_v31 = vsel %vm112_vm0, %v769_v24, %v770_v20  ;;  %v6168_v49 = vld [vmem:[#allocation2 + $0x250] sm:$0xff]  }
 0x216   :  { %v6669_v17 = vadd.f32 %v6666_v16, %v759_v13  ;;  %v762_v18 = vadd.f32 %v5840_v54, %v713_v14  ;;  %v6173_v54 = vld [vmem:[#allocation2 + $0x2e0] sm:$0xff]  }
 0x217   :  { %v4825_v13 = vld [vmem:[#allocation4 + $0x2] ss:$0 sm:$0xff] }
 0x218   :  { %v6679_v22 = vadd.f32 %v6676_v21, %v762_v18  ;;  %v783_v23 = vrot.slane %v6669_v17, 1  ;;  %v771_v40 = vrot.slane %v6669_v17, 7 }
 0x21a   :  { %v772_v25 = vrot.slane %v6679_v22, 7  ;;  %v784_v26 = vrot.slane %v6679_v22, 1  ;;  %v786_v27 = vsel %vm125_vm1, %v782_v15, %v783_v23  ;;  %v797_v38 = vpack.c.bf16 %v6679_v22, %v6669_v17 }
 0x21b   :  { %v4857_v30 = vpack.c.bf16 %v786_v27, %v787_v29  ;;  %v774_v43 = vsel %vm112_vm0, %v770_v20, %v771_v40 }
 0x21c   :  { %v776_v28 = vsel %vm112_vm0, %v772_v25, %v769_v24  ;;  %v785_v32 = vsel %vm125_vm1, %v783_v23, %v784_v26  ;;  %v788_v33 = vsel %vm125_vm1, %v784_v26, %v781_v19  ;;  %v773_v42 = vsel %vm112_vm0, %v771_v40, %v772_v25 }
 0x21d   :  { %5857 = vmatprep.mubr.msk.bf16.mxu1 %vm6579_vm7, %v4857_v30  ;;  %v4851_v35 = vpack.c.bf16 %v775_v31, %v776_v28  ;;  %v4860_v36 = vpack.c.bf16 %v788_v33, %v785_v32  ;;  %v4854_v46 = vpack.c.bf16 %v773_v42, %v774_v43 }
 0x21f   :  { %4852 = vmatmul.mubr.msk.bf16.vlgmr.msra.gmra.mrb[16].mxu0 %vm6566_vm6, %v4851_v35  ;;  %5858 = vmatmul.mubr.msk.bf16.vlgmr.msra.gmra.mrb[8].mxu1 %vm6588_vm9, %v4860_v36 }
 0x220   :  { %1037 = vmatprep.mubr.bf16.mxu0 %v797_v38  ;;  %5384 = vmatpush3.bf16.msra.mxu0 %v6162_v34 }
 0x221   :  { %5862 = vmatpush3.bf16.msra.mxu1 %v6641_v44  ;;  %5385 = vmatprep.subr.bf16.mxu0 %v6163_v37  ;;  %v6169_v44 = vld [vmem:[#allocation2 + $0x298] sm:$0xff]  }
 0x222   :  { %5863 = vmatprep.subr.bf16.mxu1 %v6164_v39 }
 0x224   :  { %5386 = vmatpush3.bf16.msra.mxu0 %v6165_v41 }
 0x225   :  { %5864 = vmatpush3.bf16.msra.mxu1 %v6164_v39  ;;  %5387 = vmatprep.subr.bf16.mxu0 %v6166_v47 }
 0x226   :  { %5865 = vmatprep.subr.bf16.mxu1 %v6167_v48 }
 0x227   :  { %4855 = vmatmul.mubr.msk.bf16.gmra.mrb[20].mxu0 %vm6597_vm10, %v4854_v46 }
 0x228   :  { %5388 = vmatpush3.bf16.msra.mxu0 %v6168_v49 }
 0x229   :  { %5866 = vmatpush3.bf16.msra.mxu1 %v6167_v48  ;;  %5389 = vmatprep.subr.bf16.mxu0 %v6169_v44 }
 0x22a   :  { %5867 = vmatprep.subr.bf16.mxu1 %v6170_v50 }
 0x22c   :  { %5390 = vmatpush3.bf16.msra.mxu0 %v6171_v51 }
 0x22d   :  { %5868 = vmatpush3.bf16.msra.mxu1 %v6170_v50  ;;  %5391 = vmatprep.subr.bf16.mxu0 %v6172_v53 }
 0x22e   :  { %5869 = vmatprep.subr.bf16.mxu1 %v6173_v54 }
 0x230   :  { %5392 = vmatpush3.bf16.msra.mxu0 %v6174_v55 }
 0x231   :  { %5870 = vmatpush3.bf16.msra.mxu1 %v6173_v54  ;;  %5393 = vmatprep.subr.bf16.mxu0 %v6175_v57 }
 0x232   :  { %5871 = vmatprep.subr.bf16.mxu1 %v6176_v58 }
 0x234   :  { %5394 = vmatpush3.bf16.msra.mxu0 %v6177_v59 }
 0x235   :  { %5872 = vmatpush3.bf16.msra.mxu1 %v6176_v58  ;;  %5395 = vmatprep.subr.bf16.mxu0 %v6178_v60 }
 0x236   :  { %5873 = vmatprep.subr.bf16.mxu1 %v6179_v61 }
 0x238   :  { %5396 = vmatpush3.bf16.msra.mxu0 %v6180_v62 }
 0x239   :  { %5874 = vmatpush3.bf16.msra.mxu1 %v6179_v61  ;;  %5397 = vmatprep.subr.bf16.mxu0 %v6181_v0 }
 0x23a   :  { %5875 = vmatprep.subr.bf16.mxu1 %v6182_v1 }
 0x23c   :  { %5398 = vmatpush3.bf16.msra.mxu0 %v6183_v4  ;;  %v6186_v4 = vld [vmem:[#allocation2 + $0x300] sm:$0xff]  }
 0x23d   :  { %5876 = vmatpush3.bf16.msra.mxu1 %v6182_v1  ;;  %5421 = vmatprep.subr.bf16.mxu0 %v6184_v5 }
 0x23e   :  { %5881 = vmatprep.subr.bf16.mxu1 %v6713_v8 }
 0x2f2   :  { %v5361_v9 = vpop.f32.mrb[16].mxu0  ;;  %v5859_v10 = vpop.f32.mrb[8].mxu1 }
 0x2f3   :  { %v5362_v11 = vpop.f32.mrb[17].mxu0  ;;  %v1080_v14 = vpop.f32.mrb[9].mxu1 }
 0x2f4   :  { %v5363_v15 = vadd.f32 %v5362_v11, %v5361_v9  ;;  %v5364_v18 = vpop.f32.mrb[18].mxu0  ;;  %v5860_v19 = vpop.f32.mrb[10].mxu1  ;;  %v6187_v11 = vld [vmem:[#allocation2 + $0x348] sm:$0xff]  }
 0x2f5   :  { %v5365_v20 = vpop.f32.mrb[19].mxu0  ;;  %v1083_v23 = vpop.f32.mrb[11].mxu1 }
 0x2f6   :  { %v1032_v24 = vadd.f32 %v5363_v15, %v4825_v13  ;;  %v5366_v25 = vadd.f32 %v5365_v20, %v5364_v18  ;;  %v6190_v15 = vld [vmem:[#allocation2 + $0x350] sm:$0xff]   ;;  %v6193_v20 = vld [vmem:[#allocation2 + $0x358] sm:$0xff]  }
 0x2f7   :  { %v6191_v18 = vld [vmem:[#allocation2 + $0x390] sm:$0xff]  }
 0x2f8   :  { %v1081_v26 = vadd.f32 %v1080_v14, %v1032_v24  ;;  %v1035_v27 = vadd.f32 %v5366_v25, %v4825_v13  ;;  %v6189_v14 = vld [vmem:[#allocation2 + $0x308] sm:$0xff]   ;;  %v6195_v24 = vld [vmem:[#allocation2 + $0x318] sm:$0xff]   ;;  %v6197_v25 = vld [vmem:[#allocation2 + $0x3a0] sm:$0xff]  }
 0x2fa   :  { %v1095_v29 = vmax.f32 %v1081_v26, 0.0  ;;  %v1084_v30 = vadd.f32 %v1083_v23, %v1035_v27  ;;  %v5367_v31 = vpop.f32.mrb[20].mxu0  ;;  %v6194_v23 = vld [vmem:[#allocation2 + $0x398] sm:$0xff]   ;;  %v6198_v26 = vld [vmem:[#allocation2 + $0x320] sm:$0xff]   ;;  %v6199_v27 = vld [vmem:[#allocation2 + $0x368] sm:$0xff]  }
 0x2fb   :  { %v5368_v28 = vpop.f32.mrb[21].mxu0 }
 0x2fc   :  { %v1096_v32 = vmax.f32 %v1084_v30, 0.0  ;;  %v5369_v33 = vadd.f32 %v5368_v28, %v5367_v31  ;;  %v5370_v34 = vpop.f32.mrb[22].mxu0  ;;  %v1099_v35 = vrot.slane %v1095_v29, 7  ;;  %v1111_v36 = vrot.slane %v1095_v29, 1  ;;  %v6201_v30 = vld [vmem:[#allocation2 + $0x328] sm:$0xff]   ;;  %v6202_v31 = vld [vmem:[#allocation2 + $0x370] sm:$0xff]  }
 0x2fd   :  { %v5371_v37 = vpop.f32.mrb[23].mxu0  ;;  %v6203_v28 = vld [vmem:[#allocation2 + $0x3b0] sm:$0xff]  }
 0x2fe   :  { %v1100_v38 = vrot.slane %v1096_v32, 7  ;;  %v1112_v39 = vrot.slane %v1096_v32, 1  ;;  %v1040_v40 = vadd.f32 %v5369_v33, %v4825_v13  ;;  %v5372_v41 = vadd.f32 %v5371_v37, %v5370_v34  ;;  %v6205_v33 = vld [vmem:[#allocation2 + $0x378] sm:$0xff]   ;;  %v6209_v37 = vld [vmem:[#allocation2 + $0x440] sm:$0xff]  }
 0x2ff   :  { %v1124_v42 = vpack.c.bf16 %v1096_v32, %v1095_v29  ;;  %v6200_v29 = vld [vmem:[#allocation2 + $0x3a8] sm:$0xff]   ;;  %v6204_v32 = vld [vmem:[#allocation2 + $0x330] sm:$0xff]   ;;  %v6206_v34 = vld [vmem:[#allocation2 + $0x3b8] sm:$0xff]  }
 0x300   :  { %v1105_v43 = vsel %vm112_vm0, %v1099_v35, %v1100_v38  ;;  %v1089_v46 = vadd.f32 %v5859_v10, %v1040_v40  ;;  %v1043_v47 = vadd.f32 %v5372_v41, %v4825_v13  ;;  %v1117_v48 = vsel %vm125_vm1, %v1111_v36, %v1112_v39  ;;  %v6188_v13 = vld [vmem:[#allocation2 + $0x388] sm:$0xff]   ;;  %v4862_v41 = vld [vmem:[#allocation4 + $0x3] ss:$0 sm:$0xff] }
 0x301   :  { %1359 = vmatprep.mubr.bf16.mxu0 %v1124_v42 }
 0x302   :  { %v1097_v49 = vmax.f32 %v1089_v46, 0.0  ;;  %v1092_v44 = vadd.f32 %v5860_v19, %v1043_v47  ;;  %v6192_v19 = vld [vmem:[#allocation2 + $0x310] sm:$0xff]  }
 0x304   :  { %v1101_v50 = vrot.slane %v1097_v49, 7  ;;  %v1113_v51 = vrot.slane %v1097_v49, 1  ;;  %v1098_v53 = vmax.f32 %v1092_v44, 0.0 }
 0x306   :  { %v1102_v54 = vrot.slane %v1098_v53, 7  ;;  %v1114_v55 = vrot.slane %v1098_v53, 1  ;;  %v1116_v57 = vsel %vm125_vm1, %v1112_v39, %v1113_v51  ;;  %v1127_v58 = vpack.c.bf16 %v1098_v53, %v1097_v49 }
 0x307   :  { %v4894_v59 = vpack.c.bf16 %v1116_v57, %v1117_v48  ;;  %v1104_v60 = vsel %vm112_vm0, %v1100_v38, %v1101_v50 }
 0x308   :  { %v1106_v61 = vsel %vm112_vm0, %v1102_v54, %v1099_v35  ;;  %v1115_v62 = vsel %vm125_vm1, %v1113_v51, %v1114_v55  ;;  %v1118_v0 = vsel %vm125_vm1, %v1114_v55, %v1111_v36  ;;  %v1103_v1 = vsel %vm112_vm0, %v1101_v50, %v1102_v54  ;;  %v6207_v35 = vld [vmem:[#allocation2 + $0x338] sm:$0xff]   ;;  %v6208_v36 = vld [vmem:[#allocation2 + $0x400] sm:$0xff]  }
 0x309   :  { %v4888_v5 = vpack.c.bf16 %v1105_v43, %v1106_v61  ;;  %5877 = vmatprep.mubr.msk.bf16.mxu1 %vm6579_vm7, %v4894_v59  ;;  %v4897_v9 = vpack.c.bf16 %v1118_v0, %v1115_v62  ;;  %v4891_v10 = vpack.c.bf16 %v1103_v1, %v1104_v60 }
 0x30b   :  { %4889 = vmatmul.mubr.msk.bf16.vlgmr.msra.gmra.mrb[24].mxu0 %vm6566_vm6, %v4888_v5  ;;  %5878 = vmatmul.mubr.msk.bf16.vlgmr.msra.gmra.mrb[12].mxu1 %vm6588_vm9, %v4897_v9 }
 0x30c   :  { %1367 = vmatprep.mubr.bf16.mxu0 %v1127_v58  ;;  %5422 = vmatpush3.bf16.msra.mxu0 %v6186_v4 }
 0x30d   :  { %5882 = vmatpush3.bf16.msra.mxu1 %v6713_v8  ;;  %5423 = vmatprep.subr.bf16.mxu0 %v6187_v11  ;;  %v6196_v8 = vld [vmem:[#allocation2 + $0x360] sm:$0xff]  }
 0x30e   :  { %5883 = vmatprep.subr.bf16.mxu1 %v6188_v13 }
 0x310   :  { %5424 = vmatpush3.bf16.msra.mxu0 %v6189_v14 }
 0x311   :  { %5884 = vmatpush3.bf16.msra.mxu1 %v6188_v13  ;;  %5425 = vmatprep.subr.bf16.mxu0 %v6190_v15 }
 0x312   :  { %5885 = vmatprep.subr.bf16.mxu1 %v6191_v18 }
 0x313   :  { %4892 = vmatmul.mubr.msk.bf16.gmra.mrb[28].mxu0 %vm6597_vm10, %v4891_v10 }
 0x314   :  { %5426 = vmatpush3.bf16.msra.mxu0 %v6192_v19 }
 0x315   :  { %5886 = vmatpush3.bf16.msra.mxu1 %v6191_v18  ;;  %5427 = vmatprep.subr.bf16.mxu0 %v6193_v20 }
 0x316   :  { %5887 = vmatprep.subr.bf16.mxu1 %v6194_v23 }
 0x318   :  { %5428 = vmatpush3.bf16.msra.mxu0 %v6195_v24 }
 0x319   :  { %5888 = vmatpush3.bf16.msra.mxu1 %v6194_v23  ;;  %5429 = vmatprep.subr.bf16.mxu0 %v6196_v8 }
 0x31a   :  { %5889 = vmatprep.subr.bf16.mxu1 %v6197_v25 }
 0x31c   :  { %5430 = vmatpush3.bf16.msra.mxu0 %v6198_v26 }
 0x31d   :  { %5890 = vmatpush3.bf16.msra.mxu1 %v6197_v25  ;;  %5431 = vmatprep.subr.bf16.mxu0 %v6199_v27  ;;  %v6210_v27 = vld [vmem:[#allocation2 + $0x3c0] sm:$0xff]  }
 0x31e   :  { %5891 = vmatprep.subr.bf16.mxu1 %v6200_v29 }
 0x320   :  { %5432 = vmatpush3.bf16.msra.mxu0 %v6201_v30 }
 0x321   :  { %5892 = vmatpush3.bf16.msra.mxu1 %v6200_v29  ;;  %5433 = vmatprep.subr.bf16.mxu0 %v6202_v31  ;;  %v6211_v31 = vld [vmem:[#allocation2 + $0x408] sm:$0xff]  }
 0x322   :  { %5893 = vmatprep.subr.bf16.mxu1 %v6203_v28 }
 0x324   :  { %5434 = vmatpush3.bf16.msra.mxu0 %v6204_v32  ;;  %v6212_v32 = vld [vmem:[#allocation2 + $0x448] sm:$0xff]  }
 0x325   :  { %5894 = vmatpush3.bf16.msra.mxu1 %v6203_v28  ;;  %5435 = vmatprep.subr.bf16.mxu0 %v6205_v33 }
 0x326   :  { %5895 = vmatprep.subr.bf16.mxu1 %v6206_v34 }
 0x328   :  { %5436 = vmatpush3.bf16.msra.mxu0 %v6207_v35 }
 0x329   :  { %5896 = vmatpush3.bf16.msra.mxu1 %v6206_v34  ;;  %5459 = vmatprep.subr.bf16.mxu0 %v6208_v36  ;;  %v6213_v34 = vld [vmem:[#allocation2 + $0x3c8] sm:$0xff]  }
 0x32a   :  { %5901 = vmatprep.subr.bf16.mxu1 %v6209_v37 }
 0x3de   :  { %v5399_v38 = vpop.f32.mrb[24].mxu0  ;;  %v5879_v39 = vpop.f32.mrb[12].mxu1 }
 0x3df   :  { %v5400_v40 = vpop.f32.mrb[25].mxu0  ;;  %v1410_v42 = vpop.f32.mrb[13].mxu1 }
 0x3e0   :  { %v5401_v43 = vadd.f32 %v5400_v40, %v5399_v38  ;;  %v5402_v46 = vpop.f32.mrb[26].mxu0  ;;  %v5880_v47 = vpop.f32.mrb[14].mxu1  ;;  %v6215_v40 = vld [vmem:[#allocation2 + $0x450] sm:$0xff]  }
 0x3e1   :  { %v5403_v48 = vpop.f32.mrb[27].mxu0  ;;  %v1413_v49 = vpop.f32.mrb[15].mxu1 }
 0x3e2   :  { %v1362_v44 = vadd.f32 %v5401_v43, %v4862_v41  ;;  %v5404_v50 = vadd.f32 %v5403_v48, %v5402_v46  ;;  %v6219_v43 = vld [vmem:[#allocation2 + $0x3d8] sm:$0xff]   ;;  %v6220_v46 = vld [vmem:[#allocation2 + $0x420] sm:$0xff]  }
 0x3e3   :  { %v6222_v48 = vld [vmem:[#allocation2 + $0x3e0] sm:$0xff]  }
 0x3e4   :  { %v1411_v51 = vadd.f32 %v1410_v42, %v1362_v44  ;;  %v1365_v53 = vadd.f32 %v5404_v50, %v4862_v41  ;;  %v6218_v42 = vld [vmem:[#allocation2 + $0x458] sm:$0xff]   ;;  %v6224_v44 = vld [vmem:[#allocation2 + $0x468] sm:$0xff]  }
 0x3e5   :  { %v6225_v50 = vld [vmem:[#allocation2 + $0x3e8] sm:$0xff]  }
 0x3e6   :  { %v1414_v54 = vadd.f32 %v1413_v49, %v1365_v53  ;;  %v5405_v55 = vpop.f32.mrb[28].mxu0  ;;  %v6745_v61 = vadd.f32 %v1411_v51, %v6658_v7  ;;  %v6223_v49 = vld [vmem:[#allocation2 + $0x428] sm:$0xff]   ;;  %v6226_v51 = vld [vmem:[#allocation2 + $0x430] sm:$0xff]  }
 0x3e7   :  { %v5406_v57 = vpop.f32.mrb[29].mxu0  ;;  %v6227_v53 = vld [vmem:[#allocation2 + $0x470] sm:$0xff]  }
 0x3e8   :  { %v6742_v58 = vadd.f32 %v1414_v54, %v6650_v3  ;;  %v5407_v59 = vadd.f32 %v5406_v57, %v5405_v55  ;;  %v5408_v60 = vpop.f32.mrb[30].mxu0  ;;  %v1441_v13 = vrot.slane %v6745_v61, 1  ;;  %v1429_v18 = vrot.slane %v6745_v61, 7  ;;  %v6228_v54 = vld [vmem:[#allocation2 + $0x3f0] sm:$0xff]   ;;  %v6229_v55 = vld [vmem:[#allocation2 + $0x438] sm:$0xff]  }
 0x3e9   :  { %v5409_v62 = vpop.f32.mrb[31].mxu0  ;;  %v6230_v57 = vld [vmem:[#allocation2 + $0x478] sm:$0xff]  }
 0x3ea   :  { %v1370_v0 = vadd.f32 %v5407_v59, %v4862_v41  ;;  %v5410_v1 = vadd.f32 %v5409_v62, %v5408_v60  ;;  %v1454_v4 = vpack.c.bf16 %v6742_v58, %v6745_v61  ;;  %v1442_v10 = vrot.slane %v6742_v58, 1  ;;  %v6231_v59 = vld [vmem:[#allocation2 + $0x3f8] sm:$0xff]   ;;  %v6232_v60 = vld [vmem:[#allocation2 + $0x4c0] sm:$0xff]  }
 0x3eb   :  { %v1430_v7 = vrot.slane %v6742_v58, 7  ;;  %v6233_v62 = vld [vmem:[#allocation2 + $0x500] sm:$0xff]  }
 0x3ec   :  { %v1419_v5 = vadd.f32 %v5879_v39, %v1370_v0  ;;  %v1373_v9 = vadd.f32 %v5410_v1, %v4862_v41  ;;  %1689 = vmatprep.mubr.bf16.mxu0 %v1454_v4  ;;  %v1447_v23 = vsel %vm125_vm1, %v1441_v13, %v1442_v10  ;;  %v6214_v39 = vld [vmem:[#allocation2 + $0x410] sm:$0xff]  }
 0x3ed   :  { %v1435_v8 = vsel %vm112_vm0, %v1429_v18, %v1430_v7  ;;  %v6216_v41 = vld [vmem:[#allocation2 + $0x3d0] sm:$0xff]  }
 0x3ee   :  { %v6751_v11 = vadd.f32 %v1419_v5, %v6669_v17  ;;  %v1422_v3 = vadd.f32 %v5880_v47, %v1373_v9  ;;  %v6221_v47 = vld [vmem:[#allocation2 + $0x460] sm:$0xff]  }
 0x3ef   :  { %v4899_v5 = vld [vmem:[#allocation4 + $0x4] ss:$0 sm:$0xff] }
 0x3f0   :  { %v6756_v14 = vadd.f32 %v1422_v3, %v6679_v22  ;;  %v1443_v15 = vrot.slane %v6751_v11, 1  ;;  %v1431_v33 = vrot.slane %v6751_v11, 7 }
 0x3f2   :  { %v1432_v19 = vrot.slane %v6756_v14, 7  ;;  %v1444_v20 = vrot.slane %v6756_v14, 1  ;;  %v1446_v17 = vsel %vm125_vm1, %v1442_v10, %v1443_v15  ;;  %v1457_v28 = vpack.c.bf16 %v6756_v14, %v6751_v11 }
 0x3f3   :  { %v4931_v24 = vpack.c.bf16 %v1446_v17, %v1447_v23  ;;  %v1434_v36 = vsel %vm112_vm0, %v1430_v7, %v1431_v33 }
 0x3f4   :  { %v1436_v22 = vsel %vm112_vm0, %v1432_v19, %v1429_v18  ;;  %v1445_v25 = vsel %vm125_vm1, %v1443_v15, %v1444_v20  ;;  %v1448_v26 = vsel %vm125_vm1, %v1444_v20, %v1441_v13  ;;  %v1433_v35 = vsel %vm112_vm0, %v1431_v33, %v1432_v19 }
 0x3f5   :  { %5897 = vmatprep.mubr.msk.bf16.mxu1 %vm6579_vm7, %v4931_v24  ;;  %v4925_v29 = vpack.c.bf16 %v1435_v8, %v1436_v22  ;;  %v4934_v30 = vpack.c.bf16 %v1448_v26, %v1445_v25  ;;  %v4928_v38 = vpack.c.bf16 %v1433_v35, %v1434_v36 }
 0x3f7   :  { %4926 = vmatmul.mubr.msk.bf16.vlgmr.msra.gmra.mrb[32].mxu0 %vm6566_vm6, %v4925_v29  ;;  %5898 = vmatmul.mubr.msk.bf16.vlgmr.msra.gmra.mrb[16].mxu1 %vm6588_vm9, %v4934_v30 }
 0x3f8   :  { %1697 = vmatprep.mubr.bf16.mxu0 %v1457_v28  ;;  %5460 = vmatpush3.bf16.msra.mxu0 %v6210_v27 }
 0x3f9   :  { %5902 = vmatpush3.bf16.msra.mxu1 %v6209_v37  ;;  %5461 = vmatprep.subr.bf16.mxu0 %v6211_v31  ;;  %v6217_v37 = vld [vmem:[#allocation2 + $0x418] sm:$0xff]  }
 0x3fa   :  { %5903 = vmatprep.subr.bf16.mxu1 %v6212_v32 }
 0x3fc   :  { %5462 = vmatpush3.bf16.msra.mxu0 %v6213_v34 }
 0x3fd   :  { %5904 = vmatpush3.bf16.msra.mxu1 %v6212_v32  ;;  %5463 = vmatprep.subr.bf16.mxu0 %v6214_v39 }
 0x3fe   :  { %5905 = vmatprep.subr.bf16.mxu1 %v6215_v40 }
 0x3ff   :  { %4929 = vmatmul.mubr.msk.bf16.gmra.mrb[36].mxu0 %vm6597_vm10, %v4928_v38 }
 0x400   :  { %5464 = vmatpush3.bf16.msra.mxu0 %v6216_v41 }
 0x401   :  { %5906 = vmatpush3.bf16.msra.mxu1 %v6215_v40  ;;  %5465 = vmatprep.subr.bf16.mxu0 %v6217_v37 }
 0x402   :  { %5907 = vmatprep.subr.bf16.mxu1 %v6218_v42 }
 0x404   :  { %5466 = vmatpush3.bf16.msra.mxu0 %v6219_v43 }
 0x405   :  { %5908 = vmatpush3.bf16.msra.mxu1 %v6218_v42  ;;  %5467 = vmatprep.subr.bf16.mxu0 %v6220_v46 }
 0x406   :  { %5909 = vmatprep.subr.bf16.mxu1 %v6221_v47 }
 0x408   :  { %5468 = vmatpush3.bf16.msra.mxu0 %v6222_v48 }
 0x409   :  { %5910 = vmatpush3.bf16.msra.mxu1 %v6221_v47  ;;  %5469 = vmatprep.subr.bf16.mxu0 %v6223_v49 }
 0x40a   :  { %5911 = vmatprep.subr.bf16.mxu1 %v6224_v44 }
 0x40c   :  { %5470 = vmatpush3.bf16.msra.mxu0 %v6225_v50 }
 0x40d   :  { %5912 = vmatpush3.bf16.msra.mxu1 %v6224_v44  ;;  %5471 = vmatprep.subr.bf16.mxu0 %v6226_v51 }
 0x40e   :  { %5913 = vmatprep.subr.bf16.mxu1 %v6227_v53 }
 0x410   :  { %5472 = vmatpush3.bf16.msra.mxu0 %v6228_v54 }
 0x411   :  { %5914 = vmatpush3.bf16.msra.mxu1 %v6227_v53  ;;  %5473 = vmatprep.subr.bf16.mxu0 %v6229_v55 }
 0x412   :  { %5915 = vmatprep.subr.bf16.mxu1 %v6230_v57 }
 0x414   :  { %5474 = vmatpush3.bf16.msra.mxu0 %v6231_v59  ;;  %v6234_v59 = vld [vmem:[#allocation2 + $0x480] sm:$0xff]  }
 0x415   :  { %5916 = vmatpush3.bf16.msra.mxu1 %v6230_v57  ;;  %5497 = vmatprep.subr.bf16.mxu0 %v6232_v60 }
 0x416   :  { %5921 = vmatprep.subr.bf16.mxu1 %v6233_v62 }
 0x4ca   :  { %v5437_v0 = vpop.f32.mrb[32].mxu0  ;;  %v5899_v1 = vpop.f32.mrb[16].mxu1 }
 0x4cb   :  { %v5438_v4 = vpop.f32.mrb[33].mxu0  ;;  %v1740_v9 = vpop.f32.mrb[17].mxu1 }
 0x4cc   :  { %v5439_v10 = vadd.f32 %v5438_v4, %v5437_v0  ;;  %v5440_v3 = vpop.f32.mrb[34].mxu0  ;;  %v5900_v13 = vpop.f32.mrb[18].mxu1  ;;  %v6235_v4 = vld [vmem:[#allocation2 + $0x4c8] sm:$0xff]  }
 0x4cd   :  { %v5441_v7 = vpop.f32.mrb[35].mxu0  ;;  %v1743_v15 = vpop.f32.mrb[19].mxu1 }
 0x4ce   :  { %v1692_v18 = vadd.f32 %v5439_v10, %v4899_v5  ;;  %v5442_v19 = vadd.f32 %v5441_v7, %v5440_v3  ;;  %v6238_v10 = vld [vmem:[#allocation2 + $0x4d0] sm:$0xff]   ;;  %v6241_v7 = vld [vmem:[#allocation2 + $0x4d8] sm:$0xff]  }
 0x4cf   :  { %v6239_v3 = vld [vmem:[#allocation2 + $0x510] sm:$0xff]  }
 0x4d0   :  { %v1741_v20 = vadd.f32 %v1740_v9, %v1692_v18  ;;  %v1695_v17 = vadd.f32 %v5442_v19, %v4899_v5  ;;  %v6237_v9 = vld [vmem:[#allocation2 + $0x488] sm:$0xff]   ;;  %v6243_v18 = vld [vmem:[#allocation2 + $0x498] sm:$0xff]   ;;  %v6245_v19 = vld [vmem:[#allocation2 + $0x520] sm:$0xff]  }
 0x4d2   :  { %v1755_v23 = vmax.f32 %v1741_v20, 0.0  ;;  %v1744_v24 = vadd.f32 %v1743_v15, %v1695_v17  ;;  %v5443_v8 = vpop.f32.mrb[36].mxu0  ;;  %v6242_v15 = vld [vmem:[#allocation2 + $0x518] sm:$0xff]   ;;  %v6246_v20 = vld [vmem:[#allocation2 + $0x4a0] sm:$0xff]   ;;  %v6247_v17 = vld [vmem:[#allocation2 + $0x4e8] sm:$0xff]  }
 0x4d3   :  { %v5444_v22 = vpop.f32.mrb[37].mxu0 }
 0x4d4   :  { %v1756_v25 = vmax.f32 %v1744_v24, 0.0  ;;  %v5445_v26 = vadd.f32 %v5444_v22, %v5443_v8  ;;  %v5446_v27 = vpop.f32.mrb[38].mxu0  ;;  %v1759_v29 = vrot.slane %v1755_v23, 7  ;;  %v1771_v30 = vrot.slane %v1755_v23, 1  ;;  %v6249_v24 = vld [vmem:[#allocation2 + $0x4a8] sm:$0xff]   ;;  %v6250_v8 = vld [vmem:[#allocation2 + $0x4f0] sm:$0xff]  }
 0x4d5   :  { %v5447_v31 = vpop.f32.mrb[39].mxu0  ;;  %v6251_v22 = vld [vmem:[#allocation2 + $0x530] sm:$0xff]  }
 0x4d6   :  { %v1760_v28 = vrot.slane %v1756_v25, 7  ;;  %v1772_v32 = vrot.slane %v1756_v25, 1  ;;  %v1700_v33 = vadd.f32 %v5445_v26, %v4899_v5  ;;  %v5448_v34 = vadd.f32 %v5447_v31, %v5446_v27  ;;  %v6253_v26 = vld [vmem:[#allocation2 + $0x4f8] sm:$0xff]   ;;  %v6813_v31 = vld [vmem:[#allocation2 + $0x5c0] sm:$0xff]  }
 0x4d7   :  { %v1784_v35 = vpack.c.bf16 %v1756_v25, %v1755_v23  ;;  %v6248_v23 = vld [vmem:[#allocation2 + $0x528] sm:$0xff]   ;;  %v6252_v25 = vld [vmem:[#allocation2 + $0x4b0] sm:$0xff]   ;;  %v6254_v27 = vld [vmem:[#allocation2 + $0x538] sm:$0xff]  }
 0x4d8   :  { %v1765_v36 = vsel %vm112_vm0, %v1759_v29, %v1760_v28  ;;  %v1749_v38 = vadd.f32 %v5899_v1, %v1700_v33  ;;  %v1703_v39 = vadd.f32 %v5448_v34, %v4899_v5  ;;  %v1777_v40 = vsel %vm125_vm1, %v1771_v30, %v1772_v32  ;;  %v6236_v5 = vld [vmem:[#allocation2 + $0x508] sm:$0xff]   ;;  %v4936_v34 = vld [vmem:[#allocation4 + $0x5] ss:$0 sm:$0xff] }
 0x4d9   :  { %2019 = vmatprep.mubr.bf16.mxu0 %v1784_v35 }
 0x4da   :  { %v1757_v41 = vmax.f32 %v1749_v38, 0.0  ;;  %v1752_v37 = vadd.f32 %v5900_v13, %v1703_v39  ;;  %v6240_v13 = vld [vmem:[#allocation2 + $0x490] sm:$0xff]  }
 0x4dc   :  { %v1761_v42 = vrot.slane %v1757_v41, 7  ;;  %v1773_v43 = vrot.slane %v1757_v41, 1  ;;  %v1758_v46 = vmax.f32 %v1752_v37, 0.0 }
 0x4de   :  { %v1762_v47 = vrot.slane %v1758_v46, 7  ;;  %v1774_v48 = vrot.slane %v1758_v46, 1  ;;  %v1776_v49 = vsel %vm125_vm1, %v1772_v32, %v1773_v43  ;;  %v1787_v44 = vpack.c.bf16 %v1758_v46, %v1757_v41 }
 0x4df   :  { %v4968_v50 = vpack.c.bf16 %v1776_v49, %v1777_v40  ;;  %v1764_v51 = vsel %vm112_vm0, %v1760_v28, %v1761_v42 }
 0x4e0   :  { %v1766_v53 = vsel %vm112_vm0, %v1762_v47, %v1759_v29  ;;  %v1775_v54 = vsel %vm125_vm1, %v1773_v43, %v1774_v48  ;;  %v1778_v55 = vsel %vm125_vm1, %v1774_v48, %v1771_v30  ;;  %v1763_v57 = vsel %vm112_vm0, %v1761_v42, %v1762_v47  ;;  %v6255_v29 = vld [vmem:[#allocation2 + $0x4b8] sm:$0xff]   ;;  %v6256_v30 = vld [vmem:[#allocation2 + $0x580] sm:$0xff]  }
 0x4e1   :  { %v4962_v60 = vpack.c.bf16 %v1765_v36, %v1766_v53  ;;  %5917 = vmatprep.mubr.msk.bf16.mxu1 %vm6579_vm7, %v4968_v50  ;;  %v4971_v0 = vpack.c.bf16 %v1778_v55, %v1775_v54  ;;  %v4965_v1 = vpack.c.bf16 %v1763_v57, %v1764_v51 }
 0x4e3   :  { %4963 = vmatmul.mubr.msk.bf16.vlgmr.msra.gmra.mrb[40].mxu0 %vm6566_vm6, %v4962_v60  ;;  %5918 = vmatmul.mubr.msk.bf16.vlgmr.msra.gmra.mrb[20].mxu1 %vm6588_vm9, %v4971_v0 }
 0x4e4   :  { %2027 = vmatprep.mubr.bf16.mxu0 %v1787_v44  ;;  %5498 = vmatpush3.bf16.msra.mxu0 %v6234_v59 }
 0x4e5   :  { %5922 = vmatpush3.bf16.msra.mxu1 %v6233_v62  ;;  %5499 = vmatprep.subr.bf16.mxu0 %v6235_v4  ;;  %v6244_v62 = vld [vmem:[#allocation2 + $0x4e0] sm:$0xff]  }
 0x4e6   :  { %5923 = vmatprep.subr.bf16.mxu1 %v6236_v5 }
 0x4e8   :  { %5500 = vmatpush3.bf16.msra.mxu0 %v6237_v9 }
 0x4e9   :  { %5924 = vmatpush3.bf16.msra.mxu1 %v6236_v5  ;;  %5501 = vmatprep.subr.bf16.mxu0 %v6238_v10 }
 0x4ea   :  { %5925 = vmatprep.subr.bf16.mxu1 %v6239_v3 }
 0x4eb   :  { %4966 = vmatmul.mubr.msk.bf16.gmra.mrb[44].mxu0 %vm6597_vm10, %v4965_v1 }
 0x4ec   :  { %5502 = vmatpush3.bf16.msra.mxu0 %v6240_v13 }
 0x4ed   :  { %5926 = vmatpush3.bf16.msra.mxu1 %v6239_v3  ;;  %5503 = vmatprep.subr.bf16.mxu0 %v6241_v7 }
 0x4ee   :  { %5927 = vmatprep.subr.bf16.mxu1 %v6242_v15 }
 0x4f0   :  { %5504 = vmatpush3.bf16.msra.mxu0 %v6243_v18 }
 0x4f1   :  { %5928 = vmatpush3.bf16.msra.mxu1 %v6242_v15  ;;  %5505 = vmatprep.subr.bf16.mxu0 %v6244_v62 }
 0x4f2   :  { %5929 = vmatprep.subr.bf16.mxu1 %v6245_v19 }
 0x4f4   :  { %5506 = vmatpush3.bf16.msra.mxu0 %v6246_v20 }
 0x4f5   :  { %5930 = vmatpush3.bf16.msra.mxu1 %v6245_v19  ;;  %5507 = vmatprep.subr.bf16.mxu0 %v6247_v17  ;;  %v6258_v17 = vld [vmem:[#allocation2 + $0x540] sm:$0xff]  }
 0x4f6   :  { %5931 = vmatprep.subr.bf16.mxu1 %v6248_v23 }
 0x4f8   :  { %5508 = vmatpush3.bf16.msra.mxu0 %v6249_v24 }
 0x4f9   :  { %5932 = vmatpush3.bf16.msra.mxu1 %v6248_v23  ;;  %5509 = vmatprep.subr.bf16.mxu0 %v6250_v8  ;;  %v6259_v8 = vld [vmem:[#allocation2 + $0x588] sm:$0xff]  }
 0x4fa   :  { %5933 = vmatprep.subr.bf16.mxu1 %v6251_v22 }
 0x4fc   :  { %5510 = vmatpush3.bf16.msra.mxu0 %v6252_v25  ;;  %v6260_v25 = vld [vmem:[#allocation2 + $0x5c8] sm:$0xff]  }
 0x4fd   :  { %5934 = vmatpush3.bf16.msra.mxu1 %v6251_v22  ;;  %5511 = vmatprep.subr.bf16.mxu0 %v6253_v26 }
 0x4fe   :  { %5935 = vmatprep.subr.bf16.mxu1 %v6254_v27 }
 0x500   :  { %5512 = vmatpush3.bf16.msra.mxu0 %v6255_v29 }
 0x501   :  { %5936 = vmatpush3.bf16.msra.mxu1 %v6254_v27  ;;  %5535 = vmatprep.subr.bf16.mxu0 %v6256_v30  ;;  %v6261_v27 = vld [vmem:[#allocation2 + $0x548] sm:$0xff]  }
 0x502   :  { %5941 = vmatprep.subr.bf16.mxu1 %v6813_v31 }
 0x5b6   :  { %v5475_v28 = vpop.f32.mrb[40].mxu0  ;;  %v5919_v32 = vpop.f32.mrb[20].mxu1 }
 0x5b7   :  { %v5476_v33 = vpop.f32.mrb[41].mxu0  ;;  %v2070_v35 = vpop.f32.mrb[21].mxu1 }
 0x5b8   :  { %v5477_v36 = vadd.f32 %v5476_v33, %v5475_v28  ;;  %v5478_v38 = vpop.f32.mrb[42].mxu0  ;;  %v5920_v39 = vpop.f32.mrb[22].mxu1  ;;  %v6263_v33 = vld [vmem:[#allocation2 + $0x5d0] sm:$0xff]  }
 0x5b9   :  { %v5479_v40 = vpop.f32.mrb[43].mxu0  ;;  %v2073_v41 = vpop.f32.mrb[23].mxu1 }
 0x5ba   :  { %v2022_v37 = vadd.f32 %v5477_v36, %v4936_v34  ;;  %v5480_v42 = vadd.f32 %v5479_v40, %v5478_v38  ;;  %v6267_v36 = vld [vmem:[#allocation2 + $0x558] sm:$0xff]   ;;  %v6268_v38 = vld [vmem:[#allocation2 + $0x5a0] sm:$0xff]  }
 0x5bb   :  { %v6270_v40 = vld [vmem:[#allocation2 + $0x560] sm:$0xff]  }
 0x5bc   :  { %v2071_v43 = vadd.f32 %v2070_v35, %v2022_v37  ;;  %v2025_v46 = vadd.f32 %v5480_v42, %v4936_v34  ;;  %v6266_v35 = vld [vmem:[#allocation2 + $0x5d8] sm:$0xff]   ;;  %v6272_v37 = vld [vmem:[#allocation2 + $0x5e8] sm:$0xff]  }
 0x5bd   :  { %v6273_v42 = vld [vmem:[#allocation2 + $0x568] sm:$0xff]  }
 0x5be   :  { %v2085_v47 = vadd.f32 %v2071_v43, %v6745_v61  ;;  %v2074_v48 = vadd.f32 %v2073_v41, %v2025_v46  ;;  %v5481_v49 = vpop.f32.mrb[44].mxu0  ;;  %v6271_v41 = vld [vmem:[#allocation2 + $0x5a8] sm:$0xff]   ;;  %v6274_v43 = vld [vmem:[#allocation2 + $0x5b0] sm:$0xff]  }
 0x5bf   :  { %v5482_v44 = vpop.f32.mrb[45].mxu0  ;;  %v6275_v46 = vld [vmem:[#allocation2 + $0x5f0] sm:$0xff]  }
 0x5c0   :  { %v2086_v50 = vadd.f32 %v2074_v48, %v6742_v58  ;;  %v5483_v51 = vadd.f32 %v5482_v44, %v5481_v49  ;;  %v5484_v53 = vpop.f32.mrb[46].mxu0  ;;  %v6819_v55 = vadd.f32 %v6655_v6, %v2085_v47  ;;  %v6276_v47 = vld [vmem:[#allocation2 + $0x570] sm:$0xff]   ;;  %v6277_v48 = vld [vmem:[#allocation2 + $0x5b8] sm:$0xff]  }
 0x5c1   :  { %v5485_v54 = vpop.f32.mrb[47].mxu0  ;;  %v6278_v49 = vld [vmem:[#allocation2 + $0x5f8] sm:$0xff]  }
 0x5c2   :  { %v6822_v57 = vadd.f32 %v6647_v2, %v2086_v50  ;;  %v2030_v59 = vadd.f32 %v5483_v51, %v4936_v34  ;;  %v5486_v60 = vadd.f32 %v5485_v54, %v5484_v53  ;;  %v2105_v3 = vrot.slane %v6819_v55, 1  ;;  %v6279_v44 = vld [vmem:[#allocation2 + $0x578] sm:$0xff]   ;;  %v6280_v50 = vld [vmem:[#allocation2 + $0x640] sm:$0xff]  }
 0x5c3   :  { %v6869_v51 = vld [vmem:[#allocation2 + $0x680] sm:$0xff]  }
 0x5c4   :  { %v2079_v0 = vadd.f32 %v5919_v32, %v2030_v59  ;;  %v2033_v1 = vadd.f32 %v5486_v60, %v4936_v34  ;;  %v2118_v61 = vpack.c.bf16 %v6822_v57, %v6819_v55  ;;  %v2106_v9 = vrot.slane %v6822_v57, 1  ;;  %v6262_v32 = vld [vmem:[#allocation2 + $0x590] sm:$0xff]   ;;  %v4973_v60 = vld [vmem:[#allocation4 + $0x6] ss:$0 sm:$0xff] }
 0x5c5   :  { %v2094_v2 = vrot.slane %v6822_v57, 7  ;;  %v6264_v34 = vld [vmem:[#allocation2 + $0x550] sm:$0xff]  }
 0x5c6   :  { %v2087_v4 = vadd.f32 %v2079_v0, %v6751_v11  ;;  %v2082_v5 = vadd.f32 %v5920_v39, %v2033_v1  ;;  %2353 = vmatprep.mubr.bf16.mxu0 %v2118_v61  ;;  %v2093_v11 = vrot.slane %v6819_v55, 7  ;;  %v6269_v39 = vld [vmem:[#allocation2 + $0x5e0] sm:$0xff]  }
 0x5c8   :  { %v6828_v58 = vadd.f32 %v6666_v16, %v2087_v4  ;;  %v2088_v6 = vadd.f32 %v2082_v5, %v6756_v14  ;;  %v2111_v14 = vsel %vm125_vm1, %v2105_v3, %v2106_v9 }
 0x5ca   :  { %v6834_v10 = vadd.f32 %v6676_v21, %v2088_v6  ;;  %v2107_v13 = vrot.slane %v6828_v58, 1  ;;  %v2099_v21 = vsel %vm112_vm0, %v2093_v11, %v2094_v2  ;;  %v2095_v26 = vrot.slane %v6828_v58, 7 }
 0x5cc   :  { %v2096_v7 = vrot.slane %v6834_v10, 7  ;;  %v2110_v16 = vsel %vm125_vm1, %v2106_v9, %v2107_v13  ;;  %v2108_v15 = vrot.slane %v6834_v10, 1  ;;  %v2121_v22 = vpack.c.bf16 %v6834_v10, %v6828_v58 }
 0x5cd   :  { %v5005_v18 = vpack.c.bf16 %v2110_v16, %v2111_v14  ;;  %v2098_v30 = vsel %vm112_vm0, %v2094_v2, %v2095_v26 }
 0x5ce   :  { %v2100_v62 = vsel %vm112_vm0, %v2096_v7, %v2093_v11  ;;  %v2109_v19 = vsel %vm125_vm1, %v2107_v13, %v2108_v15  ;;  %v2112_v20 = vsel %vm125_vm1, %v2108_v15, %v2105_v3  ;;  %v2097_v29 = vsel %vm112_vm0, %v2095_v26, %v2096_v7 }
 0x5cf   :  { %5937 = vmatprep.mubr.msk.bf16.mxu1 %vm6579_vm7, %v5005_v18  ;;  %v4999_v23 = vpack.c.bf16 %v2099_v21, %v2100_v62  ;;  %v5008_v24 = vpack.c.bf16 %v2112_v20, %v2109_v19  ;;  %v5002_v28 = vpack.c.bf16 %v2097_v29, %v2098_v30 }
 0x5d1   :  { %5000 = vmatmul.mubr.msk.bf16.vlgmr.msra.gmra.mrb[48].mxu0 %vm6566_vm6, %v4999_v23  ;;  %5938 = vmatmul.mubr.msk.bf16.vlgmr.msra.gmra.mrb[24].mxu1 %vm6588_vm9, %v5008_v24 }
 0x5d2   :  { %2361 = vmatprep.mubr.bf16.mxu0 %v2121_v22  ;;  %5536 = vmatpush3.bf16.msra.mxu0 %v6258_v17 }
 0x5d3   :  { %5942 = vmatpush3.bf16.msra.mxu1 %v6813_v31  ;;  %5537 = vmatprep.subr.bf16.mxu0 %v6259_v8  ;;  %v6265_v31 = vld [vmem:[#allocation2 + $0x598] sm:$0xff]  }
 0x5d4   :  { %5943 = vmatprep.subr.bf16.mxu1 %v6260_v25 }
 0x5d6   :  { %5538 = vmatpush3.bf16.msra.mxu0 %v6261_v27 }
 0x5d7   :  { %5944 = vmatpush3.bf16.msra.mxu1 %v6260_v25  ;;  %5539 = vmatprep.subr.bf16.mxu0 %v6262_v32 }
 0x5d8   :  { %5945 = vmatprep.subr.bf16.mxu1 %v6263_v33 }
 0x5d9   :  { %5003 = vmatmul.mubr.msk.bf16.gmra.mrb[52].mxu0 %vm6597_vm10, %v5002_v28 }
 0x5da   :  { %5540 = vmatpush3.bf16.msra.mxu0 %v6264_v34 }
 0x5db   :  { %5946 = vmatpush3.bf16.msra.mxu1 %v6263_v33  ;;  %5541 = vmatprep.subr.bf16.mxu0 %v6265_v31 }
 0x5dc   :  { %5947 = vmatprep.subr.bf16.mxu1 %v6266_v35 }
 0x5de   :  { %5542 = vmatpush3.bf16.msra.mxu0 %v6267_v36 }
 0x5df   :  { %5948 = vmatpush3.bf16.msra.mxu1 %v6266_v35  ;;  %5543 = vmatprep.subr.bf16.mxu0 %v6268_v38 }
 0x5e0   :  { %5949 = vmatprep.subr.bf16.mxu1 %v6269_v39 }
 0x5e2   :  { %5544 = vmatpush3.bf16.msra.mxu0 %v6270_v40 }
 0x5e3   :  { %5950 = vmatpush3.bf16.msra.mxu1 %v6269_v39  ;;  %5545 = vmatprep.subr.bf16.mxu0 %v6271_v41 }
 0x5e4   :  { %5951 = vmatprep.subr.bf16.mxu1 %v6272_v37 }
 0x5e6   :  { %5546 = vmatpush3.bf16.msra.mxu0 %v6273_v42 }
 0x5e7   :  { %5952 = vmatpush3.bf16.msra.mxu1 %v6272_v37  ;;  %5547 = vmatprep.subr.bf16.mxu0 %v6274_v43 }
 0x5e8   :  { %5953 = vmatprep.subr.bf16.mxu1 %v6275_v46 }
 0x5ea   :  { %5548 = vmatpush3.bf16.msra.mxu0 %v6276_v47 }
 0x5eb   :  { %5954 = vmatpush3.bf16.msra.mxu1 %v6275_v46  ;;  %5549 = vmatprep.subr.bf16.mxu0 %v6277_v48  ;;  %v6282_v46 = vld [vmem:[#allocation2 + $0x600] sm:$0xff]  }
 0x5ec   :  { %5955 = vmatprep.subr.bf16.mxu1 %v6278_v49 }
 0x5ee   :  { %5550 = vmatpush3.bf16.msra.mxu0 %v6279_v44  ;;  %v6283_v44 = vld [vmem:[#allocation2 + $0x648] sm:$0xff]  }
 0x5ef   :  { %5956 = vmatpush3.bf16.msra.mxu1 %v6278_v49  ;;  %5573 = vmatprep.subr.bf16.mxu0 %v6280_v50  ;;  %v6284_v50 = vld [vmem:[#allocation2 + $0x688] sm:$0xff]  }
 0x5f0   :  { %5961 = vmatprep.subr.bf16.mxu1 %v6869_v51 }
 0x6a4   :  { %v5513_v53 = vpop.f32.mrb[48].mxu0  ;;  %v5939_v54 = vpop.f32.mrb[24].mxu1 }
 0x6a5   :  { %v5514_v59 = vpop.f32.mrb[49].mxu0  ;;  %v2404_v0 = vpop.f32.mrb[25].mxu1 }
 0x6a6   :  { %v5515_v1 = vadd.f32 %v5514_v59, %v5513_v53  ;;  %v5516_v61 = vpop.f32.mrb[50].mxu0  ;;  %v5940_v4 = vpop.f32.mrb[26].mxu1  ;;  %v6285_v53 = vld [vmem:[#allocation2 + $0x608] sm:$0xff]   ;;  %v6287_v59 = vld [vmem:[#allocation2 + $0x690] sm:$0xff]  }
 0x6a7   :  { %v5517_v5 = vpop.f32.mrb[51].mxu0  ;;  %v2407_v6 = vpop.f32.mrb[27].mxu1 }
 0x6a8   :  { %v2356_v9 = vadd.f32 %v5515_v1, %v4973_v60  ;;  %v5518_v2 = vadd.f32 %v5517_v5, %v5516_v61  ;;  %v6290_v1 = vld [vmem:[#allocation2 + $0x698] sm:$0xff]   ;;  %v6294_v5 = vld [vmem:[#allocation2 + $0x620] sm:$0xff]  }
 0x6a9   :  { %v6291_v61 = vld [vmem:[#allocation2 + $0x618] sm:$0xff]  }
 0x6aa   :  { %v2405_v3 = vadd.f32 %v2404_v0, %v2356_v9  ;;  %v2359_v13 = vadd.f32 %v5518_v2, %v4973_v60  ;;  %v6289_v0 = vld [vmem:[#allocation2 + $0x658] sm:$0xff]   ;;  %v6296_v9 = vld [vmem:[#allocation2 + $0x6a8] sm:$0xff]  }
 0x6ab   :  { %v6297_v2 = vld [vmem:[#allocation2 + $0x628] sm:$0xff]  }
 0x6ac   :  { %v2419_v11 = vmax.f32 %v2405_v3, 0.0  ;;  %v2408_v7 = vadd.f32 %v2407_v6, %v2359_v13  ;;  %v5519_v16 = vpop.f32.mrb[52].mxu0  ;;  %v6295_v6 = vld [vmem:[#allocation2 + $0x668] sm:$0xff]   ;;  %v6298_v3 = vld [vmem:[#allocation2 + $0x670] sm:$0xff]  }
 0x6ad   :  { %v5520_v14 = vpop.f32.mrb[53].mxu0  ;;  %v6299_v13 = vld [vmem:[#allocation2 + $0x6b0] sm:$0xff]  }
 0x6ae   :  { %v2420_v15 = vmax.f32 %v2408_v7, 0.0  ;;  %v5521_v18 = vadd.f32 %v5520_v14, %v5519_v16  ;;  %v5522_v21 = vpop.f32.mrb[54].mxu0  ;;  %v2423_v62 = vrot.slane %v2419_v11, 7  ;;  %v2435_v19 = vrot.slane %v2419_v11, 1  ;;  %v6301_v7 = vld [vmem:[#allocation2 + $0x678] sm:$0xff]  }
 0x6af   :  { %v5523_v20 = vpop.f32.mrb[55].mxu0  ;;  %v6302_v16 = vld [vmem:[#allocation2 + $0x6b8] sm:$0xff]  }
 0x6b0   :  { %v2424_v17 = vrot.slane %v2420_v15, 7  ;;  %v2436_v23 = vrot.slane %v2420_v15, 1  ;;  %v2364_v24 = vadd.f32 %v5521_v18, %v4973_v60  ;;  %v5524_v8 = vadd.f32 %v5523_v20, %v5522_v21  ;;  %v6303_v14 = vld [vmem:[#allocation2 + $0x638] sm:$0xff]   ;;  %v6305_v18 = vld [vmem:[#allocation2 + $0x740] sm:$0xff]  }
 0x6b1   :  { %v2448_v22 = vpack.c.bf16 %v2420_v15, %v2419_v11  ;;  %v6300_v11 = vld [vmem:[#allocation2 + $0x630] sm:$0xff]   ;;  %v6304_v15 = vld [vmem:[#allocation2 + $0x700] sm:$0xff]  }
 0x6b2   :  { %v2429_v25 = vsel %vm112_vm0, %v2423_v62, %v2424_v17  ;;  %v2413_v26 = vadd.f32 %v5939_v54, %v2364_v24  ;;  %v2367_v27 = vadd.f32 %v5524_v8, %v4973_v60  ;;  %v2441_v29 = vsel %vm125_vm1, %v2435_v19, %v2436_v23  ;;  %v6286_v54 = vld [vmem:[#allocation2 + $0x650] sm:$0xff]   ;;  %v5010_v20 = vld [vmem:[#allocation4 + $0x7] ss:$0 sm:$0xff] }
 0x6b3   :  { %2683 = vmatprep.mubr.bf16.mxu0 %v2448_v22  ;;  %v6288_v60 = vld [vmem:[#allocation2 + $0x610] sm:$0xff]  }
 0x6b4   :  { %v2421_v30 = vmax.f32 %v2413_v26, 0.0  ;;  %v2416_v28 = vadd.f32 %v5940_v4, %v2367_v27  ;;  %v6293_v4 = vld [vmem:[#allocation2 + $0x6a0] sm:$0xff]  }
 0x6b6   :  { %v2425_v32 = vrot.slane %v2421_v30, 7  ;;  %v2437_v33 = vrot.slane %v2421_v30, 1  ;;  %v2422_v34 = vmax.f32 %v2416_v28, 0.0 }
 0x6b8   :  { %v2426_v31 = vrot.slane %v2422_v34, 7  ;;  %v2438_v35 = vrot.slane %v2422_v34, 1  ;;  %v2440_v36 = vsel %vm125_vm1, %v2436_v23, %v2437_v33  ;;  %v2451_v38 = vpack.c.bf16 %v2422_v34, %v2421_v30 }
 0x6b9   :  { %v5042_v39 = vpack.c.bf16 %v2440_v36, %v2441_v29  ;;  %v2428_v40 = vsel %vm112_vm0, %v2424_v17, %v2425_v32 }
 0x6ba   :  { %v2430_v41 = vsel %vm112_vm0, %v2426_v31, %v2423_v62  ;;  %v2439_v37 = vsel %vm125_vm1, %v2437_v33, %v2438_v35  ;;  %v2442_v42 = vsel %vm125_vm1, %v2438_v35, %v2435_v19  ;;  %v2427_v43 = vsel %vm112_vm0, %v2425_v32, %v2426_v31 }
 0x6bb   :  { %v5036_v47 = vpack.c.bf16 %v2429_v25, %v2430_v41  ;;  %5957 = vmatprep.mubr.msk.bf16.mxu1 %vm6579_vm7, %v5042_v39  ;;  %v5045_v48 = vpack.c.bf16 %v2442_v42, %v2439_v37  ;;  %v5039_v49 = vpack.c.bf16 %v2427_v43, %v2428_v40 }
 0x6bd   :  { %5037 = vmatmul.mubr.msk.bf16.vlgmr.msra.gmra.mrb[56].mxu0 %vm6566_vm6, %v5036_v47  ;;  %5958 = vmatmul.mubr.msk.bf16.vlgmr.msra.gmra.mrb[28].mxu1 %vm6588_vm9, %v5045_v48 }
 0x6be   :  { %2691 = vmatprep.mubr.bf16.mxu0 %v2451_v38  ;;  %5574 = vmatpush3.bf16.msra.mxu0 %v6282_v46 }
 0x6bf   :  { %5962 = vmatpush3.bf16.msra.mxu1 %v6869_v51  ;;  %5575 = vmatprep.subr.bf16.mxu0 %v6283_v44  ;;  %v6292_v51 = vld [vmem:[#allocation2 + $0x660] sm:$0xff]  }
 0x6c0   :  { %5963 = vmatprep.subr.bf16.mxu1 %v6284_v50 }
 0x6c2   :  { %5576 = vmatpush3.bf16.msra.mxu0 %v6285_v53 }
 0x6c3   :  { %5964 = vmatpush3.bf16.msra.mxu1 %v6284_v50  ;;  %5577 = vmatprep.subr.bf16.mxu0 %v6286_v54 }
 0x6c4   :  { %5965 = vmatprep.subr.bf16.mxu1 %v6287_v59 }
 0x6c5   :  { %5040 = vmatmul.mubr.msk.bf16.gmra.mrb[60].mxu0 %vm6597_vm10, %v5039_v49 }
 0x6c6   :  { %5578 = vmatpush3.bf16.msra.mxu0 %v6288_v60 }
 0x6c7   :  { %5966 = vmatpush3.bf16.msra.mxu1 %v6287_v59  ;;  %5579 = vmatprep.subr.bf16.mxu0 %v6289_v0 }
 0x6c8   :  { %5967 = vmatprep.subr.bf16.mxu1 %v6290_v1 }
 0x6ca   :  { %5580 = vmatpush3.bf16.msra.mxu0 %v6291_v61 }
 0x6cb   :  { %5968 = vmatpush3.bf16.msra.mxu1 %v6290_v1  ;;  %5581 = vmatprep.subr.bf16.mxu0 %v6292_v51 }
 0x6cc   :  { %5969 = vmatprep.subr.bf16.mxu1 %v6293_v4 }
 0x6ce   :  { %5582 = vmatpush3.bf16.msra.mxu0 %v6294_v5 }
 0x6cf   :  { %5970 = vmatpush3.bf16.msra.mxu1 %v6293_v4  ;;  %5583 = vmatprep.subr.bf16.mxu0 %v6295_v6  ;;  %v6306_v6 = vld [vmem:[#allocation2 + $0x6c0] sm:$0xff]  }
 0x6d0   :  { %5971 = vmatprep.subr.bf16.mxu1 %v6296_v9 }
 0x6d2   :  { %5584 = vmatpush3.bf16.msra.mxu0 %v6297_v2 }
 0x6d3   :  { %5972 = vmatpush3.bf16.msra.mxu1 %v6296_v9  ;;  %5585 = vmatprep.subr.bf16.mxu0 %v6298_v3  ;;  %v6307_v3 = vld [vmem:[#allocation2 + $0x708] sm:$0xff]  }
 0x6d4   :  { %5973 = vmatprep.subr.bf16.mxu1 %v6299_v13 }
 0x6d6   :  { %5586 = vmatpush3.bf16.msra.mxu0 %v6300_v11  ;;  %v6308_v11 = vld [vmem:[#allocation2 + $0x748] sm:$0xff]  }
 0x6d7   :  { %5974 = vmatpush3.bf16.msra.mxu1 %v6299_v13  ;;  %5587 = vmatprep.subr.bf16.mxu0 %v6301_v7 }
 0x6d8   :  { %5975 = vmatprep.subr.bf16.mxu1 %v6302_v16 }
 0x6da   :  { %5588 = vmatpush3.bf16.msra.mxu0 %v6303_v14 }
 0x6db   :  { %5976 = vmatpush3.bf16.msra.mxu1 %v6302_v16  ;;  %5611 = vmatprep.subr.bf16.mxu0 %v6304_v15  ;;  %v6309_v16 = vld [vmem:[#allocation2 + $0x6c8] sm:$0xff]  }
 0x6dc   :  { %5981 = vmatprep.subr.bf16.mxu1 %v6305_v18 }
 0x790   :  { %v5551_v21 = vpop.f32.mrb[56].mxu0  ;;  %v5959_v62 = vpop.f32.mrb[28].mxu1 }
 0x791   :  { %v5552_v19 = vpop.f32.mrb[57].mxu0  ;;  %v2734_v17 = vpop.f32.mrb[29].mxu1 }
 0x792   :  { %v5553_v23 = vadd.f32 %v5552_v19, %v5551_v21  ;;  %v5554_v24 = vpop.f32.mrb[58].mxu0  ;;  %v5960_v8 = vpop.f32.mrb[30].mxu1  ;;  %v6311_v19 = vld [vmem:[#allocation2 + $0x750] sm:$0xff]  }
 0x793   :  { %v5555_v22 = vpop.f32.mrb[59].mxu0  ;;  %v2737_v25 = vpop.f32.mrb[31].mxu1 }
 0x794   :  { %v2686_v26 = vadd.f32 %v5553_v23, %v5010_v20  ;;  %v5556_v27 = vadd.f32 %v5555_v22, %v5554_v24  ;;  %v6315_v23 = vld [vmem:[#allocation2 + $0x6d8] sm:$0xff]   ;;  %v6316_v24 = vld [vmem:[#allocation2 + $0x720] sm:$0xff]  }
 0x795   :  { %v6318_v22 = vld [vmem:[#allocation2 + $0x6e0] sm:$0xff]  }
 0x796   :  { %v2735_v29 = vadd.f32 %v2734_v17, %v2686_v26  ;;  %v2689_v30 = vadd.f32 %v5556_v27, %v5010_v20  ;;  %v6314_v17 = vld [vmem:[#allocation2 + $0x758] sm:$0xff]   ;;  %v6320_v26 = vld [vmem:[#allocation2 + $0x768] sm:$0xff]  }
 0x797   :  { %v6321_v27 = vld [vmem:[#allocation2 + $0x6e8] sm:$0xff]  }
 0x798   :  { %v2738_v28 = vadd.f32 %v2737_v25, %v2689_v30  ;;  %v5557_v32 = vpop.f32.mrb[60].mxu0  ;;  %v6901_v36 = vadd.f32 %v2735_v29, %v6819_v55  ;;  %v6319_v25 = vld [vmem:[#allocation2 + $0x728] sm:$0xff]   ;;  %v6322_v29 = vld [vmem:[#allocation2 + $0x730] sm:$0xff]  }
 0x799   :  { %v5558_v33 = vpop.f32.mrb[61].mxu0  ;;  %v6323_v30 = vld [vmem:[#allocation2 + $0x770] sm:$0xff]  }
 0x79a   :  { %v6898_v34 = vadd.f32 %v2738_v28, %v6822_v57  ;;  %v5559_v31 = vadd.f32 %v5558_v33, %v5557_v32  ;;  %v5560_v35 = vpop.f32.mrb[62].mxu0  ;;  %v2765_v48 = vrot.slane %v6901_v36, 1  ;;  %v2753_v53 = vrot.slane %v6901_v36, 7  ;;  %v6324_v28 = vld [vmem:[#allocation2 + $0x6f0] sm:$0xff]   ;;  %v6325_v32 = vld [vmem:[#allocation2 + $0x738] sm:$0xff]  }
 0x79b   :  { %v5561_v38 = vpop.f32.mrb[63].mxu0  ;;  %v6326_v33 = vld [vmem:[#allocation2 + $0x778] sm:$0xff]  }
 0x79c   :  { %v2694_v39 = vadd.f32 %v5559_v31, %v5010_v20  ;;  %v5562_v40 = vadd.f32 %v5561_v38, %v5560_v35  ;;  %v2778_v41 = vpack.c.bf16 %v6898_v34, %v6901_v36  ;;  %v2766_v43 = vrot.slane %v6898_v34, 1  ;;  %v6327_v31 = vld [vmem:[#allocation2 + $0x6f8] sm:$0xff]   ;;  %v6328_v35 = vld [vmem:[#allocation2 + $0x7c0] sm:$0xff]  }
 0x79d   :  { %v2754_v49 = vrot.slane %v6898_v34, 7  ;;  %v6945_v38 = vld [vmem:[#allocation2 + $0x800] sm:$0xff]  }
 0x79e   :  { %v2743_v37 = vadd.f32 %v5959_v62, %v2694_v39  ;;  %v2697_v42 = vadd.f32 %v5562_v40, %v5010_v20  ;;  %3013 = vmatprep.mubr.bf16.mxu0 %v2778_v41  ;;  %v2771_v0 = vsel %vm125_vm1, %v2765_v48, %v2766_v43  ;;  %v6310_v62 = vld [vmem:[#allocation2 + $0x710] sm:$0xff]  }
 0x79f   :  { %v2759_v61 = vsel %vm112_vm0, %v2753_v53, %v2754_v49  ;;  %v6312_v20 = vld [vmem:[#allocation2 + $0x6d0] sm:$0xff]  }
 0x7a0   :  { %v6907_v46 = vadd.f32 %v2743_v37, %v6828_v58  ;;  %v2746_v47 = vadd.f32 %v5960_v8, %v2697_v42  ;;  %v6317_v8 = vld [vmem:[#allocation2 + $0x760] sm:$0xff]   ;;  %v5047_v37 = vld [vmem:[#allocation4 + $0x8] ss:$0 sm:$0xff] }
 0x7a2   :  { %v6912_v44 = vadd.f32 %v2746_v47, %v6834_v10  ;;  %v2767_v50 = vrot.slane %v6907_v46, 1  ;;  %v2755_v7 = vrot.slane %v6907_v46, 7 }
 0x7a4   :  { %v2756_v54 = vrot.slane %v6912_v44, 7  ;;  %v2768_v59 = vrot.slane %v6912_v44, 1  ;;  %v2770_v60 = vsel %vm125_vm1, %v2766_v43, %v2767_v50  ;;  %v2781_v13 = vpack.c.bf16 %v6912_v44, %v6907_v46 }
 0x7a5   :  { %v5079_v1 = vpack.c.bf16 %v2770_v60, %v2771_v0  ;;  %v2758_v15 = vsel %vm112_vm0, %v2754_v49, %v2755_v7 }
 0x7a6   :  { %v2760_v51 = vsel %vm112_vm0, %v2756_v54, %v2753_v53  ;;  %v2769_v4 = vsel %vm125_vm1, %v2767_v50, %v2768_v59  ;;  %v2772_v5 = vsel %vm125_vm1, %v2768_v59, %v2765_v48  ;;  %v2757_v14 = vsel %vm112_vm0, %v2755_v7, %v2756_v54 }
 0x7a7   :  { %5977 = vmatprep.mubr.msk.bf16.mxu1 %vm6579_vm7, %v5079_v1  ;;  %v5073_v9 = vpack.c.bf16 %v2759_v61, %v2760_v51  ;;  %v5082_v2 = vpack.c.bf16 %v2772_v5, %v2769_v4  ;;  %v5076_v21 = vpack.c.bf16 %v2757_v14, %v2758_v15 }
 0x7a9   :  { %5074 = vmatmul.mubr.msk.bf16.vlgmr.msra.gmra.mrb[64].mxu0 %vm6566_vm6, %v5073_v9  ;;  %5978 = vmatmul.mubr.msk.bf16.vlgmr.msra.gmra.mrb[32].mxu1 %vm6588_vm9, %v5082_v2 }
 0x7aa   :  { %3021 = vmatprep.mubr.bf16.mxu0 %v2781_v13  ;;  %5612 = vmatpush3.bf16.msra.mxu0 %v6306_v6 }
 0x7ab   :  { %5982 = vmatpush3.bf16.msra.mxu1 %v6305_v18  ;;  %5613 = vmatprep.subr.bf16.mxu0 %v6307_v3  ;;  %v6313_v18 = vld [vmem:[#allocation2 + $0x718] sm:$0xff]  }
 0x7ac   :  { %5983 = vmatprep.subr.bf16.mxu1 %v6308_v11 }
 0x7ae   :  { %5614 = vmatpush3.bf16.msra.mxu0 %v6309_v16 }
 0x7af   :  { %5984 = vmatpush3.bf16.msra.mxu1 %v6308_v11  ;;  %5615 = vmatprep.subr.bf16.mxu0 %v6310_v62 }
 0x7b0   :  { %5985 = vmatprep.subr.bf16.mxu1 %v6311_v19 }
 0x7b1   :  { %5077 = vmatmul.mubr.msk.bf16.gmra.mrb[68].mxu0 %vm6597_vm10, %v5076_v21 }
 0x7b2   :  { %5616 = vmatpush3.bf16.msra.mxu0 %v6312_v20 }
 0x7b3   :  { %5986 = vmatpush3.bf16.msra.mxu1 %v6311_v19  ;;  %5617 = vmatprep.subr.bf16.mxu0 %v6313_v18 }
 0x7b4   :  { %5987 = vmatprep.subr.bf16.mxu1 %v6314_v17 }
 0x7b6   :  { %5618 = vmatpush3.bf16.msra.mxu0 %v6315_v23 }
 0x7b7   :  { %5988 = vmatpush3.bf16.msra.mxu1 %v6314_v17  ;;  %5619 = vmatprep.subr.bf16.mxu0 %v6316_v24 }
 0x7b8   :  { %5989 = vmatprep.subr.bf16.mxu1 %v6317_v8 }
 0x7ba   :  { %5620 = vmatpush3.bf16.msra.mxu0 %v6318_v22 }
 0x7bb   :  { %5990 = vmatpush3.bf16.msra.mxu1 %v6317_v8  ;;  %5621 = vmatprep.subr.bf16.mxu0 %v6319_v25 }
 0x7bc   :  { %5991 = vmatprep.subr.bf16.mxu1 %v6320_v26 }
 0x7be   :  { %5622 = vmatpush3.bf16.msra.mxu0 %v6321_v27 }
 0x7bf   :  { %5992 = vmatpush3.bf16.msra.mxu1 %v6320_v26  ;;  %5623 = vmatprep.subr.bf16.mxu0 %v6322_v29 }
 0x7c0   :  { %5993 = vmatprep.subr.bf16.mxu1 %v6323_v30 }
 0x7c2   :  { %5624 = vmatpush3.bf16.msra.mxu0 %v6324_v28 }
 0x7c3   :  { %5994 = vmatpush3.bf16.msra.mxu1 %v6323_v30  ;;  %5625 = vmatprep.subr.bf16.mxu0 %v6325_v32 }
 0x7c4   :  { %5995 = vmatprep.subr.bf16.mxu1 %v6326_v33 }
 0x7c6   :  { %5626 = vmatpush3.bf16.msra.mxu0 %v6327_v31  ;;  %v6330_v31 = vld [vmem:[#allocation2 + $0x780] sm:$0xff]  }
 0x7c7   :  { %5996 = vmatpush3.bf16.msra.mxu1 %v6326_v33  ;;  %5649 = vmatprep.subr.bf16.mxu0 %v6328_v35 }
 0x7c8   :  { %6001 = vmatprep.subr.bf16.mxu1 %v6945_v38 }
 0x87c   :  { %v5589_v39 = vpop.f32.mrb[64].mxu0  ;;  %v5979_v40 = vpop.f32.mrb[32].mxu1 }
 0x87d   :  { %v5590_v41 = vpop.f32.mrb[65].mxu0  ;;  %v3064_v42 = vpop.f32.mrb[33].mxu1 }
 0x87e   :  { %v5591_v43 = vadd.f32 %v5590_v41, %v5589_v39  ;;  %v5592_v47 = vpop.f32.mrb[66].mxu0  ;;  %v5980_v48 = vpop.f32.mrb[34].mxu1  ;;  %v6331_v41 = vld [vmem:[#allocation2 + $0x7c8] sm:$0xff]  }
 0x87f   :  { %v5593_v49 = vpop.f32.mrb[67].mxu0  ;;  %v3067_v50 = vpop.f32.mrb[35].mxu1 }
 0x880   :  { %v3016_v53 = vadd.f32 %v5591_v43, %v5047_v37  ;;  %v5594_v54 = vadd.f32 %v5593_v49, %v5592_v47  ;;  %v6334_v43 = vld [vmem:[#allocation2 + $0x7d0] sm:$0xff]   ;;  %v6337_v49 = vld [vmem:[#allocation2 + $0x7d8] sm:$0xff]  }
 0x881   :  { %v6335_v47 = vld [vmem:[#allocation2 + $0x810] sm:$0xff]  }
 0x882   :  { %v3065_v59 = vadd.f32 %v3064_v42, %v3016_v53  ;;  %v3019_v60 = vadd.f32 %v5594_v54, %v5047_v37  ;;  %v6333_v42 = vld [vmem:[#allocation2 + $0x788] sm:$0xff]   ;;  %v6339_v53 = vld [vmem:[#allocation2 + $0x798] sm:$0xff]   ;;  %v6341_v54 = vld [vmem:[#allocation2 + $0x820] sm:$0xff]  }
 0x884   :  { %v3079_v0 = vmax.f32 %v3065_v59, 0.0  ;;  %v3068_v1 = vadd.f32 %v3067_v50, %v3019_v60  ;;  %v5595_v61 = vpop.f32.mrb[68].mxu0  ;;  %v6338_v50 = vld [vmem:[#allocation2 + $0x818] sm:$0xff]   ;;  %v6342_v59 = vld [vmem:[#allocation2 + $0x7a0] sm:$0xff]   ;;  %v6343_v60 = vld [vmem:[#allocation2 + $0x7e8] sm:$0xff]  }
 0x885   :  { %v5596_v51 = vpop.f32.mrb[69].mxu0 }
 0x886   :  { %v3080_v4 = vmax.f32 %v3068_v1, 0.0  ;;  %v5597_v5 = vadd.f32 %v5596_v51, %v5595_v61  ;;  %v5598_v6 = vpop.f32.mrb[70].mxu0  ;;  %v3083_v9 = vrot.slane %v3079_v0, 7  ;;  %v3095_v2 = vrot.slane %v3079_v0, 1  ;;  %v6345_v1 = vld [vmem:[#allocation2 + $0x7a8] sm:$0xff]   ;;  %v6346_v61 = vld [vmem:[#allocation2 + $0x7f0] sm:$0xff]  }
 0x887   :  { %v5599_v3 = vpop.f32.mrb[71].mxu0  ;;  %v6347_v51 = vld [vmem:[#allocation2 + $0x830] sm:$0xff]  }
 0x888   :  { %v3084_v13 = vrot.slane %v3080_v4, 7  ;;  %v3096_v11 = vrot.slane %v3080_v4, 1  ;;  %v3024_v7 = vadd.f32 %v5597_v5, %v5047_v37  ;;  %v5600_v16 = vadd.f32 %v5599_v3, %v5598_v6  ;;  %v6349_v5 = vld [vmem:[#allocation2 + $0x7f8] sm:$0xff]   ;;  %v6353_v3 = vld [vmem:[#allocation2 + $0x8c0] sm:$0xff]  }
 0x889   :  { %v3108_v14 = vpack.c.bf16 %v3080_v4, %v3079_v0  ;;  %v6344_v0 = vld [vmem:[#allocation2 + $0x828] sm:$0xff]   ;;  %v6348_v4 = vld [vmem:[#allocation2 + $0x7b0] sm:$0xff]   ;;  %v6350_v6 = vld [vmem:[#allocation2 + $0x838] sm:$0xff]  }
 0x88a   :  { %v3089_v15 = vsel %vm112_vm0, %v3083_v9, %v3084_v13  ;;  %v3073_v21 = vadd.f32 %v5979_v40, %v3024_v7  ;;  %v3027_v62 = vadd.f32 %v5600_v16, %v5047_v37  ;;  %v3101_v19 = vsel %vm125_vm1, %v3095_v2, %v3096_v11  ;;  %v6332_v37 = vld [vmem:[#allocation2 + $0x808] sm:$0xff]  }
 0x88b   :  { %3343 = vmatprep.mubr.bf16.mxu0 %v3108_v14  ;;  %v5084_v16 = vld [vmem:[#allocation4 + $0x9] ss:$0 sm:$0xff] }
 0x88c   :  { %v3081_v20 = vmax.f32 %v3073_v21, 0.0  ;;  %v3076_v18 = vadd.f32 %v5980_v48, %v3027_v62  ;;  %v6336_v48 = vld [vmem:[#allocation2 + $0x790] sm:$0xff]  }
 0x88e   :  { %v3085_v17 = vrot.slane %v3081_v20, 7  ;;  %v3097_v23 = vrot.slane %v3081_v20, 1  ;;  %v3082_v24 = vmax.f32 %v3076_v18, 0.0 }
 0x890   :  { %v3086_v8 = vrot.slane %v3082_v24, 7  ;;  %v3098_v22 = vrot.slane %v3082_v24, 1  ;;  %v3100_v25 = vsel %vm125_vm1, %v3096_v11, %v3097_v23  ;;  %v3111_v26 = vpack.c.bf16 %v3082_v24, %v3081_v20 }
 0x891   :  { %v5116_v27 = vpack.c.bf16 %v3100_v25, %v3101_v19  ;;  %v3088_v29 = vsel %vm112_vm0, %v3084_v13, %v3085_v17 }
 0x892   :  { %v3090_v30 = vsel %vm112_vm0, %v3086_v8, %v3083_v9  ;;  %v3099_v28 = vsel %vm125_vm1, %v3097_v23, %v3098_v22  ;;  %v3102_v32 = vsel %vm125_vm1, %v3098_v22, %v3095_v2  ;;  %v3087_v33 = vsel %vm112_vm0, %v3085_v17, %v3086_v8  ;;  %v6351_v9 = vld [vmem:[#allocation2 + $0x7b8] sm:$0xff]   ;;  %v6352_v2 = vld [vmem:[#allocation2 + $0x880] sm:$0xff]  }
 0x893   :  { %v5110_v35 = vpack.c.bf16 %v3089_v15, %v3090_v30  ;;  %5997 = vmatprep.mubr.msk.bf16.mxu1 %vm6579_vm7, %v5116_v27  ;;  %v5119_v39 = vpack.c.bf16 %v3102_v32, %v3099_v28  ;;  %v5113_v40 = vpack.c.bf16 %v3087_v33, %v3088_v29 }
 0x895   :  { %5111 = vmatmul.mubr.msk.bf16.vlgmr.msra.gmra.mrb[72].mxu0 %vm6566_vm6, %v5110_v35  ;;  %5998 = vmatmul.mubr.msk.bf16.vlgmr.msra.gmra.mrb[36].mxu1 %vm6588_vm9, %v5119_v39 }
 0x896   :  { %3351 = vmatprep.mubr.bf16.mxu0 %v3111_v26  ;;  %5650 = vmatpush3.bf16.msra.mxu0 %v6330_v31 }
 0x897   :  { %6002 = vmatpush3.bf16.msra.mxu1 %v6945_v38  ;;  %5651 = vmatprep.subr.bf16.mxu0 %v6331_v41  ;;  %v6340_v38 = vld [vmem:[#allocation2 + $0x7e0] sm:$0xff]  }
 0x898   :  { %6003 = vmatprep.subr.bf16.mxu1 %v6332_v37 }
 0x89a   :  { %5652 = vmatpush3.bf16.msra.mxu0 %v6333_v42 }
 0x89b   :  { %6004 = vmatpush3.bf16.msra.mxu1 %v6332_v37  ;;  %5653 = vmatprep.subr.bf16.mxu0 %v6334_v43 }
 0x89c   :  { %6005 = vmatprep.subr.bf16.mxu1 %v6335_v47 }
 0x89d   :  { %5114 = vmatmul.mubr.msk.bf16.gmra.mrb[76].mxu0 %vm6597_vm10, %v5113_v40 }
 0x89e   :  { %5654 = vmatpush3.bf16.msra.mxu0 %v6336_v48 }
 0x89f   :  { %6006 = vmatpush3.bf16.msra.mxu1 %v6335_v47  ;;  %5655 = vmatprep.subr.bf16.mxu0 %v6337_v49 }
 0x8a0   :  { %6007 = vmatprep.subr.bf16.mxu1 %v6338_v50 }
 0x8a2   :  { %5656 = vmatpush3.bf16.msra.mxu0 %v6339_v53 }
 0x8a3   :  { %6008 = vmatpush3.bf16.msra.mxu1 %v6338_v50  ;;  %5657 = vmatprep.subr.bf16.mxu0 %v6340_v38 }
 0x8a4   :  { %6009 = vmatprep.subr.bf16.mxu1 %v6341_v54 }
 0x8a6   :  { %5658 = vmatpush3.bf16.msra.mxu0 %v6342_v59 }
 0x8a7   :  { %6010 = vmatpush3.bf16.msra.mxu1 %v6341_v54  ;;  %5659 = vmatprep.subr.bf16.mxu0 %v6343_v60  ;;  %v6354_v60 = vld [vmem:[#allocation2 + $0x840] sm:$0xff]  }
 0x8a8   :  { %6011 = vmatprep.subr.bf16.mxu1 %v6344_v0 }
 0x8aa   :  { %5660 = vmatpush3.bf16.msra.mxu0 %v6345_v1 }
 0x8ab   :  { %6012 = vmatpush3.bf16.msra.mxu1 %v6344_v0  ;;  %5661 = vmatprep.subr.bf16.mxu0 %v6346_v61  ;;  %v6355_v61 = vld [vmem:[#allocation2 + $0x888] sm:$0xff]  }
 0x8ac   :  { %6013 = vmatprep.subr.bf16.mxu1 %v6347_v51 }
 0x8ae   :  { %5662 = vmatpush3.bf16.msra.mxu0 %v6348_v4  ;;  %v6356_v4 = vld [vmem:[#allocation2 + $0x8c8] sm:$0xff]  }
 0x8af   :  { %6014 = vmatpush3.bf16.msra.mxu1 %v6347_v51  ;;  %5663 = vmatprep.subr.bf16.mxu0 %v6349_v5 }
 0x8b0   :  { %6015 = vmatprep.subr.bf16.mxu1 %v6350_v6 }
 0x8b2   :  { %5664 = vmatpush3.bf16.msra.mxu0 %v6351_v9 }
 0x8b3   :  { %6016 = vmatpush3.bf16.msra.mxu1 %v6350_v6  ;;  %5687 = vmatprep.subr.bf16.mxu0 %v6352_v2  ;;  %v6357_v6 = vld [vmem:[#allocation2 + $0x848] sm:$0xff]  }
 0x8b4   :  { %6021 = vmatprep.subr.bf16.mxu1 %v6353_v3 }
 0x968   :  { %v5627_v13 = vpop.f32.mrb[72].mxu0  ;;  %v5999_v11 = vpop.f32.mrb[36].mxu1 }
 0x969   :  { %v5628_v7 = vpop.f32.mrb[73].mxu0  ;;  %v3394_v14 = vpop.f32.mrb[37].mxu1 }
 0x96a   :  { %v5629_v15 = vadd.f32 %v5628_v7, %v5627_v13  ;;  %v5630_v21 = vpop.f32.mrb[74].mxu0  ;;  %v6000_v62 = vpop.f32.mrb[38].mxu1  ;;  %v6359_v7 = vld [vmem:[#allocation2 + $0x8d0] sm:$0xff]  }
 0x96b   :  { %v5631_v19 = vpop.f32.mrb[75].mxu0  ;;  %v3397_v20 = vpop.f32.mrb[39].mxu1 }
 0x96c   :  { %v3346_v18 = vadd.f32 %v5629_v15, %v5084_v16  ;;  %v5632_v17 = vadd.f32 %v5631_v19, %v5630_v21  ;;  %v6363_v15 = vld [vmem:[#allocation2 + $0x858] sm:$0xff]   ;;  %v6364_v21 = vld [vmem:[#allocation2 + $0x8a0] sm:$0xff]  }
 0x96d   :  { %v6366_v19 = vld [vmem:[#allocation2 + $0x860] sm:$0xff]  }
 0x96e   :  { %v3395_v23 = vadd.f32 %v3394_v14, %v3346_v18  ;;  %v3349_v24 = vadd.f32 %v5632_v17, %v5084_v16  ;;  %v6362_v14 = vld [vmem:[#allocation2 + $0x8d8] sm:$0xff]   ;;  %v6368_v18 = vld [vmem:[#allocation2 + $0x8e8] sm:$0xff]  }
 0x96f   :  { %v6369_v17 = vld [vmem:[#allocation2 + $0x868] sm:$0xff]  }
 0x970   :  { %v3398_v8 = vadd.f32 %v3397_v20, %v3349_v24  ;;  %v5633_v22 = vpop.f32.mrb[76].mxu0  ;;  %v6977_v30 = vadd.f32 %v3395_v23, %v6901_v36  ;;  %v6367_v20 = vld [vmem:[#allocation2 + $0x8a8] sm:$0xff]   ;;  %v6370_v23 = vld [vmem:[#allocation2 + $0x8b0] sm:$0xff]  }
 0x971   :  { %v5634_v25 = vpop.f32.mrb[77].mxu0  ;;  %v6371_v24 = vld [vmem:[#allocation2 + $0x8f0] sm:$0xff]  }
 0x972   :  { %v6974_v26 = vadd.f32 %v3398_v8, %v6898_v34  ;;  %v5635_v27 = vadd.f32 %v5634_v25, %v5633_v22  ;;  %v5636_v29 = vpop.f32.mrb[78].mxu0  ;;  %v3425_v37 = vrot.slane %v6977_v30, 1  ;;  %v3413_v47 = vrot.slane %v6977_v30, 7  ;;  %v6372_v8 = vld [vmem:[#allocation2 + $0x870] sm:$0xff]   ;;  %v6373_v22 = vld [vmem:[#allocation2 + $0x8b8] sm:$0xff]  }
 0x973   :  { %v5637_v28 = vpop.f32.mrb[79].mxu0  ;;  %v6374_v25 = vld [vmem:[#allocation2 + $0x8f8] sm:$0xff]  }
 0x974   :  { %v3354_v32 = vadd.f32 %v5635_v27, %v5084_v16  ;;  %v5638_v33 = vadd.f32 %v5637_v28, %v5636_v29  ;;  %v3438_v31 = vpack.c.bf16 %v6974_v26, %v6977_v30  ;;  %v3426_v40 = vrot.slane %v6974_v26, 1  ;;  %v6375_v27 = vld [vmem:[#allocation2 + $0x878] sm:$0xff]   ;;  %v6376_v29 = vld [vmem:[#allocation2 + $0x940] sm:$0xff]  }
 0x975   :  { %v3414_v36 = vrot.slane %v6974_v26, 7  ;;  %v6377_v28 = vld [vmem:[#allocation2 + $0x980] sm:$0xff]  }
 0x976   :  { %v3403_v35 = vadd.f32 %v5999_v11, %v3354_v32  ;;  %v3357_v39 = vadd.f32 %v5638_v33, %v5084_v16  ;;  %3673 = vmatprep.mubr.bf16.mxu0 %v3438_v31  ;;  %v3431_v50 = vsel %vm125_vm1, %v3425_v37, %v3426_v40  ;;  %v6358_v11 = vld [vmem:[#allocation2 + $0x890] sm:$0xff]  }
 0x977   :  { %v3419_v38 = vsel %vm112_vm0, %v3413_v47, %v3414_v36  ;;  %v6360_v16 = vld [vmem:[#allocation2 + $0x850] sm:$0xff]  }
 0x978   :  { %v6983_v41 = vadd.f32 %v3403_v35, %v6907_v46  ;;  %v3406_v34 = vadd.f32 %v6000_v62, %v3357_v39  ;;  %v6365_v62 = vld [vmem:[#allocation2 + $0x8e0] sm:$0xff]   ;;  %v5121_v35 = vld [vmem:[#allocation4 + $0xa] ss:$0 sm:$0xff] }
 0x97a   :  { %v6988_v42 = vadd.f32 %v3406_v34, %v6912_v44  ;;  %v3427_v43 = vrot.slane %v6983_v41, 1  ;;  %v3415_v5 = vrot.slane %v6983_v41, 7 }
 0x97c   :  { %v3416_v48 = vrot.slane %v6988_v42, 7  ;;  %v3428_v49 = vrot.slane %v6988_v42, 1  ;;  %v3430_v46 = vsel %vm125_vm1, %v3426_v40, %v3427_v43  ;;  %v3441_v51 = vpack.c.bf16 %v6988_v42, %v6983_v41 }
 0x97d   :  { %v5153_v53 = vpack.c.bf16 %v3430_v46, %v3431_v50  ;;  %v3418_v2 = vsel %vm112_vm0, %v3414_v36, %v3415_v5 }
 0x97e   :  { %v3420_v44 = vsel %vm112_vm0, %v3416_v48, %v3413_v47  ;;  %v3429_v54 = vsel %vm125_vm1, %v3427_v43, %v3428_v49  ;;  %v3432_v59 = vsel %vm125_vm1, %v3428_v49, %v3425_v37  ;;  %v3417_v9 = vsel %vm112_vm0, %v3415_v5, %v3416_v48 }
 0x97f   :  { %6017 = vmatprep.mubr.msk.bf16.mxu1 %vm6579_vm7, %v5153_v53  ;;  %v5147_v0 = vpack.c.bf16 %v3419_v38, %v3420_v44  ;;  %v5156_v1 = vpack.c.bf16 %v3432_v59, %v3429_v54  ;;  %v5150_v13 = vpack.c.bf16 %v3417_v9, %v3418_v2 }
 0x981   :  { %5148 = vmatmul.mubr.msk.bf16.vlgmr.msra.gmra.mrb[80].mxu0 %vm6566_vm6, %v5147_v0  ;;  %6018 = vmatmul.mubr.msk.bf16.vlgmr.msra.gmra.mrb[40].mxu1 %vm6588_vm9, %v5156_v1 }
 0x982   :  { %3681 = vmatprep.mubr.bf16.mxu0 %v3441_v51  ;;  %5688 = vmatpush3.bf16.msra.mxu0 %v6354_v60 }
 0x983   :  { %6022 = vmatpush3.bf16.msra.mxu1 %v6353_v3  ;;  %5689 = vmatprep.subr.bf16.mxu0 %v6355_v61  ;;  %v6361_v3 = vld [vmem:[#allocation2 + $0x898] sm:$0xff]  }
 0x984   :  { %6023 = vmatprep.subr.bf16.mxu1 %v6356_v4 }
 0x986   :  { %5690 = vmatpush3.bf16.msra.mxu0 %v6357_v6 }
 0x987   :  { %6024 = vmatpush3.bf16.msra.mxu1 %v6356_v4  ;;  %5691 = vmatprep.subr.bf16.mxu0 %v6358_v11 }
 0x988   :  { %6025 = vmatprep.subr.bf16.mxu1 %v6359_v7 }
 0x989   :  { %5151 = vmatmul.mubr.msk.bf16.gmra.mrb[84].mxu0 %vm6597_vm10, %v5150_v13 }
 0x98a   :  { %5692 = vmatpush3.bf16.msra.mxu0 %v6360_v16 }
 0x98b   :  { %6026 = vmatpush3.bf16.msra.mxu1 %v6359_v7  ;;  %5693 = vmatprep.subr.bf16.mxu0 %v6361_v3 }
 0x98c   :  { %6027 = vmatprep.subr.bf16.mxu1 %v6362_v14 }
 0x98e   :  { %5694 = vmatpush3.bf16.msra.mxu0 %v6363_v15 }
 0x98f   :  { %6028 = vmatpush3.bf16.msra.mxu1 %v6362_v14  ;;  %5695 = vmatprep.subr.bf16.mxu0 %v6364_v21 }
 0x990   :  { %6029 = vmatprep.subr.bf16.mxu1 %v6365_v62 }
 0x992   :  { %5696 = vmatpush3.bf16.msra.mxu0 %v6366_v19 }
 0x993   :  { %6030 = vmatpush3.bf16.msra.mxu1 %v6365_v62  ;;  %5697 = vmatprep.subr.bf16.mxu0 %v6367_v20 }
 0x994   :  { %6031 = vmatprep.subr.bf16.mxu1 %v6368_v18 }
 0x996   :  { %5698 = vmatpush3.bf16.msra.mxu0 %v6369_v17 }
 0x997   :  { %6032 = vmatpush3.bf16.msra.mxu1 %v6368_v18  ;;  %5699 = vmatprep.subr.bf16.mxu0 %v6370_v23 }
 0x998   :  { %6033 = vmatprep.subr.bf16.mxu1 %v6371_v24 }
 0x99a   :  { %5700 = vmatpush3.bf16.msra.mxu0 %v6372_v8 }
 0x99b   :  { %6034 = vmatpush3.bf16.msra.mxu1 %v6371_v24  ;;  %5701 = vmatprep.subr.bf16.mxu0 %v6373_v22 }
 0x99c   :  { %6035 = vmatprep.subr.bf16.mxu1 %v6374_v25 }
 0x99e   :  { %5702 = vmatpush3.bf16.msra.mxu0 %v6375_v27  ;;  %v6378_v27 = vld [vmem:[#allocation2 + $0x900] sm:$0xff]  }
 0x99f   :  { %6036 = vmatpush3.bf16.msra.mxu1 %v6374_v25  ;;  %5725 = vmatprep.subr.bf16.mxu0 %v6376_v29 }
 0x9a0   :  { %6041 = vmatprep.subr.bf16.mxu1 %v6377_v28 }
 0xa54   :  { %v5665_v32 = vpop.f32.mrb[80].mxu0  ;;  %v6019_v33 = vpop.f32.mrb[40].mxu1 }
 0xa55   :  { %v5666_v31 = vpop.f32.mrb[81].mxu0  ;;  %v3724_v39 = vpop.f32.mrb[41].mxu1 }
 0xa56   :  { %v5667_v40 = vadd.f32 %v5666_v31, %v5665_v32  ;;  %v5668_v34 = vpop.f32.mrb[82].mxu0  ;;  %v6020_v37 = vpop.f32.mrb[42].mxu1  ;;  %v6379_v31 = vld [vmem:[#allocation2 + $0x948] sm:$0xff]  }
 0xa57   :  { %v5669_v36 = vpop.f32.mrb[83].mxu0  ;;  %v3727_v43 = vpop.f32.mrb[43].mxu1 }
 0xa58   :  { %v3676_v47 = vadd.f32 %v5667_v40, %v5121_v35  ;;  %v5670_v48 = vadd.f32 %v5669_v36, %v5668_v34  ;;  %v6382_v40 = vld [vmem:[#allocation2 + $0x950] sm:$0xff]   ;;  %v6385_v36 = vld [vmem:[#allocation2 + $0x958] sm:$0xff]  }
 0xa59   :  { %v6383_v34 = vld [vmem:[#allocation2 + $0x990] sm:$0xff]  }
 0xa5a   :  { %v3725_v49 = vadd.f32 %v3724_v39, %v3676_v47  ;;  %v3679_v46 = vadd.f32 %v5670_v48, %v5121_v35  ;;  %v6381_v39 = vld [vmem:[#allocation2 + $0x908] sm:$0xff]   ;;  %v6387_v47 = vld [vmem:[#allocation2 + $0x918] sm:$0xff]   ;;  %v6389_v48 = vld [vmem:[#allocation2 + $0x9a0] sm:$0xff]  }
 0xa5c   :  { %v3739_v50 = vmax.f32 %v3725_v49, 0.0  ;;  %v3728_v53 = vadd.f32 %v3727_v43, %v3679_v46  ;;  %v5671_v38 = vpop.f32.mrb[84].mxu0  ;;  %v6386_v43 = vld [vmem:[#allocation2 + $0x998] sm:$0xff]   ;;  %v6390_v49 = vld [vmem:[#allocation2 + $0x920] sm:$0xff]   ;;  %v6391_v46 = vld [vmem:[#allocation2 + $0x968] sm:$0xff]  }
 0xa5d   :  { %v5672_v44 = vpop.f32.mrb[85].mxu0 }
 0xa5e   :  { %v3740_v54 = vmax.f32 %v3728_v53, 0.0  ;;  %v5673_v59 = vadd.f32 %v5672_v44, %v5671_v38  ;;  %v5674_v60 = vpop.f32.mrb[86].mxu0  ;;  %v3743_v0 = vrot.slane %v3739_v50, 7  ;;  %v3755_v1 = vrot.slane %v3739_v50, 1  ;;  %v6393_v53 = vld [vmem:[#allocation2 + $0x928] sm:$0xff]   ;;  %v6394_v38 = vld [vmem:[#allocation2 + $0x970] sm:$0xff]  }
 0xa5f   :  { %v5675_v61 = vpop.f32.mrb[87].mxu0  ;;  %v6395_v44 = vld [vmem:[#allocation2 + $0x9b0] sm:$0xff]  }
 0xa60   :  { %v3744_v51 = vrot.slane %v3740_v54, 7  ;;  %v3756_v4 = vrot.slane %v3740_v54, 1  ;;  %v3684_v5 = vadd.f32 %v5673_v59, %v5121_v35  ;;  %v5676_v6 = vadd.f32 %v5675_v61, %v5674_v60  ;;  %v6397_v59 = vld [vmem:[#allocation2 + $0x978] sm:$0xff]   ;;  %v7045_v61 = vld [vmem:[#allocation2 + $0xa40] sm:$0xff]  }
 0xa61   :  { %v3768_v9 = vpack.c.bf16 %v3740_v54, %v3739_v50  ;;  %v6392_v50 = vld [vmem:[#allocation2 + $0x9a8] sm:$0xff]   ;;  %v6396_v54 = vld [vmem:[#allocation2 + $0x930] sm:$0xff]   ;;  %v6398_v60 = vld [vmem:[#allocation2 + $0x9b8] sm:$0xff]  }
 0xa62   :  { %v3749_v2 = vsel %vm112_vm0, %v3743_v0, %v3744_v51  ;;  %v3733_v13 = vadd.f32 %v6019_v33, %v3684_v5  ;;  %v3687_v11 = vadd.f32 %v5676_v6, %v5121_v35  ;;  %v3761_v7 = vsel %vm125_vm1, %v3755_v1, %v3756_v4  ;;  %v6380_v35 = vld [vmem:[#allocation2 + $0x988] sm:$0xff]  }
 0xa63   :  { %4003 = vmatprep.mubr.bf16.mxu0 %v3768_v9  ;;  %v5158_v6 = vld [vmem:[#allocation4 + $0xb] ss:$0 sm:$0xff] }
 0xa64   :  { %v3741_v16 = vmax.f32 %v3733_v13, 0.0  ;;  %v3736_v3 = vadd.f32 %v6020_v37, %v3687_v11  ;;  %v6384_v37 = vld [vmem:[#allocation2 + $0x910] sm:$0xff]  }
 0xa66   :  { %v3745_v14 = vrot.slane %v3741_v16, 7  ;;  %v3757_v15 = vrot.slane %v3741_v16, 1  ;;  %v3742_v21 = vmax.f32 %v3736_v3, 0.0 }
 0xa68   :  { %v3746_v62 = vrot.slane %v3742_v21, 7  ;;  %v3758_v19 = vrot.slane %v3742_v21, 1  ;;  %v3760_v20 = vsel %vm125_vm1, %v3756_v4, %v3757_v15  ;;  %v3771_v18 = vpack.c.bf16 %v3742_v21, %v3741_v16 }
 0xa69   :  { %v5190_v17 = vpack.c.bf16 %v3760_v20, %v3761_v7  ;;  %v3748_v23 = vsel %vm112_vm0, %v3744_v51, %v3745_v14 }
 0xa6a   :  { %v3750_v24 = vsel %vm112_vm0, %v3746_v62, %v3743_v0  ;;  %v3759_v8 = vsel %vm125_vm1, %v3757_v15, %v3758_v19  ;;  %v3762_v22 = vsel %vm125_vm1, %v3758_v19, %v3755_v1  ;;  %v3747_v25 = vsel %vm112_vm0, %v3745_v14, %v3746_v62  ;;  %v6399_v0 = vld [vmem:[#allocation2 + $0x938] sm:$0xff]   ;;  %v6400_v1 = vld [vmem:[#allocation2 + $0xa00] sm:$0xff]  }
 0xa6b   :  { %v5184_v29 = vpack.c.bf16 %v3749_v2, %v3750_v24  ;;  %6037 = vmatprep.mubr.msk.bf16.mxu1 %vm6579_vm7, %v5190_v17  ;;  %v5193_v32 = vpack.c.bf16 %v3762_v22, %v3759_v8  ;;  %v5187_v33 = vpack.c.bf16 %v3747_v25, %v3748_v23 }
 0xa6d   :  { %5185 = vmatmul.mubr.msk.bf16.vlgmr.msra.gmra.mrb[88].mxu0 %vm6566_vm6, %v5184_v29  ;;  %6038 = vmatmul.mubr.msk.bf16.vlgmr.msra.gmra.mrb[44].mxu1 %vm6588_vm9, %v5193_v32 }
 0xa6e   :  { %4011 = vmatprep.mubr.bf16.mxu0 %v3771_v18  ;;  %5726 = vmatpush3.bf16.msra.mxu0 %v6378_v27 }
 0xa6f   :  { %6042 = vmatpush3.bf16.msra.mxu1 %v6377_v28  ;;  %5727 = vmatprep.subr.bf16.mxu0 %v6379_v31  ;;  %v6388_v28 = vld [vmem:[#allocation2 + $0x960] sm:$0xff]  }
 0xa70   :  { %6043 = vmatprep.subr.bf16.mxu1 %v6380_v35 }
 0xa72   :  { %5728 = vmatpush3.bf16.msra.mxu0 %v6381_v39 }
 0xa73   :  { %6044 = vmatpush3.bf16.msra.mxu1 %v6380_v35  ;;  %5729 = vmatprep.subr.bf16.mxu0 %v6382_v40 }
 0xa74   :  { %6045 = vmatprep.subr.bf16.mxu1 %v6383_v34 }
 0xa75   :  { %5188 = vmatmul.mubr.msk.bf16.gmra.mrb[92].mxu0 %vm6597_vm10, %v5187_v33 }
 0xa76   :  { %5730 = vmatpush3.bf16.msra.mxu0 %v6384_v37 }
 0xa77   :  { %6046 = vmatpush3.bf16.msra.mxu1 %v6383_v34  ;;  %5731 = vmatprep.subr.bf16.mxu0 %v6385_v36 }
 0xa78   :  { %6047 = vmatprep.subr.bf16.mxu1 %v6386_v43 }
 0xa7a   :  { %5732 = vmatpush3.bf16.msra.mxu0 %v6387_v47 }
 0xa7b   :  { %6048 = vmatpush3.bf16.msra.mxu1 %v6386_v43  ;;  %5733 = vmatprep.subr.bf16.mxu0 %v6388_v28 }
 0xa7c   :  { %6049 = vmatprep.subr.bf16.mxu1 %v6389_v48 }
 0xa7e   :  { %5734 = vmatpush3.bf16.msra.mxu0 %v6390_v49 }
 0xa7f   :  { %6050 = vmatpush3.bf16.msra.mxu1 %v6389_v48  ;;  %5735 = vmatprep.subr.bf16.mxu0 %v6391_v46  ;;  %v6402_v46 = vld [vmem:[#allocation2 + $0x9c0] sm:$0xff]  }
 0xa80   :  { %6051 = vmatprep.subr.bf16.mxu1 %v6392_v50 }
 0xa82   :  { %5736 = vmatpush3.bf16.msra.mxu0 %v6393_v53 }
 0xa83   :  { %6052 = vmatpush3.bf16.msra.mxu1 %v6392_v50  ;;  %5737 = vmatprep.subr.bf16.mxu0 %v6394_v38  ;;  %v6403_v38 = vld [vmem:[#allocation2 + $0xa08] sm:$0xff]  }
 0xa84   :  { %6053 = vmatprep.subr.bf16.mxu1 %v6395_v44 }
 0xa86   :  { %5738 = vmatpush3.bf16.msra.mxu0 %v6396_v54  ;;  %v6404_v54 = vld [vmem:[#allocation2 + $0xa48] sm:$0xff]  }
 0xa87   :  { %6054 = vmatpush3.bf16.msra.mxu1 %v6395_v44  ;;  %5739 = vmatprep.subr.bf16.mxu0 %v6397_v59 }
 0xa88   :  { %6055 = vmatprep.subr.bf16.mxu1 %v6398_v60 }
 0xa8a   :  { %5740 = vmatpush3.bf16.msra.mxu0 %v6399_v0 }
 0xa8b   :  { %6056 = vmatpush3.bf16.msra.mxu1 %v6398_v60  ;;  %5763 = vmatprep.subr.bf16.mxu0 %v6400_v1  ;;  %v6405_v60 = vld [vmem:[#allocation2 + $0x9c8] sm:$0xff]  }
 0xa8c   :  { %6061 = vmatprep.subr.bf16.mxu1 %v7045_v61 }
 0xb40   :  { %v5703_v51 = vpop.f32.mrb[88].mxu0  ;;  %v6039_v4 = vpop.f32.mrb[44].mxu1 }
 0xb41   :  { %v5704_v5 = vpop.f32.mrb[89].mxu0  ;;  %v4054_v9 = vpop.f32.mrb[45].mxu1 }
 0xb42   :  { %v5705_v2 = vadd.f32 %v5704_v5, %v5703_v51  ;;  %v5706_v13 = vpop.f32.mrb[90].mxu0  ;;  %v6040_v11 = vpop.f32.mrb[46].mxu1  ;;  %v6407_v5 = vld [vmem:[#allocation2 + $0xa50] sm:$0xff]  }
 0xb43   :  { %v5707_v7 = vpop.f32.mrb[91].mxu0  ;;  %v4057_v16 = vpop.f32.mrb[47].mxu1 }
 0xb44   :  { %v4006_v3 = vadd.f32 %v5705_v2, %v5158_v6  ;;  %v5708_v14 = vadd.f32 %v5707_v7, %v5706_v13  ;;  %v6411_v2 = vld [vmem:[#allocation2 + $0x9d8] sm:$0xff]   ;;  %v6412_v13 = vld [vmem:[#allocation2 + $0xa20] sm:$0xff]  }
 0xb45   :  { %v6414_v7 = vld [vmem:[#allocation2 + $0x9e0] sm:$0xff]  }
 0xb46   :  { %v4055_v15 = vadd.f32 %v4054_v9, %v4006_v3  ;;  %v4009_v21 = vadd.f32 %v5708_v14, %v5158_v6  ;;  %v6410_v9 = vld [vmem:[#allocation2 + $0xa58] sm:$0xff]   ;;  %v6416_v3 = vld [vmem:[#allocation2 + $0xa68] sm:$0xff]  }
 0xb47   :  { %v6417_v14 = vld [vmem:[#allocation2 + $0x9e8] sm:$0xff]  }
 0xb48   :  { %v4069_v62 = vadd.f32 %v4055_v15, %v6977_v30  ;;  %v4058_v19 = vadd.f32 %v4057_v16, %v4009_v21  ;;  %v5709_v20 = vpop.f32.mrb[92].mxu0  ;;  %v6415_v16 = vld [vmem:[#allocation2 + $0xa28] sm:$0xff]   ;;  %v6418_v15 = vld [vmem:[#allocation2 + $0xa30] sm:$0xff]  }
 0xb49   :  { %v5710_v18 = vpop.f32.mrb[93].mxu0  ;;  %v6419_v21 = vld [vmem:[#allocation2 + $0xa70] sm:$0xff]  }
 0xb4a   :  { %v4070_v17 = vadd.f32 %v4058_v19, %v6974_v26  ;;  %v5711_v23 = vadd.f32 %v5710_v18, %v5709_v20  ;;  %v5712_v24 = vpop.f32.mrb[94].mxu0  ;;  %v7051_v22 = vadd.f32 %v4069_v62, %v6819_v55  ;;  %v6420_v62 = vld [vmem:[#allocation2 + $0x9f0] sm:$0xff]   ;;  %v6421_v19 = vld [vmem:[#allocation2 + $0xa38] sm:$0xff]  }
 0xb4b   :  { %v5713_v8 = vpop.f32.mrb[95].mxu0  ;;  %v6422_v20 = vld [vmem:[#allocation2 + $0xa78] sm:$0xff]  }
 0xb4c   :  { %v7054_v25 = vadd.f32 %v4070_v17, %v6822_v57  ;;  %v4014_v27 = vadd.f32 %v5711_v23, %v5158_v6  ;;  %v5714_v29 = vadd.f32 %v5713_v8, %v5712_v24  ;;  %v4089_v57 = vrot.slane %v7051_v22, 1  ;;  %v6423_v18 = vld [vmem:[#allocation2 + $0x9f8] sm:$0xff]   ;;  %v5195_v8 = vld [vmem:[#allocation4 + $0xc] ss:$0 sm:$0xff] }
 0xb4e   :  { %v4063_v32 = vadd.f32 %v6039_v4, %v4014_v27  ;;  %v4102_v30 = vpack.c.bf16 %v7054_v25, %v7051_v22  ;;  %v4017_v33 = vadd.f32 %v5714_v29, %v5158_v6  ;;  %v4090_v35 = vrot.slane %v7054_v25, 1  ;;  %v6406_v4 = vld [vmem:[#allocation2 + $0xa10] sm:$0xff]  }
 0xb4f   :  { %v4078_v34 = vrot.slane %v7054_v25, 7  ;;  %v6408_v6 = vld [vmem:[#allocation2 + $0x9d0] sm:$0xff]  }
 0xb50   :  { %v4071_v31 = vadd.f32 %v4063_v32, %v6983_v41  ;;  %4337 = vmatprep.mubr.bf16.mxu0 %v4102_v30  ;;  %v4066_v26 = vadd.f32 %v6040_v11, %v4017_v33  ;;  %v4095_v36 = vsel %vm125_vm1, %v4089_v57, %v4090_v35  ;;  %v6413_v11 = vld [vmem:[#allocation2 + $0xa60] sm:$0xff]  }
 0xb52   :  { %v7061_v39 = vadd.f32 %v4071_v31, %v6828_v58  ;;  %v4072_v55 = vadd.f32 %v4066_v26, %v6988_v42  ;;  %v4077_v58 = vrot.slane %v7051_v22, 7 }
 0xb54   :  { %v4091_v40 = vrot.slane %v7061_v39, 1  ;;  %v7068_v37 = vadd.f32 %v4072_v55, %v6834_v10  ;;  %v4083_v28 = vsel %vm112_vm0, %v4077_v58, %v4078_v34  ;;  %v4079_v59 = vrot.slane %v7061_v39, 7 }
 0xb56   :  { %v4094_v41 = vsel %vm125_vm1, %v4090_v35, %v4091_v40  ;;  %v4080_v43 = vrot.slane %v7068_v37, 7  ;;  %v4092_v42 = vrot.slane %v7068_v37, 1  ;;  %v4105_v44 = vpack.c.bf16 %v7068_v37, %v7061_v39 }
 0xb57   :  { %v5227_v47 = vpack.c.bf16 %v4094_v41, %v4095_v36  ;;  %v4082_v1 = vsel %vm112_vm0, %v4078_v34, %v4079_v59 }
 0xb58   :  { %v4084_v10 = vsel %vm112_vm0, %v4080_v43, %v4077_v58  ;;  %v4093_v48 = vsel %vm125_vm1, %v4091_v40, %v4092_v42  ;;  %v4096_v49 = vsel %vm125_vm1, %v4092_v42, %v4089_v57  ;;  %v4081_v0 = vsel %vm112_vm0, %v4079_v59, %v4080_v43 }
 0xb59   :  { %6057 = vmatprep.mubr.msk.bf16.mxu1 %vm6579_vm7, %v5227_v47  ;;  %v5221_v50 = vpack.c.bf16 %v4083_v28, %v4084_v10  ;;  %v5230_v53 = vpack.c.bf16 %v4096_v49, %v4093_v48  ;;  %v5224_v51 = vpack.c.bf16 %v4081_v0, %v4082_v1 }
 0xb5b   :  { %5222 = vmatmul.mubr.msk.bf16.vlgmr.msra.gmra.mrb[96].mxu0 %vm6566_vm6, %v5221_v50  ;;  %6058 = vmatmul.mubr.msk.bf16.vlgmr.msra.gmra.mrb[48].mxu1 %vm6588_vm9, %v5230_v53 }
 0xb5c   :  { %4345 = vmatprep.mubr.bf16.mxu0 %v4105_v44  ;;  %5764 = vmatpush3.bf16.msra.mxu0 %v6402_v46 }
 0xb5d   :  { %6062 = vmatpush3.bf16.msra.mxu1 %v7045_v61  ;;  %5765 = vmatprep.subr.bf16.mxu0 %v6403_v38  ;;  %v6409_v61 = vld [vmem:[#allocation2 + $0xa18] sm:$0xff]  }
 0xb5e   :  { %6063 = vmatprep.subr.bf16.mxu1 %v6404_v54 }
 0xb60   :  { %5766 = vmatpush3.bf16.msra.mxu0 %v6405_v60 }
 0xb61   :  { %6064 = vmatpush3.bf16.msra.mxu1 %v6404_v54  ;;  %5767 = vmatprep.subr.bf16.mxu0 %v6406_v4 }
 0xb62   :  { %6065 = vmatprep.subr.bf16.mxu1 %v6407_v5 }
 0xb63   :  { %5225 = vmatmul.mubr.msk.bf16.gmra.mrb[100].mxu0 %vm6597_vm10, %v5224_v51 }
 0xb64   :  { %5768 = vmatpush3.bf16.msra.mxu0 %v6408_v6 }
 0xb65   :  { %6066 = vmatpush3.bf16.msra.mxu1 %v6407_v5  ;;  %5769 = vmatprep.subr.bf16.mxu0 %v6409_v61 }
 0xb66   :  { %6067 = vmatprep.subr.bf16.mxu1 %v6410_v9 }
 0xb68   :  { %5770 = vmatpush3.bf16.msra.mxu0 %v6411_v2 }
 0xb69   :  { %6068 = vmatpush3.bf16.msra.mxu1 %v6410_v9  ;;  %5771 = vmatprep.subr.bf16.mxu0 %v6412_v13 }
 0xb6a   :  { %6069 = vmatprep.subr.bf16.mxu1 %v6413_v11 }
 0xb6c   :  { %5772 = vmatpush3.bf16.msra.mxu0 %v6414_v7 }
 0xb6d   :  { %6070 = vmatpush3.bf16.msra.mxu1 %v6413_v11  ;;  %5773 = vmatprep.subr.bf16.mxu0 %v6415_v16 }
 0xb6e   :  { %6071 = vmatprep.subr.bf16.mxu1 %v6416_v3 }
 0xb70   :  { %5774 = vmatpush3.bf16.msra.mxu0 %v6417_v14 }
 0xb71   :  { %6072 = vmatpush3.bf16.msra.mxu1 %v6416_v3  ;;  %5775 = vmatprep.subr.bf16.mxu0 %v6418_v15 }
 0xb72   :  { %6073 = vmatprep.subr.bf16.mxu1 %v6419_v21 }
 0xb74   :  { %5776 = vmatpush3.bf16.msra.mxu0 %v6420_v62 }
 0xb75   :  { %6074 = vmatpush3.bf16.msra.mxu1 %v6419_v21  ;;  %5777 = vmatprep.subr.bf16.mxu0 %v6421_v19 }
 0xb76   :  { %6075 = vmatprep.subr.bf16.mxu1 %v6422_v20 }
 0xb78   :  { %5778 = vmatpush3.bf16.msra.mxu0 %v6423_v18 }
 0xb79   :  { %6076 = vmatpush3.bf16.msra.mxu1 %v6422_v20  ;;  %v5232_v20 = vld [vmem:[#allocation4 + $0xd] ss:$0 sm:$0xff] }
 0xc2e   :  { %v5741_v17 = vpop.f32.mrb[96].mxu0  ;;  %v6059_v23 = vpop.f32.mrb[48].mxu1 }
 0xc2f   :  { %v5742_v24 = vpop.f32.mrb[97].mxu0  ;;  %v4388_v27 = vpop.f32.mrb[49].mxu1 }
 0xc30   :  { %v5743_v29 = vadd.f32 %v5742_v24, %v5741_v17  ;;  %v5744_v32 = vpop.f32.mrb[98].mxu0  ;;  %v6060_v30 = vpop.f32.mrb[50].mxu1 }
 0xc31   :  { %v5745_v33 = vpop.f32.mrb[99].mxu0  ;;  %v4391_v31 = vpop.f32.mrb[51].mxu1 }
 0xc32   :  { %v4340_v26 = vadd.f32 %v5743_v29, %v5195_v8  ;;  %v5746_v35 = vadd.f32 %v5745_v33, %v5744_v32 }
 0xc34   :  { %v4389_v55 = vadd.f32 %v4388_v27, %v4340_v26  ;;  %v4343_v57 = vadd.f32 %v5746_v35, %v5195_v8 }
 0xc36   :  { %v4403_v40 = vmax.f32 %v4389_v55, 0.0  ;;  %v4392_v34 = vadd.f32 %v4391_v31, %v4343_v57  ;;  %v5747_v41 = vpop.f32.mrb[100].mxu0  ;;  %v6428_v31 = vld [vmem:[%s7153_s0] sm:$0xff] }
 0xc37   :  { %v5748_v36 = vpop.f32.mrb[101].mxu0 }
 0xc38   :  { %v4404_v58 = vmax.f32 %v4392_v34, 0.0  ;;  %v5749_v43 = vadd.f32 %v5748_v36, %v5747_v41  ;;  %v5750_v42 = vpop.f32.mrb[102].mxu0  ;;  %v4407_v47 = vrot.slane %v4403_v40, 7  ;;  %v4419_v28 = vrot.slane %v4403_v40, 1 }
 0xc39   :  { %v5751_v10 = vpop.f32.mrb[103].mxu0 }
 0xc3a   :  { %v4408_v48 = vrot.slane %v4404_v58, 7  ;;  %v4420_v49 = vrot.slane %v4404_v58, 1  ;;  %v4348_v46 = vadd.f32 %v5749_v43, %v5195_v8  ;;  %v5752_v50 = vadd.f32 %v5751_v10, %v5750_v42 }
 0xc3b   :  { %v4432_v53 = vpack.c.bf16 %v4404_v58, %v4403_v40 }
 0xc3c   :  { %v4413_v38 = vsel %vm112_vm0, %v4407_v47, %v4408_v48  ;;  %v4397_v44 = vadd.f32 %v6059_v23, %v4348_v46  ;;  %v4351_v54 = vadd.f32 %v5752_v50, %v5195_v8  ;;  %v4425_v59 = vsel %vm125_vm1, %v4419_v28, %v4420_v49 }
 0xc3d   :  { %4667 = vmatprep.mubr.bf16.mxu0 %v4432_v53 }
 0xc3e   :  { %v4405_v60 = vmax.f32 %v4397_v44, 0.0  ;;  %v4400_v0 = vadd.f32 %v6060_v30, %v4351_v54 }
 0xc40   :  { %v4409_v1 = vrot.slane %v4405_v60, 7  ;;  %v4421_v51 = vrot.slane %v4405_v60, 1  ;;  %v4406_v4 = vmax.f32 %v4400_v0, 0.0 }
 0xc42   :  { %v4410_v5 = vrot.slane %v4406_v4, 7  ;;  %v4422_v6 = vrot.slane %v4406_v4, 1  ;;  %v4424_v61 = vsel %vm125_vm1, %v4420_v49, %v4421_v51  ;;  %v4435_v9 = vpack.c.bf16 %v4406_v4, %v4405_v60 }
 0xc43   :  { %v5264_v2 = vpack.c.bf16 %v4424_v61, %v4425_v59  ;;  %v4412_v13 = vsel %vm112_vm0, %v4408_v48, %v4409_v1  ;;  %v6431_v48 = vld [vmem:[%s7153_s0 + $0x18] sm:$0xff] }
 0xc44   :  { %v4414_v11 = vsel %vm112_vm0, %v4410_v5, %v4407_v47  ;;  %v4423_v7 = vsel %vm125_vm1, %v4421_v51, %v4422_v6  ;;  %v4426_v16 = vsel %vm125_vm1, %v4422_v6, %v4419_v28  ;;  %v4411_v3 = vsel %vm112_vm0, %v4409_v1, %v4410_v5  ;;  %v6430_v47 = vld [vmem:[%s7153_s0 + $0x10] sm:$0xff] }
 0xc45   :  { %v5258_v14 = vpack.c.bf16 %v4413_v38, %v4414_v11  ;;  %6077 = vmatprep.mubr.msk.bf16.mxu1 %vm6579_vm7, %v5264_v2  ;;  %v5267_v15 = vpack.c.bf16 %v4426_v16, %v4423_v7  ;;  %v5261_v21 = vpack.c.bf16 %v4411_v3, %v4412_v13 }
 0xc47   :  { %5259 = vmatmul.mubr.msk.bf16.vlgmr.msra.gmra.mrb[104].mxu0 %vm6566_vm6, %v5258_v14  ;;  %6078 = vmatmul.mubr.msk.bf16.vlgmr.msra.gmra.mrb[52].mxu1 %vm6588_vm9, %v5267_v15 }
 0xc48   :  { %4675 = vmatprep.mubr.bf16.mxu0 %v4435_v9 }
 0xc4f   :  { %5262 = vmatmul.mubr.msk.bf16.gmra.mrb[108].mxu0 %vm6597_vm10, %v5261_v21 }
 0xd1a   :  { %v5779_v62 = vpop.f32.mrb[104].mxu0  ;;  %v6079_v19 = vpop.f32.mrb[52].mxu1 }
 0xd1b   :  { %v5780_v12 = vpop.f32.mrb[105].mxu0  ;;  %v4718_v18 = vpop.f32.mrb[53].mxu1 }
 0xd1c   :  { %v5781_v17 = vadd.f32 %v5780_v12, %v5779_v62  ;;  %v5782_v52 = vpop.f32.mrb[106].mxu0  ;;  %v6080_v23 = vpop.f32.mrb[54].mxu1 }
 0xd1d   :  { %v5783_v24 = vpop.f32.mrb[107].mxu0  ;;  %v4721_v8 = vpop.f32.mrb[55].mxu1 }
 0xd1e   :  { %v4670_v27 = vadd.f32 %v5781_v17, %v5232_v20  ;;  %v5784_v45 = vadd.f32 %v5783_v24, %v5782_v52 }
 0xd20   :  { %v4719_v29 = vadd.f32 %v4718_v18, %v4670_v27  ;;  %v4673_v32 = vadd.f32 %v5784_v45, %v5232_v20 }
 0xd22   :  { %v4733_v56 = vadd.f32 %v4719_v29, %v7051_v22  ;;  %v4722_v30 = vadd.f32 %v4721_v8, %v4673_v32  ;;  %v5785_v33 = vpop.f32.mrb[108].mxu0  ;;  %v6429_v22 = vld [vmem:[%s7153_s0 + $0x8] sm:$0xff] }
 0xd23   :  { %v5786_v63 = vpop.f32.mrb[109].mxu0 }
 0xd24   :  { %v4737_v26 = vadd.f32 %v6428_v31, %v4733_v56  ;;  %v4734_v35 = vadd.f32 %v4722_v30, %v7054_v25  ;;  %v5787_v55 = vadd.f32 %v5786_v63, %v5785_v33  ;;  %v5788_v57 = vpop.f32.mrb[110].mxu0 }
 0xd25   :  { %v5789_v40 = vpop.f32.mrb[111].mxu0 }
 0xd26   :  { %4741 = vst [vmem:[%s7156_s3] sm:$0xff] %v4737_v26  ;;  %v4738_v34 = vadd.f32 %v6429_v22, %v4734_v35  ;;  %v4678_v41 = vadd.f32 %v5787_v55, %v5232_v20  ;;  %v5790_v36 = vadd.f32 %v5789_v40, %v5788_v57 }
 0xd28   :  { %4742 = vst [vmem:[%s7156_s3 + $0x8] sm:$0xff] %v4738_v34  ;;  %v4727_v58 = vadd.f32 %v6079_v19, %v4678_v41  ;;  %v4681_v25 = vadd.f32 %v5790_v36, %v5232_v20 }
 0xd2a   :  { %v4735_v43 = vadd.f32 %v4727_v58, %v7061_v39  ;;  %v4730_v42 = vadd.f32 %v6080_v23, %v4681_v25 }
 0xd2c   :  { %v4739_v28 = vadd.f32 %v6430_v47, %v4735_v43  ;;  %v4736_v10 = vadd.f32 %v4730_v42, %v7068_v37 }
 0xd2e   :  { %4743 = vst [vmem:[%s7156_s3 + $0x10] sm:$0xff] %v4739_v28  ;;  %v4740_v49 = vadd.f32 %v6431_v48, %v4736_v10 }
 0xd30   :  { %4744 = vst [vmem:[%s7156_s3 + $0x18] sm:$0xff] %v4740_v49 }
 0xd31   :  { %4749 = vsyncpa [#allocation3], 1 }
 0xd32   :  { %4750 = vsyncpa [#allocation5], 1 }

</bundles_post_ra>
